<compile_context>
chip_gen: v6e
topology: v6e:2x2x1
jax: 0.10.0
libtpu: 0.0.40
codegen_flags: <defaults>
</compile_context>

<pallas_src>
import functools
import math

import jax
import jax.numpy as jnp
from jax.experimental import pallas as pl
from jax.experimental.pallas import tpu as pltpu


# ---------------------------------------------------------------------------
# Fused kernel: QKV projection + per-head softmax attention + gamma*out + x.
# Blocks are channel-first: x/out (C, N), weight (3C, C), bias (3C, 1).
# ---------------------------------------------------------------------------
def _mha_fused_kernel(x_ref, w_ref, b_ref, g_ref, o_ref, *, num_heads, head_dim):
    C = num_heads * head_dim
    x = x_ref[...]                                           # (C, N) f32

    # Fused QKV projection on the MXU: bf16 operands, f32 accumulation.
    qkv = jax.lax.dot_general(
        w_ref[...], x.astype(jnp.bfloat16),
        dimension_numbers=(((1,), (0,)), ((), ())),
        preferred_element_type=jnp.float32) + b_ref[...]     # (3C, N) f32

    gamma = g_ref[0]                                         # SMEM scalar
    scale = 1.0 / math.sqrt(head_dim)

    for h in range(num_heads):                               # unrolled, sublane-aligned slices
        lo = h * head_dim
        # Fold the softmax scale into q (hd x N) instead of the (N x N) scores.
        q = (qkv[lo:lo + head_dim, :] * scale).astype(jnp.bfloat16)        # (hd, N)
        k = qkv[C + lo:C + lo + head_dim, :].astype(jnp.bfloat16)          # (hd, N)
        v = qkv[2 * C + lo:2 * C + lo + head_dim, :].astype(jnp.bfloat16)  # (hd, N)

        # energy[n, m] = sum_d q[d, n] * k[d, m]
        e = jax.lax.dot_general(q, k, (((0,), (0,)), ((), ())),
                                preferred_element_type=jnp.float32)        # (N, N)
        m = jnp.max(e, axis=-1, keepdims=True)
        p = jnp.exp(e - m)
        a = p * pl.reciprocal(jnp.sum(p, axis=-1, keepdims=True), approx=True)

        # out_ch[d, n] = sum_m v[d, m] * a[n, m]   (channel-first head output)
        out_h = jax.lax.dot_general(v, a.astype(jnp.bfloat16),
                                    (((1,), (1,)), ((), ())),
                                    preferred_element_type=jnp.float32)    # (hd, N)

        o_ref[lo:lo + head_dim, :] = (gamma * out_h
                                      + x[lo:lo + head_dim, :]).astype(o_ref.dtype)


def multi_head_attention_module(x, w_qkv, b_qkv, gamma, *, num_heads):
    """x: (B, C, D, H, W); w_qkv: (3C, C) = [Wq; Wk; Wv] (torch 1x1x1-conv
    weights, squeezed); b_qkv: (3C,); gamma: (1,).  Returns (B, C, D, H, W)."""
    B, C, D, H, W = x.shape
    N = D * H * W
    assert C % num_heads == 0, "in_channels should be divisible by num_heads"
    head_dim = C // num_heads
    # TODO(synk): general (non TPU-tileable) shapes would need padding + softmax
    # masking; this kernel assumes C % 8 == 0, N % 128 == 0, head_dim % 8 == 0.
    assert C % 8 == 0 and N % 128 == 0 and head_dim % 8 == 0

    x2d = x.reshape(B * C, N).astype(jnp.float32)  # channel-first, free reshape
    w = w_qkv.astype(jnp.bfloat16)                 # native (3C, C), no transpose
    b = b_qkv.reshape(3 * C, 1).astype(jnp.float32)
    g = jnp.asarray(gamma, jnp.float32).reshape(1)

    kernel = functools.partial(_mha_fused_kernel,
                               num_heads=num_heads, head_dim=head_dim)
    out = pl.pallas_call(
        kernel,
        out_shape=jax.ShapeDtypeStruct((B * C, N), jnp.float32),
        grid_spec=pltpu.PrefetchScalarGridSpec(
            num_scalar_prefetch=0,
            grid=(B,),
            in_specs=[
                pl.BlockSpec((C, N), lambda i: (i, 0)),             # x per batch
                pl.BlockSpec((3 * C, C), lambda i: (0, 0)),         # fused QKV weight
                pl.BlockSpec((3 * C, 1), lambda i: (0, 0)),         # fused bias
                pl.BlockSpec(memory_space=pltpu.MemorySpace.SMEM),  # gamma scalar
            ],
            out_specs=pl.BlockSpec((C, N), lambda i: (i, 0)),
        ),
        compiler_params=pltpu.CompilerParams(
            dimension_semantics=("parallel",)),
    )(x2d, w, b, g)
    return out.reshape(B, C, D, H, W)


# ---------------------------------------------------------------------------
# Pure-JAX f32 reference (mirrors the PyTorch forward exactly).
# ---------------------------------------------------------------------------
def mha_reference(x, w_qkv, b_qkv, gamma, *, num_heads):
    B, C, D, H, W = x.shape
    N = D * H * W
    hd = C // num_heads
    wq, wk, wv = jnp.split(w_qkv, 3, axis=0)
    bq, bk, bv = jnp.split(b_qkv, 3, axis=0)
    xf = x.reshape(B, C, N)

    def proj(wm, bm):
        return jnp.einsum("oc,bcn->bon", wm, xf) + bm[None, :, None]

    q = proj(wq, bq).reshape(B, num_heads, hd, N).transpose(0, 1, 3, 2)
    k = proj(wk, bk).reshape(B, num_heads, hd, N)
    v = proj(wv, bv).reshape(B, num_heads, hd, N).transpose(0, 1, 3, 2)
    e = jnp.einsum("bhnd,bhdm->bhnm", q, k) / math.sqrt(hd)
    a = jax.nn.softmax(e, axis=-1)
    o = jnp.einsum("bhnm,bhmd->bhnd", a, v)
    o = o.transpose(0, 1, 3, 2).reshape(B, C, D, H, W)
    return gamma * o + x


if __name__ == "__main__":
    import numpy as np

    B, C, D, H, W = 2, 64, 2, 8, 8           # N = D*H*W = 128
    NUM_HEADS = 8                            # head_dim = 8

    key = jax.random.PRNGKey(0)
    kx, kq, kk, kv, kb = jax.random.split(key, 5)
    bound = 1.0 / math.sqrt(C)               # PyTorch Conv3d default init bound
    x = jax.random.normal(kx, (B, C, D, H, W), jnp.float32)
    wq = jax.random.uniform(kq, (C, C), jnp.float32, -bound, bound)
    wk = jax.random.uniform(kk, (C, C), jnp.float32, -bound, bound)
    wv = jax.random.uniform(kv, (C, C), jnp.float32, -bound, bound)
    biases = jax.random.uniform(kb, (3, C), jnp.float32, -bound, bound)
    w_qkv = jnp.concatenate([wq, wk, wv], axis=0)        # (3C, C)
    b_qkv = biases.reshape(3 * C)                        # (3C,)

    fwd = jax.jit(functools.partial(multi_head_attention_module,
                                    num_heads=NUM_HEADS))

    # gamma = 0 (PyTorch init): module output must equal the input.
    gamma0 = jnp.zeros((1,), jnp.float32)
    out0 = jax.block_until_ready(fwd(x, w_qkv, b_qkv, gamma0))
    np.testing.assert_allclose(np.asarray(out0), np.asarray(x), rtol=0, atol=1e-6)

    # gamma = 0.5: exercises the attention path; compare vs f32 reference
    # (bf16 MXU operands + approx reciprocal -> loose tolerance).
    gamma1 = jnp.full((1,), 0.5, jnp.float32)
    out1 = jax.block_until_ready(fwd(x, w_qkv, b_qkv, gamma1))
    ref1 = mha_reference(x, w_qkv, b_qkv, gamma1, num_heads=NUM_HEADS)
    assert out1.shape == x.shape
    assert bool(jnp.all(jnp.isfinite(out1)))
    np.testing.assert_allclose(np.asarray(out1), np.asarray(ref1),
                               rtol=2e-2, atol=2e-2)

    print("KERNEL_OK")
</pallas_src>

<mosaic_0001>
module attributes {stable_mosaic.version = 11 : i64} {
  func.func @_mha_fused_kernel(%arg0: i32, %arg1: memref<64x128xf32, #tpu.memory_space<vmem>>, %arg2: memref<192x64xbf16, #tpu.memory_space<vmem>>, %arg3: memref<192x1xf32, #tpu.memory_space<vmem>>, %arg4: memref<1xf32, #tpu.memory_space<smem>>, %arg5: memref<64x128xf32, #tpu.memory_space<vmem>>) attributes {dimension_semantics = [#tpu.dimension_semantics<parallel>], iteration_bounds = array<i64: 2>, scalar_prefetch = 0 : i64, scratch_operands = 0 : i64, tpu.core_type = #tpu.core_type<tc>, window_params = [{transform_indices = @transform_0, window_bounds = array<i64: 64, 128>}, {pipeline_mode = #tpu.pipeline_mode<synchronous>, transform_indices = @transform_1, window_bounds = array<i64: 192, 64>}, {pipeline_mode = #tpu.pipeline_mode<synchronous>, transform_indices = @transform_2, window_bounds = array<i64: 192, 1>}, {transform_indices = @transform_3, window_bounds = array<i64: 1>}, {transform_indices = @transform_4, window_bounds = array<i64: 64, 128>}]} {
    %c0 = arith.constant 0 : index
    %c0_0 = arith.constant 0 : index
    %0 = vector.load %arg1[%c0, %c0_0] : memref<64x128xf32, #tpu.memory_space<vmem>>, vector<64x128xf32>
    %c0_1 = arith.constant 0 : index
    %c0_2 = arith.constant 0 : index
    %1 = vector.load %arg2[%c0_1, %c0_2] : memref<192x64xbf16, #tpu.memory_space<vmem>>, vector<192x64xbf16>
    %2 = arith.truncf %0 : vector<64x128xf32> to vector<64x128xbf16>
    %cst = arith.constant dense<0.000000e+00> : vector<192x128xf32>
    %3 = tpu.matmul %1, %2, %cst {dimension_numbers = #tpu.dot_dimension_numbers<[1], [0], [0], [1], [0, 0, 1, 1], [], []>} : vector<192x64xbf16>, vector<64x128xbf16>, vector<192x128xf32> -> vector<192x128xf32>
    %c0_3 = arith.constant 0 : index
    %c0_4 = arith.constant 0 : index
    %4 = vector.load %arg3[%c0_3, %c0_4] : memref<192x1xf32, #tpu.memory_space<vmem>>, vector<192x1xf32>
    %5 = vector.broadcast %4 : vector<192x1xf32> to vector<192x128xf32>
    %6 = arith.addf %3, %5 : vector<192x128xf32>
    %c0_5 = arith.constant 0 : index
    %7 = memref.load %arg4[%c0_5] : memref<1xf32, #tpu.memory_space<smem>>
    %8 = vector.extract_strided_slice %6 {offsets = [0, 0], sizes = [8, 128], strides = [1, 1]} : vector<192x128xf32> to vector<8x128xf32>
    %cst_6 = arith.constant 0.353553385 : f32
    %9 = vector.broadcast %cst_6 : f32 to vector<8x128xf32>
    %10 = arith.mulf %8, %9 : vector<8x128xf32>
    %11 = arith.truncf %10 : vector<8x128xf32> to vector<8x128xbf16>
    %12 = vector.extract_strided_slice %6 {offsets = [64, 0], sizes = [8, 128], strides = [1, 1]} : vector<192x128xf32> to vector<8x128xf32>
    %13 = arith.truncf %12 : vector<8x128xf32> to vector<8x128xbf16>
    %14 = vector.extract_strided_slice %6 {offsets = [128, 0], sizes = [8, 128], strides = [1, 1]} : vector<192x128xf32> to vector<8x128xf32>
    %15 = arith.truncf %14 : vector<8x128xf32> to vector<8x128xbf16>
    %cst_7 = arith.constant dense<0.000000e+00> : vector<128x128xf32>
    %16 = tpu.matmul %11, %13, %cst_7 {dimension_numbers = #tpu.dot_dimension_numbers<[0], [0], [1], [1], [0, 1, 1, 1], [], []>} : vector<8x128xbf16>, vector<8x128xbf16>, vector<128x128xf32> -> vector<128x128xf32>
    %cst_8 = arith.constant dense<0xFF800000> : vector<128xf32>
    %17 = vector.multi_reduction <maximumf>, %16, %cst_8 [1] : vector<128x128xf32> to vector<128xf32>
    %18 = vector.shape_cast %17 : vector<128xf32> to vector<128x1xf32>
    %19 = vector.broadcast %18 : vector<128x1xf32> to vector<128x128xf32>
    %20 = arith.subf %16, %19 : vector<128x128xf32>
    %21 = math.exp %20 : vector<128x128xf32>
    %cst_9 = arith.constant dense<0.000000e+00> : vector<128xf32>
    %22 = vector.multi_reduction <add>, %21, %cst_9 [1] : vector<128x128xf32> to vector<128xf32>
    %23 = vector.shape_cast %22 : vector<128xf32> to vector<128x1xf32>
    %24 = tpu.reciprocal %23 {approx = true} : vector<128x1xf32> -> vector<128x1xf32>
    %25 = vector.broadcast %24 : vector<128x1xf32> to vector<128x128xf32>
    %26 = arith.mulf %21, %25 : vector<128x128xf32>
    %27 = arith.truncf %26 : vector<128x128xf32> to vector<128x128xbf16>
    %cst_10 = arith.constant dense<0.000000e+00> : vector<8x128xf32>
    %28 = tpu.matmul %15, %27, %cst_10 {dimension_numbers = #tpu.dot_dimension_numbers<[1], [1], [0], [0], [0, 0, 1, 0], [], []>} : vector<8x128xbf16>, vector<128x128xbf16>, vector<8x128xf32> -> vector<8x128xf32>
    %29 = vector.broadcast %7 : f32 to vector<8x128xf32>
    %30 = arith.mulf %29, %28 : vector<8x128xf32>
    %31 = vector.extract_strided_slice %0 {offsets = [0, 0], sizes = [8, 128], strides = [1, 1]} : vector<64x128xf32> to vector<8x128xf32>
    %32 = arith.addf %30, %31 : vector<8x128xf32>
    %c0_11 = arith.constant 0 : index
    %c0_12 = arith.constant 0 : index
    %33 = vector.load %arg5[%c0_11, %c0_12] : memref<64x128xf32, #tpu.memory_space<vmem>>, vector<8x128xf32>
    tpu.vector_store %arg5[%c0_11, %c0_12], %32 {strides = array<i32>} : memref<64x128xf32, #tpu.memory_space<vmem>>, vector<8x128xf32>,
    %34 = vector.extract_strided_slice %6 {offsets = [8, 0], sizes = [8, 128], strides = [1, 1]} : vector<192x128xf32> to vector<8x128xf32>
    %cst_13 = arith.constant 0.353553385 : f32
    %35 = vector.broadcast %cst_13 : f32 to vector<8x128xf32>
    %36 = arith.mulf %34, %35 : vector<8x128xf32>
    %37 = arith.truncf %36 : vector<8x128xf32> to vector<8x128xbf16>
    %38 = vector.extract_strided_slice %6 {offsets = [72, 0], sizes = [8, 128], strides = [1, 1]} : vector<192x128xf32> to vector<8x128xf32>
    %39 = arith.truncf %38 : vector<8x128xf32> to vector<8x128xbf16>
    %40 = vector.extract_strided_slice %6 {offsets = [136, 0], sizes = [8, 128], strides = [1, 1]} : vector<192x128xf32> to vector<8x128xf32>
    %41 = arith.truncf %40 : vector<8x128xf32> to vector<8x128xbf16>
    %cst_14 = arith.constant dense<0.000000e+00> : vector<128x128xf32>
    %42 = tpu.matmul %37, %39, %cst_14 {dimension_numbers = #tpu.dot_dimension_numbers<[0], [0], [1], [1], [0, 1, 1, 1], [], []>} : vector<8x128xbf16>, vector<8x128xbf16>, vector<128x128xf32> -> vector<128x128xf32>
    %cst_15 = arith.constant dense<0xFF800000> : vector<128xf32>
    %43 = vector.multi_reduction <maximumf>, %42, %cst_15 [1] : vector<128x128xf32> to vector<128xf32>
    %44 = vector.shape_cast %43 : vector<128xf32> to vector<128x1xf32>
    %45 = vector.broadcast %44 : vector<128x1xf32> to vector<128x128xf32>
    %46 = arith.subf %42, %45 : vector<128x128xf32>
    %47 = math.exp %46 : vector<128x128xf32>
    %cst_16 = arith.constant dense<0.000000e+00> : vector<128xf32>
    %48 = vector.multi_reduction <add>, %47, %cst_16 [1] : vector<128x128xf32> to vector<128xf32>
    %49 = vector.shape_cast %48 : vector<128xf32> to vector<128x1xf32>
    %50 = tpu.reciprocal %49 {approx = true} : vector<128x1xf32> -> vector<128x1xf32>
    %51 = vector.broadcast %50 : vector<128x1xf32> to vector<128x128xf32>
    %52 = arith.mulf %47, %51 : vector<128x128xf32>
    %53 = arith.truncf %52 : vector<128x128xf32> to vector<128x128xbf16>
    %cst_17 = arith.constant dense<0.000000e+00> : vector<8x128xf32>
    %54 = tpu.matmul %41, %53, %cst_17 {dimension_numbers = #tpu.dot_dimension_numbers<[1], [1], [0], [0], [0, 0, 1, 0], [], []>} : vector<8x128xbf16>, vector<128x128xbf16>, vector<8x128xf32> -> vector<8x128xf32>
    %55 = vector.broadcast %7 : f32 to vector<8x128xf32>
    %56 = arith.mulf %55, %54 : vector<8x128xf32>
    %57 = vector.extract_strided_slice %0 {offsets = [8, 0], sizes = [8, 128], strides = [1, 1]} : vector<64x128xf32> to vector<8x128xf32>
    %58 = arith.addf %56, %57 : vector<8x128xf32>
    %c8 = arith.constant 8 : index
    %c0_18 = arith.constant 0 : index
    %59 = vector.load %arg5[%c8, %c0_18] : memref<64x128xf32, #tpu.memory_space<vmem>>, vector<8x128xf32>
    tpu.vector_store %arg5[%c8, %c0_18], %58 {strides = array<i32>} : memref<64x128xf32, #tpu.memory_space<vmem>>, vector<8x128xf32>,
    %60 = vector.extract_strided_slice %6 {offsets = [16, 0], sizes = [8, 128], strides = [1, 1]} : vector<192x128xf32> to vector<8x128xf32>
    %cst_19 = arith.constant 0.353553385 : f32
    %61 = vector.broadcast %cst_19 : f32 to vector<8x128xf32>
    %62 = arith.mulf %60, %61 : vector<8x128xf32>
    %63 = arith.truncf %62 : vector<8x128xf32> to vector<8x128xbf16>
    %64 = vector.extract_strided_slice %6 {offsets = [80, 0], sizes = [8, 128], strides = [1, 1]} : vector<192x128xf32> to vector<8x128xf32>
    %65 = arith.truncf %64 : vector<8x128xf32> to vector<8x128xbf16>
    %66 = vector.extract_strided_slice %6 {offsets = [144, 0], sizes = [8, 128], strides = [1, 1]} : vector<192x128xf32> to vector<8x128xf32>
    %67 = arith.truncf %66 : vector<8x128xf32> to vector<8x128xbf16>
    %cst_20 = arith.constant dense<0.000000e+00> : vector<128x128xf32>
    %68 = tpu.matmul %63, %65, %cst_20 {dimension_numbers = #tpu.dot_dimension_numbers<[0], [0], [1], [1], [0, 1, 1, 1], [], []>} : vector<8x128xbf16>, vector<8x128xbf16>, vector<128x128xf32> -> vector<128x128xf32>
    %cst_21 = arith.constant dense<0xFF800000> : vector<128xf32>
    %69 = vector.multi_reduction <maximumf>, %68, %cst_21 [1] : vector<128x128xf32> to vector<128xf32>
    %70 = vector.shape_cast %69 : vector<128xf32> to vector<128x1xf32>
    %71 = vector.broadcast %70 : vector<128x1xf32> to vector<128x128xf32>
    %72 = arith.subf %68, %71 : vector<128x128xf32>
    %73 = math.exp %72 : vector<128x128xf32>
    %cst_22 = arith.constant dense<0.000000e+00> : vector<128xf32>
    %74 = vector.multi_reduction <add>, %73, %cst_22 [1] : vector<128x128xf32> to vector<128xf32>
    %75 = vector.shape_cast %74 : vector<128xf32> to vector<128x1xf32>
    %76 = tpu.reciprocal %75 {approx = true} : vector<128x1xf32> -> vector<128x1xf32>
    %77 = vector.broadcast %76 : vector<128x1xf32> to vector<128x128xf32>
    %78 = arith.mulf %73, %77 : vector<128x128xf32>
    %79 = arith.truncf %78 : vector<128x128xf32> to vector<128x128xbf16>
    %cst_23 = arith.constant dense<0.000000e+00> : vector<8x128xf32>
    %80 = tpu.matmul %67, %79, %cst_23 {dimension_numbers = #tpu.dot_dimension_numbers<[1], [1], [0], [0], [0, 0, 1, 0], [], []>} : vector<8x128xbf16>, vector<128x128xbf16>, vector<8x128xf32> -> vector<8x128xf32>
    %81 = vector.broadcast %7 : f32 to vector<8x128xf32>
    %82 = arith.mulf %81, %80 : vector<8x128xf32>
    %83 = vector.extract_strided_slice %0 {offsets = [16, 0], sizes = [8, 128], strides = [1, 1]} : vector<64x128xf32> to vector<8x128xf32>
    %84 = arith.addf %82, %83 : vector<8x128xf32>
    %c16 = arith.constant 16 : index
    %c0_24 = arith.constant 0 : index
    %85 = vector.load %arg5[%c16, %c0_24] : memref<64x128xf32, #tpu.memory_space<vmem>>, vector<8x128xf32>
    tpu.vector_store %arg5[%c16, %c0_24], %84 {strides = array<i32>} : memref<64x128xf32, #tpu.memory_space<vmem>>, vector<8x128xf32>,
    %86 = vector.extract_strided_slice %6 {offsets = [24, 0], sizes = [8, 128], strides = [1, 1]} : vector<192x128xf32> to vector<8x128xf32>
    %cst_25 = arith.constant 0.353553385 : f32
    %87 = vector.broadcast %cst_25 : f32 to vector<8x128xf32>
    %88 = arith.mulf %86, %87 : vector<8x128xf32>
    %89 = arith.truncf %88 : vector<8x128xf32> to vector<8x128xbf16>
    %90 = vector.extract_strided_slice %6 {offsets = [88, 0], sizes = [8, 128], strides = [1, 1]} : vector<192x128xf32> to vector<8x128xf32>
    %91 = arith.truncf %90 : vector<8x128xf32> to vector<8x128xbf16>
    %92 = vector.extract_strided_slice %6 {offsets = [152, 0], sizes = [8, 128], strides = [1, 1]} : vector<192x128xf32> to vector<8x128xf32>
    %93 = arith.truncf %92 : vector<8x128xf32> to vector<8x128xbf16>
    %cst_26 = arith.constant dense<0.000000e+00> : vector<128x128xf32>
    %94 = tpu.matmul %89, %91, %cst_26 {dimension_numbers = #tpu.dot_dimension_numbers<[0], [0], [1], [1], [0, 1, 1, 1], [], []>} : vector<8x128xbf16>, vector<8x128xbf16>, vector<128x128xf32> -> vector<128x128xf32>
    %cst_27 = arith.constant dense<0xFF800000> : vector<128xf32>
    %95 = vector.multi_reduction <maximumf>, %94, %cst_27 [1] : vector<128x128xf32> to vector<128xf32>
    %96 = vector.shape_cast %95 : vector<128xf32> to vector<128x1xf32>
    %97 = vector.broadcast %96 : vector<128x1xf32> to vector<128x128xf32>
    %98 = arith.subf %94, %97 : vector<128x128xf32>
    %99 = math.exp %98 : vector<128x128xf32>
    %cst_28 = arith.constant dense<0.000000e+00> : vector<128xf32>
    %100 = vector.multi_reduction <add>, %99, %cst_28 [1] : vector<128x128xf32> to vector<128xf32>
    %101 = vector.shape_cast %100 : vector<128xf32> to vector<128x1xf32>
    %102 = tpu.reciprocal %101 {approx = true} : vector<128x1xf32> -> vector<128x1xf32>
    %103 = vector.broadcast %102 : vector<128x1xf32> to vector<128x128xf32>
    %104 = arith.mulf %99, %103 : vector<128x128xf32>
    %105 = arith.truncf %104 : vector<128x128xf32> to vector<128x128xbf16>
    %cst_29 = arith.constant dense<0.000000e+00> : vector<8x128xf32>
    %106 = tpu.matmul %93, %105, %cst_29 {dimension_numbers = #tpu.dot_dimension_numbers<[1], [1], [0], [0], [0, 0, 1, 0], [], []>} : vector<8x128xbf16>, vector<128x128xbf16>, vector<8x128xf32> -> vector<8x128xf32>
    %107 = vector.broadcast %7 : f32 to vector<8x128xf32>
    %108 = arith.mulf %107, %106 : vector<8x128xf32>
    %109 = vector.extract_strided_slice %0 {offsets = [24, 0], sizes = [8, 128], strides = [1, 1]} : vector<64x128xf32> to vector<8x128xf32>
    %110 = arith.addf %108, %109 : vector<8x128xf32>
    %c24 = arith.constant 24 : index
    %c0_30 = arith.constant 0 : index
    %111 = vector.load %arg5[%c24, %c0_30] : memref<64x128xf32, #tpu.memory_space<vmem>>, vector<8x128xf32>
    tpu.vector_store %arg5[%c24, %c0_30], %110 {strides = array<i32>} : memref<64x128xf32, #tpu.memory_space<vmem>>, vector<8x128xf32>,
    %112 = vector.extract_strided_slice %6 {offsets = [32, 0], sizes = [8, 128], strides = [1, 1]} : vector<192x128xf32> to vector<8x128xf32>
    %cst_31 = arith.constant 0.353553385 : f32
    %113 = vector.broadcast %cst_31 : f32 to vector<8x128xf32>
    %114 = arith.mulf %112, %113 : vector<8x128xf32>
    %115 = arith.truncf %114 : vector<8x128xf32> to vector<8x128xbf16>
    %116 = vector.extract_strided_slice %6 {offsets = [96, 0], sizes = [8, 128], strides = [1, 1]} : vector<192x128xf32> to vector<8x128xf32>
    %117 = arith.truncf %116 : vector<8x128xf32> to vector<8x128xbf16>
    %118 = vector.extract_strided_slice %6 {offsets = [160, 0], sizes = [8, 128], strides = [1, 1]} : vector<192x128xf32> to vector<8x128xf32>
    %119 = arith.truncf %118 : vector<8x128xf32> to vector<8x128xbf16>
    %cst_32 = arith.constant dense<0.000000e+00> : vector<128x128xf32>
    %120 = tpu.matmul %115, %117, %cst_32 {dimension_numbers = #tpu.dot_dimension_numbers<[0], [0], [1], [1], [0, 1, 1, 1], [], []>} : vector<8x128xbf16>, vector<8x128xbf16>, vector<128x128xf32> -> vector<128x128xf32>
    %cst_33 = arith.constant dense<0xFF800000> : vector<128xf32>
    %121 = vector.multi_reduction <maximumf>, %120, %cst_33 [1] : vector<128x128xf32> to vector<128xf32>
    %122 = vector.shape_cast %121 : vector<128xf32> to vector<128x1xf32>
    %123 = vector.broadcast %122 : vector<128x1xf32> to vector<128x128xf32>
    %124 = arith.subf %120, %123 : vector<128x128xf32>
    %125 = math.exp %124 : vector<128x128xf32>
    %cst_34 = arith.constant dense<0.000000e+00> : vector<128xf32>
    %126 = vector.multi_reduction <add>, %125, %cst_34 [1] : vector<128x128xf32> to vector<128xf32>
    %127 = vector.shape_cast %126 : vector<128xf32> to vector<128x1xf32>
    %128 = tpu.reciprocal %127 {approx = true} : vector<128x1xf32> -> vector<128x1xf32>
    %129 = vector.broadcast %128 : vector<128x1xf32> to vector<128x128xf32>
    %130 = arith.mulf %125, %129 : vector<128x128xf32>
    %131 = arith.truncf %130 : vector<128x128xf32> to vector<128x128xbf16>
    %cst_35 = arith.constant dense<0.000000e+00> : vector<8x128xf32>
    %132 = tpu.matmul %119, %131, %cst_35 {dimension_numbers = #tpu.dot_dimension_numbers<[1], [1], [0], [0], [0, 0, 1, 0], [], []>} : vector<8x128xbf16>, vector<128x128xbf16>, vector<8x128xf32> -> vector<8x128xf32>
    %133 = vector.broadcast %7 : f32 to vector<8x128xf32>
    %134 = arith.mulf %133, %132 : vector<8x128xf32>
    %135 = vector.extract_strided_slice %0 {offsets = [32, 0], sizes = [8, 128], strides = [1, 1]} : vector<64x128xf32> to vector<8x128xf32>
    %136 = arith.addf %134, %135 : vector<8x128xf32>
    %c32 = arith.constant 32 : index
    %c0_36 = arith.constant 0 : index
    %137 = vector.load %arg5[%c32, %c0_36] : memref<64x128xf32, #tpu.memory_space<vmem>>, vector<8x128xf32>
    tpu.vector_store %arg5[%c32, %c0_36], %136 {strides = array<i32>} : memref<64x128xf32, #tpu.memory_space<vmem>>, vector<8x128xf32>,
    %138 = vector.extract_strided_slice %6 {offsets = [40, 0], sizes = [8, 128], strides = [1, 1]} : vector<192x128xf32> to vector<8x128xf32>
    %cst_37 = arith.constant 0.353553385 : f32
    %139 = vector.broadcast %cst_37 : f32 to vector<8x128xf32>
    %140 = arith.mulf %138, %139 : vector<8x128xf32>
    %141 = arith.truncf %140 : vector<8x128xf32> to vector<8x128xbf16>
    %142 = vector.extract_strided_slice %6 {offsets = [104, 0], sizes = [8, 128], strides = [1, 1]} : vector<192x128xf32> to vector<8x128xf32>
    %143 = arith.truncf %142 : vector<8x128xf32> to vector<8x128xbf16>
    %144 = vector.extract_strided_slice %6 {offsets = [168, 0], sizes = [8, 128], strides = [1, 1]} : vector<192x128xf32> to vector<8x128xf32>
    %145 = arith.truncf %144 : vector<8x128xf32> to vector<8x128xbf16>
    %cst_38 = arith.constant dense<0.000000e+00> : vector<128x128xf32>
    %146 = tpu.matmul %141, %143, %cst_38 {dimension_numbers = #tpu.dot_dimension_numbers<[0], [0], [1], [1], [0, 1, 1, 1], [], []>} : vector<8x128xbf16>, vector<8x128xbf16>, vector<128x128xf32> -> vector<128x128xf32>
    %cst_39 = arith.constant dense<0xFF800000> : vector<128xf32>
    %147 = vector.multi_reduction <maximumf>, %146, %cst_39 [1] : vector<128x128xf32> to vector<128xf32>
    %148 = vector.shape_cast %147 : vector<128xf32> to vector<128x1xf32>
    %149 = vector.broadcast %148 : vector<128x1xf32> to vector<128x128xf32>
    %150 = arith.subf %146, %149 : vector<128x128xf32>
    %151 = math.exp %150 : vector<128x128xf32>
    %cst_40 = arith.constant dense<0.000000e+00> : vector<128xf32>
    %152 = vector.multi_reduction <add>, %151, %cst_40 [1] : vector<128x128xf32> to vector<128xf32>
    %153 = vector.shape_cast %152 : vector<128xf32> to vector<128x1xf32>
    %154 = tpu.reciprocal %153 {approx = true} : vector<128x1xf32> -> vector<128x1xf32>
    %155 = vector.broadcast %154 : vector<128x1xf32> to vector<128x128xf32>
    %156 = arith.mulf %151, %155 : vector<128x128xf32>
    %157 = arith.truncf %156 : vector<128x128xf32> to vector<128x128xbf16>
    %cst_41 = arith.constant dense<0.000000e+00> : vector<8x128xf32>
    %158 = tpu.matmul %145, %157, %cst_41 {dimension_numbers = #tpu.dot_dimension_numbers<[1], [1], [0], [0], [0, 0, 1, 0], [], []>} : vector<8x128xbf16>, vector<128x128xbf16>, vector<8x128xf32> -> vector<8x128xf32>
    %159 = vector.broadcast %7 : f32 to vector<8x128xf32>
    %160 = arith.mulf %159, %158 : vector<8x128xf32>
    %161 = vector.extract_strided_slice %0 {offsets = [40, 0], sizes = [8, 128], strides = [1, 1]} : vector<64x128xf32> to vector<8x128xf32>
    %162 = arith.addf %160, %161 : vector<8x128xf32>
    %c40 = arith.constant 40 : index
    %c0_42 = arith.constant 0 : index
    %163 = vector.load %arg5[%c40, %c0_42] : memref<64x128xf32, #tpu.memory_space<vmem>>, vector<8x128xf32>
    tpu.vector_store %arg5[%c40, %c0_42], %162 {strides = array<i32>} : memref<64x128xf32, #tpu.memory_space<vmem>>, vector<8x128xf32>,
    %164 = vector.extract_strided_slice %6 {offsets = [48, 0], sizes = [8, 128], strides = [1, 1]} : vector<192x128xf32> to vector<8x128xf32>
    %cst_43 = arith.constant 0.353553385 : f32
    %165 = vector.broadcast %cst_43 : f32 to vector<8x128xf32>
    %166 = arith.mulf %164, %165 : vector<8x128xf32>
    %167 = arith.truncf %166 : vector<8x128xf32> to vector<8x128xbf16>
    %168 = vector.extract_strided_slice %6 {offsets = [112, 0], sizes = [8, 128], strides = [1, 1]} : vector<192x128xf32> to vector<8x128xf32>
    %169 = arith.truncf %168 : vector<8x128xf32> to vector<8x128xbf16>
    %170 = vector.extract_strided_slice %6 {offsets = [176, 0], sizes = [8, 128], strides = [1, 1]} : vector<192x128xf32> to vector<8x128xf32>
    %171 = arith.truncf %170 : vector<8x128xf32> to vector<8x128xbf16>
    %cst_44 = arith.constant dense<0.000000e+00> : vector<128x128xf32>
    %172 = tpu.matmul %167, %169, %cst_44 {dimension_numbers = #tpu.dot_dimension_numbers<[0], [0], [1], [1], [0, 1, 1, 1], [], []>} : vector<8x128xbf16>, vector<8x128xbf16>, vector<128x128xf32> -> vector<128x128xf32>
    %cst_45 = arith.constant dense<0xFF800000> : vector<128xf32>
    %173 = vector.multi_reduction <maximumf>, %172, %cst_45 [1] : vector<128x128xf32> to vector<128xf32>
    %174 = vector.shape_cast %173 : vector<128xf32> to vector<128x1xf32>
    %175 = vector.broadcast %174 : vector<128x1xf32> to vector<128x128xf32>
    %176 = arith.subf %172, %175 : vector<128x128xf32>
    %177 = math.exp %176 : vector<128x128xf32>
    %cst_46 = arith.constant dense<0.000000e+00> : vector<128xf32>
    %178 = vector.multi_reduction <add>, %177, %cst_46 [1] : vector<128x128xf32> to vector<128xf32>
    %179 = vector.shape_cast %178 : vector<128xf32> to vector<128x1xf32>
    %180 = tpu.reciprocal %179 {approx = true} : vector<128x1xf32> -> vector<128x1xf32>
    %181 = vector.broadcast %180 : vector<128x1xf32> to vector<128x128xf32>
    %182 = arith.mulf %177, %181 : vector<128x128xf32>
    %183 = arith.truncf %182 : vector<128x128xf32> to vector<128x128xbf16>
    %cst_47 = arith.constant dense<0.000000e+00> : vector<8x128xf32>
    %184 = tpu.matmul %171, %183, %cst_47 {dimension_numbers = #tpu.dot_dimension_numbers<[1], [1], [0], [0], [0, 0, 1, 0], [], []>} : vector<8x128xbf16>, vector<128x128xbf16>, vector<8x128xf32> -> vector<8x128xf32>
    %185 = vector.broadcast %7 : f32 to vector<8x128xf32>
    %186 = arith.mulf %185, %184 : vector<8x128xf32>
    %187 = vector.extract_strided_slice %0 {offsets = [48, 0], sizes = [8, 128], strides = [1, 1]} : vector<64x128xf32> to vector<8x128xf32>
    %188 = arith.addf %186, %187 : vector<8x128xf32>
    %c48 = arith.constant 48 : index
    %c0_48 = arith.constant 0 : index
    %189 = vector.load %arg5[%c48, %c0_48] : memref<64x128xf32, #tpu.memory_space<vmem>>, vector<8x128xf32>
    tpu.vector_store %arg5[%c48, %c0_48], %188 {strides = array<i32>} : memref<64x128xf32, #tpu.memory_space<vmem>>, vector<8x128xf32>,
    %190 = vector.extract_strided_slice %6 {offsets = [56, 0], sizes = [8, 128], strides = [1, 1]} : vector<192x128xf32> to vector<8x128xf32>
    %cst_49 = arith.constant 0.353553385 : f32
    %191 = vector.broadcast %cst_49 : f32 to vector<8x128xf32>
    %192 = arith.mulf %190, %191 : vector<8x128xf32>
    %193 = arith.truncf %192 : vector<8x128xf32> to vector<8x128xbf16>
    %194 = vector.extract_strided_slice %6 {offsets = [120, 0], sizes = [8, 128], strides = [1, 1]} : vector<192x128xf32> to vector<8x128xf32>
    %195 = arith.truncf %194 : vector<8x128xf32> to vector<8x128xbf16>
    %196 = vector.extract_strided_slice %6 {offsets = [184, 0], sizes = [8, 128], strides = [1, 1]} : vector<192x128xf32> to vector<8x128xf32>
    %197 = arith.truncf %196 : vector<8x128xf32> to vector<8x128xbf16>
    %cst_50 = arith.constant dense<0.000000e+00> : vector<128x128xf32>
    %198 = tpu.matmul %193, %195, %cst_50 {dimension_numbers = #tpu.dot_dimension_numbers<[0], [0], [1], [1], [0, 1, 1, 1], [], []>} : vector<8x128xbf16>, vector<8x128xbf16>, vector<128x128xf32> -> vector<128x128xf32>
    %cst_51 = arith.constant dense<0xFF800000> : vector<128xf32>
    %199 = vector.multi_reduction <maximumf>, %198, %cst_51 [1] : vector<128x128xf32> to vector<128xf32>
    %200 = vector.shape_cast %199 : vector<128xf32> to vector<128x1xf32>
    %201 = vector.broadcast %200 : vector<128x1xf32> to vector<128x128xf32>
    %202 = arith.subf %198, %201 : vector<128x128xf32>
    %203 = math.exp %202 : vector<128x128xf32>
    %cst_52 = arith.constant dense<0.000000e+00> : vector<128xf32>
    %204 = vector.multi_reduction <add>, %203, %cst_52 [1] : vector<128x128xf32> to vector<128xf32>
    %205 = vector.shape_cast %204 : vector<128xf32> to vector<128x1xf32>
    %206 = tpu.reciprocal %205 {approx = true} : vector<128x1xf32> -> vector<128x1xf32>
    %207 = vector.broadcast %206 : vector<128x1xf32> to vector<128x128xf32>
    %208 = arith.mulf %203, %207 : vector<128x128xf32>
    %209 = arith.truncf %208 : vector<128x128xf32> to vector<128x128xbf16>
    %cst_53 = arith.constant dense<0.000000e+00> : vector<8x128xf32>
    %210 = tpu.matmul %197, %209, %cst_53 {dimension_numbers = #tpu.dot_dimension_numbers<[1], [1], [0], [0], [0, 0, 1, 0], [], []>} : vector<8x128xbf16>, vector<128x128xbf16>, vector<8x128xf32> -> vector<8x128xf32>
    %211 = vector.broadcast %7 : f32 to vector<8x128xf32>
    %212 = arith.mulf %211, %210 : vector<8x128xf32>
    %213 = vector.extract_strided_slice %0 {offsets = [56, 0], sizes = [8, 128], strides = [1, 1]} : vector<64x128xf32> to vector<8x128xf32>
    %214 = arith.addf %212, %213 : vector<8x128xf32>
    %c56 = arith.constant 56 : index
    %c0_54 = arith.constant 0 : index
    %215 = vector.load %arg5[%c56, %c0_54] : memref<64x128xf32, #tpu.memory_space<vmem>>, vector<8x128xf32>
    tpu.vector_store %arg5[%c56, %c0_54], %214 {strides = array<i32>} : memref<64x128xf32, #tpu.memory_space<vmem>>, vector<8x128xf32>,
    return
  }
  func.func @transform_0(%arg0: i32) -> (i32, i32) {
    %c0_i32 = arith.constant 0 : i32
    %c0_i32_0 = arith.constant 0 : i32
    return %arg0, %c0_i32 : i32, i32
  }
  func.func @transform_1(%arg0: i32) -> (i32, i32) {
    %c0_i32 = arith.constant 0 : i32
    %c0_i32_0 = arith.constant 0 : i32
    %c0_i32_1 = arith.constant 0 : i32
    return %c0_i32, %c0_i32_0 : i32, i32
  }
  func.func @transform_2(%arg0: i32) -> (i32, i32) {
    %c0_i32 = arith.constant 0 : i32
    %c0_i32_0 = arith.constant 0 : i32
    %c0_i32_1 = arith.constant 0 : i32
    return %c0_i32, %c0_i32_0 : i32, i32
  }
  func.func @transform_3(%arg0: i32) -> i32 {
    %c0_i32 = arith.constant 0 : i32
    %c0_i32_0 = arith.constant 0 : i32
    return %c0_i32 : i32
  }
  func.func @transform_4(%arg0: i32) -> (i32, i32) {
    %c0_i32 = arith.constant 0 : i32
    %c0_i32_0 = arith.constant 0 : i32
    return %arg0, %c0_i32 : i32, i32
  }
}

</mosaic_0001>

<bundles_post_ra>
// kernel: multi_head_attention_module.1
= control target key start
LH: loop header
LB: loop body
LE: loop exit
PB: predicated region body
PF: predicated region fallthrough
CT: control target
= control target key end

     0   :  { %s4567_s17 = smov 0   ;;  %s5931_s0 = inlined_call_operand.vmem [shape: f32[128,128], index: 0, kind: input, shape index: {}]   ;;  %s5932_s1 = inlined_call_operand.vmem [shape: bf16[192,64], index: 1, kind: input, shape index: {}]   ;;  %s5933_s2 = inlined_call_operand.vmem [shape: f32[192,1], index: 2, kind: input, shape index: {}]   ;;  %s5934_s3 = inlined_call_operand.<no memory space> [shape: f32[1], index: 3, kind: input, shape index: {}]   ;;  %s5935_s4 = inlined_call_operand.vmem [shape: f32[128,128], index: 4, kind: output, shape index: {}]  }
   0x1   :  { %9 = sst [smem:[#allocation2]] %s5934_s3 }
   0x2 LB: > { %s3381_s18 = sadd.s32 4294967295, %s4534_s17   ;;  %p3385_p0 = scmp.ge.s32.totalorder %s4534_s17, 1  ;;  %s4534_s17 = sphi %s4567_s17, %s15_s17  }
   0x3   : > { %p164_p1 = scmp.lt.s32.totalorder %s4534_s17, 3 }
   0x5   : > { %p165_p2 = pnand %p3385_p0, %p164_p1 }
   0x7   : > { %168 = sbr.rel (%p165_p2) target bundleno = 3891 (0xf33), region = 36 }
   0xc   : > { %s3386_s19 = sshll.u32 %s3381_s18, 3  ;;  %v3997_v0 = vld [vmem:[%s5932_s1] sm:$0xff]   ;;  %vm443_vm0 = vcmask 523264   ;;  %v4536_v1 = vmov 0   ;;  %v3998_v16 = vld [vmem:[%s5932_s1 + $0x8] sm:$0xff]   ;;  %v3999_v17 = vld [vmem:[%s5932_s1 + $0x10] sm:$0xff]  }
   0xd   : > { %p191_p3 = scmp.lt.s32.totalorder %s3386_s19, 15  ;;  %3648 = vmatprep.mubr.msk.bf16.mxu0 %vm443_vm0, %v3997_v0  ;;  %3995 = vset.pattern.permute.xlu0 %v4536_v1  ;;  %v239_v2 = vld [vmem:[%s5933_s2] sm:$0xff]  ;;  %v4000_v18 = vld [vmem:[%s5932_s1 + $0x18] sm:$0xff]   ;;  %v4002_v20 = vld [vmem:[%s5932_s1 + $0x28] sm:$0xff]   ;;  %vm655_vm1 = vcmask 1043456   ;;  %vm630_vm2 = vcmask 64512  }
   0xe   : > { %265 = vperm.xlu0 %3995, %v239_v2   ;;  %v247_v8 = vld [vmem:[%s5933_s2 + $0x40] sm:$0xff]  ;;  %v4003_v62 = vld [vmem:[%s5932_s1 + $0x30] sm:$0xff]   ;;  %v4004_v63 = vld [vmem:[%s5932_s1 + $0x38] sm:$0xff]   ;;  %vm4538_vm3 = vmmov 0   ;;  %s609_s30 = sld [smem:[#allocation2]] }
   0xf   : > { %s5954_s19 = smov (!%p191_p3, %s3386_s19), 15  ;;  %v4001_v19 = vld [vmem:[%s5932_s1 + $0x20] sm:$0xff]   ;;  %v4006_v2 = vld [vmem:[%s5932_s1 + $0x48] sm:$0xff]  }
  0x10   : > { %s3387_s3 = sshll.u32 %s5954_s19, 3 }
  0x11   : > { %s4587_s24 = scalar_lea.vmem %s5931_s0, %s3387_s3  ;;  %s4819_s7 = scalar_lea.vmem %s5935_s4, %s3387_s3 }
  0x12   : > { %v209_v3 = vld [vmem:[%s4587_s24 + $0x30] sm:$0xff]  ;;  %v210_v4 = vld [vmem:[%s4587_s24 + $0x38] sm:$0xff]  ;;  %v207_v5 = vld [vmem:[%s4587_s24 + $0x20] sm:$0xff]  ;;  %305 = vperm.xlu0 %3995, %v247_v8  }
  0x13   : > { %v238_v6 = vpack.c.bf16 %v210_v4, %v209_v3  ;;  %v208_v7 = vld [vmem:[%s4587_s24 + $0x28] sm:$0xff]  ;;  %v205_v10 = vld [vmem:[%s4587_s24 + $0x10] sm:$0xff]  ;;  %v206_v11 = vld [vmem:[%s4587_s24 + $0x18] sm:$0xff] }
  0x14   : > { %v237_v9 = vpack.c.bf16 %v208_v7, %v207_v5  ;;  %v4602_v12 = vld [vmem:[%s4587_s24] sm:$0xff]  ;;  %v236_v13 = vpack.c.bf16 %v206_v11, %v205_v10  ;;  %v204_v14 = vld [vmem:[%s4587_s24 + $0x8] sm:$0xff] }
  0x15   : > { %3640 = vmatprep.subr.bf16.mxu0 %v238_v6  ;;  %v235_v15 = vpack.c.bf16 %v204_v14, %v4602_v12 }
  0x16   : > { %3641 = vmatpush3.bf16.msra.mxu0 %v238_v6 }
  0x17   : > { %3642 = vmatprep.subr.bf16.mxu0 %v237_v9 }
  0x1a   : > { %3643 = vmatpush3.bf16.msra.mxu0 %v237_v9 }
  0x1b   : > { %3644 = vmatprep.subr.bf16.mxu0 %v236_v13 }
  0x1e   : > { %3645 = vmatpush3.bf16.msra.mxu0 %v236_v13 }
  0x1f   : > { %3646 = vmatprep.subr.bf16.mxu0 %v235_v15 }
  0x22   : > { %3647 = vmatpush3.bf16.msra.mxu0 %v235_v15 }
  0x25   : > { %3649 = vmatmul.mubr.msk.bf16.vlgmr.msra.gmra.mxu0 %vm443_vm0, %v3998_v16 }
  0x26   : > { %3652 = vmatprep.mubr.msk.bf16.mxu0 %vm443_vm0, %v3999_v17 }
  0x2d   : > { %3653 = vmatmul.mubr.msk.bf16.gmra.mxu0 %vm443_vm0, %v4000_v18 }
  0x2e   : > { %3656 = vmatprep.mubr.msk.bf16.mxu0 %vm443_vm0, %v4001_v19 }
  0x35   : > { %3657 = vmatmul.mubr.msk.bf16.gmra.mxu0 %vm443_vm0, %v4002_v20 }
  0x36   : > { %3660 = vmatprep.mubr.msk.bf16.mxu0 %vm443_vm0, %v4003_v62 }
  0x3d   : > { %3661 = vmatmul.mubr.msk.bf16.gmra.mxu0 %vm443_vm0, %v4004_v63 }
  0x89   : > { %v266_v22 = vpop.permute.xlu0 %265 }
  0x8d   : > { %v306_v34 = vpop.permute.xlu0 %305 }
  0xe5   : > { %v4626_v21 = vpop.f32.mrf.mxu0 }
  0xe7   : > { %v514_v23 = vpop.f32.mrf.mxu0 }
  0xe8   : > { %v515_v24 = vadd.f32 %v514_v23, %v266_v22 }
  0xe9   : > { %v4628_v25 = vpop.f32.mrf.mxu0 }
  0xea   : > { %v610_v26 = vmul.f32 0.35355338, %v515_v24 }
  0xeb   : > { %v4630_v27 = vpop.f32.mrf.mxu0 }
  0xec   : > { %v611_v28 = vpack.c.bf16 %v610_v26, %v610_v26 }
  0xed   : > { %v4632_v29 = vpop.f32.mrf.mxu0 }
  0xee   : > { %614 = vxpose.xlu1.c.b16.start.end [1/1] (short) %v611_v28, 128 }
  0xef   : > { %v4634_v30 = vpop.f32.mrf.mxu0 }
  0xf1   : > { %v4636_v31 = vpop.f32.mrf.mxu0 }
  0xf2   : > { %5938 = vst [vmem:[#allocation3_spill] sm:$0xff] %v4636_v31  ;;  %3996 = vset.pattern.permute.xlu1 %v4536_v1  ;;  %v4005_v1 = vld [vmem:[%s5932_s1 + $0x40] sm:$0xff]  }
  0xf3   : > { %v4638_v32 = vpop.f32.mrf.mxu0  ;;  %3664 = vmatprep.mubr.msk.bf16.mxu0 %vm443_vm0, %v4005_v1 }
  0xf4   : > { %3665 = vmatmul.mubr.msk.bf16.gmra.mxu0 %vm443_vm0, %v4006_v2 }
  0xf5   : > { %v4640_v33 = vpop.f32.mrf.mxu0 }
  0xf7   : > { %v546_v35 = vpop.f32.mrf.mxu0 }
  0xf8   : > { %v547_v36 = vadd.f32 %v546_v35, %v306_v34 }
  0xfa   : > { %v612_v37 = vpack.c.bf16 %v547_v36, %v547_v36 }
  0xfc   : > { %3976 = vmatprep.subr.msk.bf16.mxu1 %vm655_vm1, %v612_v37  ;;  %v657_v38 = vsel %vm655_vm1, %v612_v37, 0 }
  0xfd   : > { %3673 = vmatpush3.bf16.msra.mxu1 %v657_v38 }
 0x150   : > { %v622_v39 = vpop.trf.xlu1 }
 0x151   : > { %3674 = vmatprep.mubr.msk.bf16.mxu1 %vm630_vm2, %v622_v39 }
 0x154   : > { %v623_v40 = vpop.trf.xlu1 }
 0x155   : > { %3675 = vmatmul.mubr.msk.bf16.vlgmr.msra.gmra.mxu1 %vm630_vm2, %v623_v40 }
 0x158   : > { %v624_v41 = vpop.trf.xlu1 }
 0x159   : > { %3678 = vmatprep.mubr.msk.bf16.mxu1 %vm630_vm2, %v624_v41 }
 0x15c   : > { %v625_v42 = vpop.trf.xlu1 }
 0x15d   : > { %3679 = vmatmul.mubr.msk.bf16.gmra.mxu1 %vm630_vm2, %v625_v42 }
 0x160   : > { %v626_v43 = vpop.trf.xlu1 }
 0x161   : > { %3682 = vmatprep.mubr.msk.bf16.mxu1 %vm630_vm2, %v626_v43 }
 0x164   : > { %v627_v44 = vpop.trf.xlu1 }
 0x165   : > { %3683 = vmatmul.mubr.msk.bf16.gmra.mxu1 %vm630_vm2, %v627_v44 }
 0x168   : > { %v628_v45 = vpop.trf.xlu1 }
 0x169   : > { %3686 = vmatprep.mubr.msk.bf16.mxu1 %vm630_vm2, %v628_v45 }
 0x16c   : > { %v629_v46 = vpop.trf.xlu1 }
 0x16d   : > { %3687 = vmatmul.mubr.msk.bf16.gmra.mxu1 %vm630_vm2, %v629_v46 }
 0x215   : > { %v4652_v47 = vpop.f32.mrf.mxu1 }
 0x217   : > { %v4654_v48 = vpop.f32.mrf.mxu1 }
 0x219   : > { %v4656_v49 = vpop.f32.mrf.mxu1 }
 0x21b   : > { %v4658_v50 = vpop.f32.mrf.mxu1 }
 0x21d   : > { %v4660_v51 = vpop.f32.mrf.mxu1 }
 0x21f   : > { %v4662_v52 = vpop.f32.mrf.mxu1 }
 0x221   : > { %v4664_v53 = vpop.f32.mrf.mxu1 }
 0x223   : > { %v4666_v54 = vpop.f32.mrf.mxu1 }
 0x225   : > { %v3684_v55 = vpop.f32.mrf.mxu1 }
 0x227   : > { %v725_v56 = vpop.f32.mrf.mxu1 }
 0x229   : > { %v3685_v57 = vpop.f32.mrf.mxu1 }
 0x22b   : > { %v4668_v58 = vpop.f32.mrf.mxu1 }
 0x22d   : > { %v3688_v59 = vpop.f32.mrf.mxu1 }
 0x22e   : > { %784 = vmax.xlane.f32.xlu1 %v3688_v59 }
 0x22f   : > { %v741_v60 = vpop.f32.mrf.mxu1 }
 0x231   : > { %v3689_v61 = vpop.f32.mrf.mxu1 }
 0x232   : > { %776 = vmax.xlane.f32.xlu1 %v3684_v55  ;;  %786 = vmax.xlane.f32.xlu0 %v3689_v61 }
 0x233   : > { %v744_v0 = vpop.f32.mrf.mxu1 }
 0x236   : > { %772 = vmax.xlane.f32.xlu1 %v725_v56  ;;  %780 = vmax.xlane.f32.xlu0 %v741_v60 }
 0x23a   : > { %768 = vmax.xlane.f32.xlu1 %v4660_v51  ;;  %782 = vmax.xlane.f32.xlu0 %v744_v0 }
 0x23e   : > { %764 = vmax.xlane.f32.xlu1 %v4662_v52  ;;  %778 = vmax.xlane.f32.xlu0 %v3685_v57 }
 0x242   : > { %760 = vmax.xlane.f32.xlu1 %v4652_v47  ;;  %774 = vmax.xlane.f32.xlu0 %v4668_v58 }
 0x246   : > { %756 = vmax.xlane.f32.xlu1 %v4654_v48  ;;  %770 = vmax.xlane.f32.xlu0 %v4664_v53 }
 0x24a   : > { %766 = vmax.xlane.f32.xlu0 %v4666_v54 }
 0x24e   : > { %762 = vmax.xlane.f32.xlu0 %v4656_v49 }
 0x252   : > { %758 = vmax.xlane.f32.xlu0 %v4658_v50 }
 0x2b7   : > { %v785_v3 = vpop.xlane.xlu1 %784 }
 0x2b8   : > { %v802_v4 = vsub.f32 %v3688_v59, %v785_v3 }
 0x2ba   : > { %v832_v5 = vmul.f32 1.442695, %v802_v4 }
 0x2bb   : > { %v777_v6 = vpop.xlane.xlu1 %776  ;;  %v787_v7 = vpop.xlane.xlu0 %786 }
 0x2bc   : > { %4009 = vpow2.f32 %v832_v5  ;;  %v803_v8 = vsub.f32 %v3689_v61, %v787_v7  ;;  %v798_v13 = vsub.f32 %v3684_v55, %v777_v6 }
 0x2be   : > { %v834_v9 = vmul.f32 1.442695, %v803_v8  ;;  %v824_v18 = vmul.f32 1.442695, %v798_v13 }
 0x2bf   : > { %v773_v10 = vpop.xlane.xlu1 %772  ;;  %v781_v11 = vpop.xlane.xlu0 %780 }
 0x2c0   : > { %v800_v14 = vsub.f32 %v741_v60, %v781_v11  ;;  %4011 = vpow2.f32 %v834_v9  ;;  %v796_v19 = vsub.f32 %v725_v56, %v773_v10  ;;  %v5936_v10 = vmov 0.0  }
 0x2c1   : > { %3690 = vmatprep.subr.bf16.mxu1 %v5936_v10  ;;  %3728 = vmatprep.subr.bf16.mxu0 %v5936_v10 }
 0x2c2   : > { %v828_v15 = vmul.f32 1.442695, %v800_v14  ;;  %v820_v24 = vmul.f32 1.442695, %v796_v19  ;;  %v240_v14 = vld [vmem:[%s5933_s2 + $0x8] sm:$0xff]  ;;  %3706 = vmatprep.mubr.msk.bf16.mxu1 %vm4538_vm3, %v5936_v10 }
 0x2c3   : > { %v769_v16 = vpop.xlane.xlu1 %768  ;;  %v783_v17 = vpop.xlane.xlu0 %782 }
 0x2c4   : > { %v801_v20 = vsub.f32 %v744_v0, %v783_v17  ;;  %4013 = vpow2.f32 %v828_v15  ;;  %v794_v26 = vsub.f32 %v4660_v51, %v769_v16  ;;  %v248_v15 = vld [vmem:[%s5933_s2 + $0x48] sm:$0xff]  ;;  %v255_v16 = vld [vmem:[%s5933_s2 + $0x80] sm:$0xff] }
 0x2c5   : > { %4015 = vpow2.f32 %v824_v18 }
 0x2c6   : > { %v830_v22 = vmul.f32 1.442695, %v801_v20  ;;  %v816_v38 = vmul.f32 1.442695, %v794_v26 }
 0x2c7   : > { %v779_v23 = vpop.xlane.xlu0 %778  ;;  %v765_v28 = vpop.xlane.xlu1 %764 }
 0x2c8   : > { %v799_v34 = vsub.f32 %v3685_v57, %v779_v23  ;;  %4017 = vpow2.f32 %v830_v22  ;;  %v792_v39 = vsub.f32 %v4662_v52, %v765_v28 }
 0x2c9   : > { %v4696_v35 = vpop.eup %4009  ;;  %4019 = vpow2.f32 %v820_v24 }
 0x2ca   : > { %v826_v36 = vmul.f32 1.442695, %v799_v34  ;;  %864 = vadd.xlane.f32.xlu1 %v4696_v35  ;;  %v812_v45 = vmul.f32 1.442695, %v792_v39 }
 0x2cb   : > { %v775_v37 = vpop.xlane.xlu0 %774  ;;  %v761_v42 = vpop.xlane.xlu1 %760 }
 0x2cc   : > { %v797_v40 = vsub.f32 %v4668_v58, %v775_v37  ;;  %4021 = vpow2.f32 %v826_v36  ;;  %v790_v51 = vsub.f32 %v4652_v47, %v761_v42 }
 0x2cd   : > { %v4701_v41 = vpop.eup %4011  ;;  %4023 = vpow2.f32 %v816_v38 }
 0x2ce   : > { %v822_v43 = vmul.f32 1.442695, %v797_v40  ;;  %866 = vadd.xlane.f32.xlu0 %v4701_v41  ;;  %v808_v59 = vmul.f32 1.442695, %v790_v51 }
 0x2cf   : > { %v771_v44 = vpop.xlane.xlu0 %770  ;;  %v757_v61 = vpop.xlane.xlu1 %756 }
 0x2d0   : > { %v795_v46 = vsub.f32 %v4664_v53, %v771_v44  ;;  %4025 = vpow2.f32 %v822_v43 }
 0x2d1   : > { %v4706_v55 = vpop.eup %4013  ;;  %4027 = vpow2.f32 %v812_v45 }
 0x2d2   : > { %v818_v52 = vmul.f32 1.442695, %v795_v46  ;;  %860 = vadd.xlane.f32.xlu1 %v4706_v55  ;;  %v4710_v58 = vpop.eup %4015 }
 0x2d3   : > { %v767_v56 = vpop.xlane.xlu0 %766 }
 0x2d4   : > { %v793_v57 = vsub.f32 %v4666_v54, %v767_v56  ;;  %4029 = vpow2.f32 %v818_v52  ;;  %v788_v54 = vsub.f32 %v4654_v48, %v757_v61 }
 0x2d5   : > { %v4712_v60 = vpop.eup %4017 }
 0x2d6   : > { %v814_v53 = vmul.f32 1.442695, %v793_v57  ;;  %856 = vadd.xlane.f32.xlu1 %v4710_v58  ;;  %862 = vadd.xlane.f32.xlu0 %v4712_v60  ;;  %v4717_v63 = vpop.eup %4019  ;;  %v804_v4 = vmul.f32 1.442695, %v788_v54 }
 0x2d7   : > { %v763_v47 = vpop.xlane.xlu0 %762 }
 0x2d8   : > { %4031 = vpow2.f32 %v814_v53  ;;  %v791_v62 = vsub.f32 %v4656_v49, %v763_v47 }
 0x2d9   : > { %4033 = vpow2.f32 %v808_v59  ;;  %v4720_v0 = vpop.eup %4021 }
 0x2da   : > { %v810_v1 = vmul.f32 1.442695, %v791_v62  ;;  %852 = vadd.xlane.f32.xlu1 %v4717_v63  ;;  %858 = vadd.xlane.f32.xlu0 %v4720_v0  ;;  %v4724_v3 = vpop.eup %4023 }
 0x2db   : > { %v759_v2 = vpop.xlane.xlu0 %758 }
 0x2dc   : > { %4035 = vpow2.f32 %v810_v1  ;;  %v789_v5 = vsub.f32 %v4658_v50, %v759_v2 }
 0x2dd   : > { %v4727_v49 = vpop.eup %4025  ;;  %4037 = vpow2.f32 %v804_v4 }
 0x2de   : > { %848 = vadd.xlane.f32.xlu1 %v4724_v3  ;;  %854 = vadd.xlane.f32.xlu0 %v4727_v49  ;;  %v4731_v48 = vpop.eup %4027  ;;  %v806_v6 = vmul.f32 1.442695, %v789_v5 }
 0x2e0   : > { %4039 = vpow2.f32 %v806_v6 }
 0x2e1   : > { %v4733_v7 = vpop.eup %4029 }
 0x2e2   : > { %844 = vadd.xlane.f32.xlu1 %v4731_v48  ;;  %850 = vadd.xlane.f32.xlu0 %v4733_v7 }
 0x2e5   : > { %v4737_v8 = vpop.eup %4031 }
 0x2e6   : > { %v4739_v50 = vpop.eup %4033  ;;  %846 = vadd.xlane.f32.xlu0 %v4737_v8 }
 0x2e7   : > { %840 = vadd.xlane.f32.xlu1 %v4739_v50 }
 0x2e9   : > { %v4743_v9 = vpop.eup %4035 }
 0x2ea   : > { %842 = vadd.xlane.f32.xlu0 %v4743_v9  ;;  %v4748_v11 = vpop.eup %4037 }
 0x2ed   : > { %v4751_v13 = vpop.eup %4039 }
 0x2ee   : > { %836 = vadd.xlane.f32.xlu0 %v4748_v11 }
 0x2f2   : > { %838 = vadd.xlane.f32.xlu0 %v4751_v13 }
 0x2f8   : > { %270 = vperm.xlu1 %3996, %v240_v14   ;;  %v4779_v14 = vpop.f32.mrf.mxu0 }
 0x2fc   : > { %310 = vperm.xlu1 %3996, %v248_v15  }
 0x308   : > { %345 = vperm.xlu0 %3995, %v255_v16  }
 0x353   : > { %v865_v17 = vpop.xlane.xlu1 %864 }
 0x354   : > { %4041 = vrcp.f32 %v865_v17 }
 0x357   : > { %v867_v18 = vpop.xlane.xlu0 %866 }
 0x358   : > { %4043 = vrcp.f32 %v867_v18  ;;  %v549_v18 = vpop.f32.mrf.mxu0 }
 0x35b   : > { %v861_v19 = vpop.xlane.xlu1 %860 }
 0x35c   : > { %4045 = vrcp.f32 %v861_v19  ;;  %v4783_v19 = vpop.f32.mrf.mxu0 }
 0x35d   : > { %5939 = vst [vmem:[#allocation4_spill] sm:$0xff] %v4783_v19 }
 0x35f   : > { %v857_v20 = vpop.xlane.xlu1 %856  ;;  %v863_v22 = vpop.xlane.xlu0 %862 }
 0x360   : > { %4047 = vrcp.f32 %v863_v22  ;;  %v4787_v22 = vpop.f32.mrf.mxu0 }
 0x361   : > { %v4042_v23 = vpop.eup %4041 }
 0x362   : > { %v898_v34 = vmul.f32 %v4042_v23, %v4696_v35 }
 0x363   : > { %v853_v24 = vpop.xlane.xlu1 %852  ;;  %v859_v26 = vpop.xlane.xlu0 %858 }
 0x364   : > { %4049 = vrcp.f32 %v859_v26  ;;  %v4790_v26 = vpop.f32.mrf.mxu0 }
 0x365   : > { %v4044_v28 = vpop.eup %4043  ;;  %4051 = vrcp.f32 %v857_v20  ;;  %5940 = vst [vmem:[#allocation5_spill] sm:$0xff] %v4790_v26 }
 0x366   : > { %v899_v36 = vmul.f32 %v4044_v28, %v4701_v41 }
 0x367   : > { %v849_v37 = vpop.xlane.xlu1 %848  ;;  %v855_v39 = vpop.xlane.xlu0 %854 }
 0x368   : > { %v907_v38 = vpack.c.bf16 %v899_v36, %v898_v34  ;;  %4053 = vrcp.f32 %v855_v39  ;;  %v4794_v36 = vpop.f32.mrf.mxu0 }
 0x369   : > { %v4046_v42 = vpop.eup %4045  ;;  %4055 = vrcp.f32 %v853_v24 }
 0x36a   : > { %3691 = vmatpush3.bf16.xpose.msra.mxu1 %v907_v38  ;;  %v896_v45 = vmul.f32 %v4046_v42, %v4706_v55  ;;  %v4797_v39 = vpop.f32.mrf.mxu0 }
 0x36b   : > { %v845_v40 = vpop.xlane.xlu1 %844  ;;  %3692 = vmatprep.subr.bf16.mxu1 %v5936_v10  ;;  %v851_v41 = vpop.xlane.xlu0 %850 }
 0x36c   : > { %4057 = vrcp.f32 %v851_v41 }
 0x36d   : > { %v4048_v43 = vpop.eup %4047  ;;  %4059 = vrcp.f32 %v849_v37 }
 0x36e   : > { %v897_v46 = vmul.f32 %v4048_v43, %v4712_v60 }
 0x36f   : > { %v847_v55 = vpop.xlane.xlu0 %846 }
 0x370   : > { %v841_v44 = vpop.xlane.xlu1 %840  ;;  %v906_v35 = vpack.c.bf16 %v897_v46, %v896_v45  ;;  %4061 = vrcp.f32 %v847_v55 }
 0x371   : > { %v4050_v51 = vpop.eup %4049  ;;  %4063 = vrcp.f32 %v845_v40 }
 0x372   : > { %3693 = vmatpush3.bf16.xpose.msra.mxu1 %v906_v35  ;;  %v4052_v56 = vpop.eup %4051  ;;  %v895_v59 = vmul.f32 %v4050_v51, %v4720_v0 }
 0x373   : > { %3694 = vmatprep.subr.bf16.mxu1 %v5936_v10  ;;  %v894_v53 = vmul.f32 %v4052_v56, %v4710_v58  ;;  %v843_v1 = vpop.xlane.xlu0 %842 }
 0x374   : > { %v271_v52 = vpop.permute.xlu1 %270  ;;  %4065 = vrcp.f32 %v843_v1 }
 0x375   : > { %v518_v57 = vadd.f32 %v4630_v27, %v271_v52  ;;  %v905_v60 = vpack.c.bf16 %v895_v59, %v894_v53  ;;  %v4054_v62 = vpop.eup %4053  ;;  %4067 = vrcp.f32 %v841_v44  ;;  %v578_v44 = vpop.f32.mrf.mxu0  ;;  %v4811_v53 = vstv %s609_s30 }
 0x376   : > { %v4056_v54 = vpop.eup %4055  ;;  %v893_v27 = vmul.f32 %v4054_v62, %v4727_v49 }
 0x377   : > { %v952_v61 = vmul.f32 0.35355338, %v518_v57  ;;  %v892_v0 = vmul.f32 %v4056_v54, %v4717_v63  ;;  %v837_v5 = vpop.xlane.xlu0 %836 }
 0x378   : > { %v311_v38 = vpop.permute.xlu1 %310 }
 0x379   : > { %v953_v47 = vpack.c.bf16 %v952_v61, %v952_v61  ;;  %v904_v2 = vpack.c.bf16 %v893_v27, %v892_v0  ;;  %v4058_v4 = vpop.eup %4057  ;;  %v550_v42 = vadd.f32 %v549_v18, %v311_v38 }
 0x37a   : > { %3695 = vmatpush3.bf16.xpose.msra.mxu1 %v905_v60  ;;  %v4060_v58 = vpop.eup %4059  ;;  %v891_v6 = vmul.f32 %v4058_v4, %v4733_v7 }
 0x37b   : > { %956 = vxpose.xlu1.c.b16.start.end [1/1] (short) %v953_v47, 128  ;;  %3696 = vmatprep.subr.bf16.mxu1 %v5936_v10  ;;  %v890_v15 = vmul.f32 %v4060_v58, %v4724_v3  ;;  %v839_v17 = vpop.xlane.xlu0 %838 }
 0x37c   : > { %4069 = vrcp.f32 %v839_v17 }
 0x37d   : > { %v903_v49 = vpack.c.bf16 %v891_v6, %v890_v15  ;;  %v4062_v16 = vpop.eup %4061  ;;  %4071 = vrcp.f32 %v837_v5 }
 0x37e   : > { %v4064_v63 = vpop.eup %4063  ;;  %v889_v20 = vmul.f32 %v4062_v16, %v4737_v8 }
 0x37f   : > { %v888_v7 = vmul.f32 %v4064_v63, %v4731_v48 }
 0x381   : > { %v902_v23 = vpack.c.bf16 %v889_v20, %v888_v7  ;;  %v4066_v3 = vpop.eup %4065 }
 0x382   : > { %3697 = vmatpush3.bf16.xpose.msra.mxu1 %v904_v2  ;;  %v4068_v24 = vpop.eup %4067  ;;  %v887_v28 = vmul.f32 %v4066_v3, %v4743_v9 }
 0x383   : > { %3698 = vmatprep.subr.bf16.mxu1 %v5936_v10  ;;  %v886_v34 = vmul.f32 %v4068_v24, %v4739_v50  ;;  %v346_v9 = vpop.permute.xlu0 %345  ;;  %v954_v50 = vpack.c.bf16 %v550_v42, %v550_v42 }
 0x384   : > { %v579_v46 = vadd.f32 %v578_v44, %v346_v9 }
 0x385   : > { %v901_v8 = vpack.c.bf16 %v887_v28, %v886_v34  ;;  %v997_v51 = vsel %vm655_vm1, %v954_v50, 0 }
 0x386   : > { %v613_v35 = vpack.c.bf16 %v579_v46, %v579_v46 }
 0x389   : > { %v4070_v37 = vpop.eup %4069 }
 0x38a   : > { %3699 = vmatpush3.bf16.xpose.msra.mxu1 %v903_v49  ;;  %v4072_v48 = vpop.eup %4071  ;;  %v885_v40 = vmul.f32 %v4070_v37, %v4751_v13 }
 0x38b   : > { %3700 = vmatprep.subr.bf16.mxu1 %v5936_v10  ;;  %v884_v43 = vmul.f32 %v4072_v48, %v4748_v11 }
 0x38d   : > { %v900_v45 = vpack.c.bf16 %v885_v40, %v884_v43 }
 0x392   : > { %3701 = vmatpush3.bf16.xpose.msra.mxu1 %v902_v23 }
 0x393   : > { %3702 = vmatprep.subr.bf16.mxu1 %v5936_v10 }
 0x39a   : > { %3703 = vmatpush3.bf16.xpose.msra.mxu1 %v901_v8 }
 0x39b   : > { %3704 = vmatprep.subr.bf16.mxu1 %v5936_v10 }
 0x3a2   : > { %3705 = vmatpush3.bf16.xpose.msra.mxu1 %v900_v45 }
 0x3a3   : > { %3977 = vmatprep.subr.msk.bf16.mxu1 %vm655_vm1, %v954_v50 }
 0x3a9   : > { %3707 = vmatmul.mubr.bf16.vlgmr.msra.gmra.mxu1 %v613_v35 }
 0x3aa   : > { %3711 = vmatpush3.bf16.msra.mxu1 %v997_v51 }
 0x3dd   : > { %v964_v41 = vpop.trf.xlu1 }
 0x3de   : > { %3712 = vmatprep.mubr.msk.bf16.mxu1 %vm630_vm2, %v964_v41 }
 0x3e1   : > { %v965_v13 = vpop.trf.xlu1 }
 0x3e2   : > { %3713 = vmatmul.mubr.msk.bf16.vlgmr.msra.gmra.mxu1 %vm630_vm2, %v965_v13 }
 0x3e5   : > { %v966_v11 = vpop.trf.xlu1 }
 0x3e6   : > { %3716 = vmatprep.mubr.msk.bf16.mxu1 %vm630_vm2, %v966_v11 }
 0x3e9   : > { %v967_v52 = vpop.trf.xlu1 }
 0x3ea   : > { %3717 = vmatmul.mubr.msk.bf16.gmra.mxu1 %vm630_vm2, %v967_v52 }
 0x3ed   : > { %v968_v56 = vpop.trf.xlu1 }
 0x3ee   : > { %3720 = vmatprep.mubr.msk.bf16.mxu1 %vm630_vm2, %v968_v56 }
 0x3f1   : > { %v969_v57 = vpop.trf.xlu1 }
 0x3f2   : > { %3721 = vmatmul.mubr.msk.bf16.gmra.mxu1 %vm630_vm2, %v969_v57 }
 0x3f5   : > { %v970_v59 = vpop.trf.xlu1 }
 0x3f6   : > { %3724 = vmatprep.mubr.msk.bf16.mxu1 %vm630_vm2, %v970_v59 }
 0x3f9   : > { %v971_v61 = vpop.trf.xlu1 }
 0x3fa   : > { %3725 = vmatmul.mubr.msk.bf16.gmra.mxu1 %vm630_vm2, %v971_v61 }
 0x469   : > { %v942_v55 = vpop.f32.mrf.mxu1 }
 0x46a   : > { %v949_v47 = vmul.f32 %v4811_v53, %v942_v55 }
 0x46b   : > { %v3708_v60 = vpop.f32.mrf.mxu1 }
 0x46c   : > { %v950_v62 = vadd.f32 %v949_v47, %v4602_v12 }
 0x46d   : > { %v945_v54 = vpop.f32.mrf.mxu1 }
 0x46e   : > { %951 = vst [vmem:[%s4819_s7] sm:$0xff] %v950_v62 }
 0x46f   : > { %v3709_v27 = vpop.f32.mrf.mxu1 }
 0x4a2   : > { %v3714_v1 = vpop.f32.mrf.mxu1 }
 0x4a4   : > { %v4823_v0 = vpop.f32.mrf.mxu1 }
 0x4a6   : > { %v3715_v2 = vpop.f32.mrf.mxu1 }
 0x4a8   : > { %v4825_v4 = vpop.f32.mrf.mxu1 }
 0x4aa   : > { %v3718_v58 = vpop.f32.mrf.mxu1 }
 0x4ac   : > { %v4827_v5 = vpop.f32.mrf.mxu1 }
 0x4ae   : > { %v3719_v6 = vpop.f32.mrf.mxu1 }
 0x4b0   : > { %v1052_v15 = vpop.f32.mrf.mxu1 }
 0x4b2   : > { %v4829_v49 = vpop.f32.mrf.mxu1 }
 0x4b4   : > { %v4831_v16 = vpop.f32.mrf.mxu1 }
 0x4b6   : > { %v3723_v17 = vpop.f32.mrf.mxu1 }
 0x4b8   : > { %v1068_v12 = vpop.f32.mrf.mxu1 }
 0x4ba   : > { %v4833_v18 = vpop.f32.mrf.mxu1 }
 0x4bb   : > { %1124 = vmax.xlane.f32.xlu0 %v4833_v18 }
 0x4bc   : > { %v4836_v63 = vpop.f32.mrf.mxu1 }
 0x4be   : > { %v3727_v20 = vpop.f32.mrf.mxu1 }
 0x4bf   : > { %1120 = vmax.xlane.f32.xlu0 %v4836_v63  ;;  %1126 = vmax.xlane.f32.xlu1 %v3727_v20 }
 0x4c0   : > { %v1084_v7 = vpop.f32.mrf.mxu1 }
 0x4c3   : > { %1106 = vmax.xlane.f32.xlu1 %v1052_v15  ;;  %1122 = vmax.xlane.f32.xlu0 %v1084_v7 }
 0x4c7   : > { %1102 = vmax.xlane.f32.xlu1 %v3715_v2  ;;  %1116 = vmax.xlane.f32.xlu0 %v4829_v49 }
 0x4cb   : > { %1098 = vmax.xlane.f32.xlu1 %v4825_v4  ;;  %1118 = vmax.xlane.f32.xlu0 %v3723_v17 }
 0x4cf   : > { %1112 = vmax.xlane.f32.xlu0 %v4831_v16 }
 0x4d3   : > { %1114 = vmax.xlane.f32.xlu0 %v1068_v12 }
 0x4d7   : > { %1108 = vmax.xlane.f32.xlu0 %v3718_v58 }
 0x4db   : > { %1110 = vmax.xlane.f32.xlu0 %v3719_v6 }
 0x4df   : > { %1104 = vmax.xlane.f32.xlu0 %v4827_v5 }
 0x4e3   : > { %1100 = vmax.xlane.f32.xlu0 %v3714_v1 }
 0x4e7   : > { %1096 = vmax.xlane.f32.xlu0 %v4823_v0 }
 0x544   : > { %v1125_v23 = vpop.xlane.xlu0 %1124 }
 0x548   : > { %v4844_v3 = vpop.xlane.xlu0 %1120  ;;  %v1127_v24 = vpop.xlane.xlu1 %1126 }
 0x549   : > { %v1143_v55 = vsub.f32 %v3727_v20, %v1127_v24 }
 0x54b   : > { %v1174_v54 = vmul.f32 1.442695, %v1143_v55 }
 0x54c   : > { %v1107_v28 = vpop.xlane.xlu1 %1106  ;;  %v1123_v34 = vpop.xlane.xlu0 %1122 }
 0x54d   : > { %v1133_v50 = vsub.f32 %v1052_v15, %v1107_v28  ;;  %v1141_v27 = vsub.f32 %v1084_v7, %v1123_v34  ;;  %v1140_v28 = vsub.f32 %v4836_v63, %v4844_v3 }
 0x54f   : > { %v1154_v13 = vmul.f32 1.442695, %v1133_v50 }
 0x550   : > { %v1103_v8 = vpop.xlane.xlu1 %1102  ;;  %v1117_v37 = vpop.xlane.xlu0 %1116 }
 0x551   : > { %v1131_v38 = vsub.f32 %v3715_v2, %v1103_v8  ;;  %v1138_v2 = vsub.f32 %v4829_v49, %v1117_v37  ;;  %v1142_v49 = vsub.f32 %v4833_v18, %v1125_v23  ;;  %v1168_v23 = vmul.f32 1.442695, %v1140_v28 }
 0x553   : > { %v1150_v48 = vmul.f32 1.442695, %v1131_v38 }
 0x554   : > { %v1119_v40 = vpop.xlane.xlu0 %1118  ;;  %v1099_v50 = vpop.xlane.xlu1 %1098 }
 0x555   : > { %4073 = vpow2.f32 %v1150_v48  ;;  %v1139_v51 = vsub.f32 %v3723_v17, %v1119_v40  ;;  %v242_v40 = vld [vmem:[%s5933_s2 + $0x18] sm:$0xff] }
 0x557   : > { %v1166_v11 = vmul.f32 1.442695, %v1139_v51 }
 0x558   : > { %v1113_v42 = vpop.xlane.xlu0 %1112 }
 0x559   : > { %v1136_v17 = vsub.f32 %v4831_v16, %v1113_v42  ;;  %v1172_v16 = vmul.f32 1.442695, %v1142_v49 }
 0x55b   : > { %v1160_v20 = vmul.f32 1.442695, %v1136_v17 }
 0x55c   : > { %v1115_v43 = vpop.xlane.xlu0 %1114 }
 0x55d   : > { %v1137_v52 = vsub.f32 %v1068_v12, %v1115_v43 }
 0x55f   : > { %v1162_v47 = vmul.f32 1.442695, %v1137_v52  ;;  %v4008_v52 = vld [vmem:[%s5932_s1 + $0x58] sm:$0xff]  }
 0x560   : > { %v1109_v44 = vpop.xlane.xlu0 %1108 }
 0x561   : > { %v1134_v57 = vsub.f32 %v3718_v58, %v1109_v44  ;;  %v1164_v58 = vmul.f32 1.442695, %v1138_v2  ;;  %v241_v44 = vld [vmem:[%s5933_s2 + $0x10] sm:$0xff] }
 0x562   : > { %v4846_v9 = vpop.eup %4073 }
 0x563   : > { %1182 = vadd.xlane.f32.xlu1 %v4846_v9  ;;  %v1156_v60 = vmul.f32 1.442695, %v1134_v57 }
 0x564   : > { %v1111_v45 = vpop.xlane.xlu0 %1110 }
 0x565   : > { %v1135_v46 = vsub.f32 %v3719_v6, %v1111_v45 }
 0x567   : > { %v1158_v35 = vmul.f32 1.442695, %v1135_v46  ;;  %v1129_v46 = vsub.f32 %v4825_v4, %v1099_v50  ;;  %v256_v4 = vld [vmem:[%s5933_s2 + $0x88] sm:$0xff] }
 0x568   : > { %v1105_v41 = vpop.xlane.xlu0 %1104 }
 0x569   : > { %4075 = vpow2.f32 %v1158_v35  ;;  %v1132_v62 = vsub.f32 %v4827_v5, %v1105_v41  ;;  %v1146_v35 = vmul.f32 1.442695, %v1129_v46 }
 0x56a   : > { %4077 = vpow2.f32 %v1154_v13  ;;  %v250_v13 = vld [vmem:[%s5933_s2 + $0x58] sm:$0xff] }
 0x56b   : > { %4079 = vpow2.f32 %v1166_v11  ;;  %v1152_v6 = vmul.f32 1.442695, %v1132_v62  ;;  %v4007_v11 = vld [vmem:[%s5932_s1 + $0x50] sm:$0xff]  }
 0x56c   : > { %v1101_v56 = vpop.xlane.xlu0 %1100  ;;  %3668 = vmatprep.mubr.msk.bf16.mxu0 %vm443_vm0, %v4007_v11 }
 0x56d   : > { %v1130_v59 = vsub.f32 %v3714_v1, %v1101_v56  ;;  %v1170_v1 = vmul.f32 1.442695, %v1141_v27  ;;  %3669 = vmatmul.mubr.msk.bf16.gmra.mxu0 %vm443_vm0, %v4008_v52 }
 0x56e   : > { %3744 = vmatprep.mubr.msk.bf16.mxu0 %vm4538_vm3, %v5936_v10 }
 0x56f   : > { %v1148_v61 = vmul.f32 1.442695, %v1130_v59 }
 0x570   : > { %v1097_v42 = vpop.xlane.xlu0 %1096 }
 0x571   : > { %4081 = vpow2.f32 %v1148_v61  ;;  %v1128_v43 = vsub.f32 %v4823_v0, %v1097_v42  ;;  %v249_v0 = vld [vmem:[%s5933_s2 + $0x50] sm:$0xff] }
 0x572   : > { %4083 = vpow2.f32 %v1162_v47 }
 0x573   : > { %4085 = vpow2.f32 %v1156_v60  ;;  %v1144_v45 = vmul.f32 1.442695, %v1128_v43 }
 0x574   : > { %4087 = vpow2.f32 %v1174_v54 }
 0x575   : > { %4089 = vpow2.f32 %v1152_v6 }
 0x576   : > { %v4851_v15 = vpop.eup %4075  ;;  %4091 = vpow2.f32 %v1170_v1 }
 0x577   : > { %1190 = vadd.xlane.f32.xlu1 %v4851_v15  ;;  %v4855_v12 = vpop.eup %4077  ;;  %4093 = vpow2.f32 %v1164_v58 }
 0x578   : > { %v4858_v5 = vpop.eup %4079  ;;  %4095 = vpow2.f32 %v1160_v20 }
 0x579   : > { %4097 = vpow2.f32 %v1172_v16 }
 0x57a   : > { %4099 = vpow2.f32 %v1168_v23 }
 0x57b   : > { %1186 = vadd.xlane.f32.xlu1 %v4855_v12  ;;  %4101 = vpow2.f32 %v1144_v45 }
 0x57c   : > { %4103 = vpow2.f32 %v1146_v35 }
 0x57e   : > { %v4861_v7 = vpop.eup %4081 }
 0x57f   : > { %1198 = vadd.xlane.f32.xlu1 %v4858_v5  ;;  %1180 = vadd.xlane.f32.xlu0 %v4861_v7  ;;  %v4865_v24 = vpop.eup %4083 }
 0x580   : > { %v4869_v34 = vpop.eup %4085 }
 0x581   : > { %v4873_v18 = vpop.eup %4087 }
 0x582   : > { %v4875_v8 = vpop.eup %4089 }
 0x583   : > { %1194 = vadd.xlane.f32.xlu1 %v4865_v24  ;;  %1188 = vadd.xlane.f32.xlu0 %v4869_v34  ;;  %v4879_v37 = vpop.eup %4091 }
 0x584   : > { %v4881_v63 = vpop.eup %4093 }
 0x585   : > { %v4885_v3 = vpop.eup %4095 }
 0x586   : > { %v4098_v38 = vpop.eup %4097 }
 0x587   : > { %1206 = vadd.xlane.f32.xlu1 %v4873_v18  ;;  %1184 = vadd.xlane.f32.xlu0 %v4875_v8  ;;  %v4888_v48 = vpop.eup %4099 }
 0x588   : > { %v4899_v51 = vpop.eup %4101 }
 0x589   : > { %v4902_v41 = vpop.eup %4103 }
 0x58b   : > { %1202 = vadd.xlane.f32.xlu1 %v4879_v37  ;;  %1196 = vadd.xlane.f32.xlu0 %v4881_v63 }
 0x58f   : > { %1192 = vadd.xlane.f32.xlu0 %v4885_v3 }
 0x593   : > { %1204 = vadd.xlane.f32.xlu0 %v4098_v38 }
 0x597   : > { %1200 = vadd.xlane.f32.xlu0 %v4888_v48 }
 0x59c   : > { %280 = vperm.xlu1 %3996, %v242_v40  }
 0x5ad   : > { %275 = vperm.xlu0 %3995, %v241_v44  }
 0x5c0   : > { %1176 = vadd.xlane.f32.xlu1 %v4899_v51 }
 0x5cc   : > { %1178 = vadd.xlane.f32.xlu0 %v4902_v41 }
 0x5d1   : > { %315 = vperm.xlu1 %3996, %v249_v0  }
 0x5d5   : > { %320 = vperm.xlu1 %3996, %v250_v13  }
 0x5e2   : > { %350 = vperm.xlu0 %3995, %v256_v4  }
 0x5ec   : > { %v4924_v56 = vpop.xlane.xlu1 %1182 }
 0x600   : > { %v1191_v57 = vpop.xlane.xlu1 %1190 }
 0x604   : > { %v1187_v59 = vpop.xlane.xlu1 %1186 }
 0x608   : > { %v1199_v61 = vpop.xlane.xlu1 %1198  ;;  %v1181_v55 = vpop.xlane.xlu0 %1180 }
 0x60c   : > { %v1195_v47 = vpop.xlane.xlu1 %1194  ;;  %v1189_v60 = vpop.xlane.xlu0 %1188 }
 0x610   : > { %v1207_v62 = vpop.xlane.xlu1 %1206  ;;  %v1185_v54 = vpop.xlane.xlu0 %1184 }
 0x611   : > { %4105 = vrcp.f32 %v1207_v62 }
 0x614   : > { %v1203_v27 = vpop.xlane.xlu1 %1202  ;;  %v1197_v2 = vpop.xlane.xlu0 %1196 }
 0x618   : > { %v281_v6 = vpop.permute.xlu1 %280  ;;  %v1193_v1 = vpop.xlane.xlu0 %1192 }
 0x619   : > { %v526_v58 = vadd.f32 %v4628_v25, %v281_v6 }
 0x61b   : > { %v1630_v17 = vmul.f32 0.35355338, %v526_v58 }
 0x61c   : > { %v1205_v49 = vpop.xlane.xlu0 %1204 }
 0x61d   : > { %v1631_v20 = vpack.c.bf16 %v1630_v17, %v1630_v17  ;;  %4107 = vrcp.f32 %v1205_v49 }
 0x61e   : > { %v4106_v28 = vpop.eup %4105 }
 0x61f   : > { %1634 = vxpose.xlu1.c.b16.start.end [1/1] (short) %v1631_v20, 128  ;;  %v1239_v25 = vmul.f32 %v4106_v28, %v4873_v18 }
 0x620   : > { %v1201_v16 = vpop.xlane.xlu0 %1200 }
 0x621   : > { %4109 = vrcp.f32 %v1201_v16 }
 0x622   : > { %4111 = vrcp.f32 %v1203_v27 }
 0x623   : > { %4113 = vrcp.f32 %v1197_v2 }
 0x624   : > { %4115 = vrcp.f32 %v1199_v61 }
 0x625   : > { %4117 = vrcp.f32 %v1193_v1 }
 0x626   : > { %4119 = vrcp.f32 %v1195_v47 }
 0x627   : > { %4121 = vrcp.f32 %v1189_v60 }
 0x628   : > { %v276_v23 = vpop.permute.xlu0 %275  ;;  %4123 = vrcp.f32 %v1191_v57 }
 0x629   : > { %v523_v40 = vadd.f32 %v4626_v21, %v276_v23  ;;  %4125 = vrcp.f32 %v1185_v54  ;;  %v4954_v23 = vpop.f32.mrf.mxu0 }
 0x62a   : > { %v4108_v42 = vpop.eup %4107  ;;  %4127 = vrcp.f32 %v1187_v59 }
 0x62b   : > { %v1291_v43 = vmul.f32 0.35355338, %v523_v40  ;;  %v1238_v44 = vmul.f32 %v4108_v42, %v4098_v38  ;;  %4129 = vrcp.f32 %v1181_v55 }
 0x62c   : > { %4131 = vrcp.f32 %v4924_v56 }
 0x62d   : > { %v1292_v45 = vpack.c.bf16 %v1291_v43, %v1291_v43  ;;  %v1247_v50 = vpack.c.bf16 %v1239_v25, %v1238_v44  ;;  %v581_v25 = vpop.f32.mrf.mxu0 }
 0x62e   : > { %v4110_v46 = vpop.eup %4109 }
 0x62f   : > { %3729 = vmatpush3.bf16.xpose.msra.mxu0 %v1247_v50  ;;  %1295 = vxpose.xlu0.c.b16.start.end [1/1] (short) %v1292_v45, 128  ;;  %v4112_v35 = vpop.eup %4111  ;;  %v1236_v0 = vmul.f32 %v4110_v46, %v4888_v48 }
 0x630   : > { %3730 = vmatprep.subr.bf16.mxu0 %v5936_v10  ;;  %v1237_v21 = vmul.f32 %v4112_v35, %v4879_v37  ;;  %v4114_v4 = vpop.eup %4113 }
 0x631   : > { %v4116_v38 = vpop.eup %4115  ;;  %v1234_v18 = vmul.f32 %v4114_v4, %v4881_v63 }
 0x632   : > { %v1246_v13 = vpack.c.bf16 %v1237_v21, %v1236_v0  ;;  %v1235_v11 = vmul.f32 %v4116_v38, %v4858_v5  ;;  %v4118_v61 = vpop.eup %4117 }
 0x633   : > { %v4120_v62 = vpop.eup %4119  ;;  %v1232_v37 = vmul.f32 %v4118_v61, %v4885_v3 }
 0x634   : > { %v1245_v52 = vpack.c.bf16 %v1235_v11, %v1234_v18  ;;  %v1233_v48 = vmul.f32 %v4120_v62, %v4865_v24  ;;  %v4122_v27 = vpop.eup %4121 }
 0x635   : > { %v4124_v60 = vpop.eup %4123  ;;  %v1230_v63 = vmul.f32 %v4122_v27, %v4869_v34 }
 0x636   : > { %v1244_v47 = vpack.c.bf16 %v1233_v48, %v1232_v37  ;;  %v1231_v57 = vmul.f32 %v4124_v60, %v4851_v15  ;;  %v4126_v3 = vpop.eup %4125  ;;  %v4981_v48 = vpop.f32.mrf.mxu0 }
 0x637   : > { %3731 = vmatpush3.bf16.xpose.msra.mxu0 %v1246_v13  ;;  %v4128_v24 = vpop.eup %4127  ;;  %v1228_v1 = vmul.f32 %v4126_v3, %v4875_v8  ;;  %5941 = vst [vmem:[#allocation6_spill] sm:$0xff] %v4981_v48 }
 0x638   : > { %3732 = vmatprep.subr.bf16.mxu0 %v5936_v10  ;;  %v1243_v2 = vpack.c.bf16 %v1231_v57, %v1230_v63  ;;  %v1229_v34 = vmul.f32 %v4128_v24, %v4855_v12 }
 0x63a   : > { %v1242_v56 = vpack.c.bf16 %v1229_v34, %v1228_v1 }
 0x63f   : > { %3733 = vmatpush3.bf16.xpose.msra.mxu0 %v1245_v52 }
 0x640   : > { %3734 = vmatprep.subr.bf16.mxu0 %v5936_v10 }
 0x647   : > { %3735 = vmatpush3.bf16.xpose.msra.mxu0 %v1244_v47  ;;  %v4983_v47 = vpop.f32.mrf.mxu0 }
 0x648   : > { %3736 = vmatprep.subr.bf16.mxu0 %v5936_v10  ;;  %5942 = vst [vmem:[#allocation7_spill] sm:$0xff] %v4983_v47 }
 0x649   : > { %v1177_v5 = vpop.xlane.xlu1 %1176  ;;  %v4985_v27 = vpop.f32.mrf.mxu0 }
 0x64a   : > { %4133 = vrcp.f32 %v1177_v5  ;;  %5943 = vst [vmem:[#allocation8_spill] sm:$0xff] %v4985_v27 }
 0x64b   : > { %v4987_v60 = vpop.f32.mrf.mxu0 }
 0x64c   : > { %5944 = vst [vmem:[#allocation9_spill] sm:$0xff] %v4987_v60 }
 0x64d   : > { %v316_v54 = vpop.permute.xlu1 %315 }
 0x64e   : > { %v555_v59 = vadd.f32 %v4640_v33, %v316_v54  ;;  %v4130_v33 = vpop.eup %4129  ;;  %v4521_v54 = vld [vmem:[%s4587_s24 + $0x8] sm:$0xff] }
 0x64f   : > { %3737 = vmatpush3.bf16.xpose.msra.mxu0 %v1243_v2  ;;  %v4132_v58 = vpop.eup %4131  ;;  %v1226_v8 = vmul.f32 %v4130_v33, %v4861_v7 }
 0x650   : > { %v1293_v6 = vpack.c.bf16 %v555_v59, %v555_v59  ;;  %3738 = vmatprep.subr.bf16.mxu0 %v5936_v10  ;;  %v1227_v17 = vmul.f32 %v4132_v58, %v4846_v9 }
 0x651   : > { %v321_v20 = vpop.permute.xlu1 %320 }
 0x652   : > { %v1336_v55 = vsel %vm655_vm1, %v1293_v6, 0  ;;  %3978 = vmatprep.subr.msk.bf16.mxu1 %vm655_vm1, %v1293_v6  ;;  %v1241_v49 = vpack.c.bf16 %v1227_v17, %v1226_v8  ;;  %v558_v28 = vadd.f32 %v4779_v14, %v321_v20 }
 0x653   : > { %3749 = vmatpush3.bf16.msra.mxu1 %v1336_v55 }
 0x654   : > { %3766 = vmatprep.subr.bf16.mxu1 %v5936_v10  ;;  %v1632_v7 = vpack.c.bf16 %v558_v28, %v558_v28 }
 0x655   : > { %v1179_v15 = vpop.xlane.xlu0 %1178 }
 0x656   : > { %4135 = vrcp.f32 %v1179_v15  ;;  %v1675_v50 = vsel %vm655_vm1, %v1632_v7, 0 }
 0x657   : > { %3739 = vmatpush3.bf16.xpose.msra.mxu0 %v1242_v56  ;;  %v4134_v12 = vpop.eup %4133 }
 0x658   : > { %3740 = vmatprep.subr.bf16.mxu0 %v5936_v10  ;;  %v1224_v40 = vmul.f32 %v4134_v12, %v4899_v51 }
 0x65d   : > { %v351_v43 = vpop.permute.xlu0 %350 }
 0x65e   : > { %v582_v9 = vadd.f32 %v581_v25, %v351_v43 }
 0x65f   : > { %3741 = vmatpush3.bf16.xpose.msra.mxu0 %v1241_v49 }
 0x660   : > { %3742 = vmatprep.subr.bf16.mxu0 %v5936_v10  ;;  %v955_v45 = vpack.c.bf16 %v582_v9, %v582_v9 }
 0x663   : > { %v4136_v16 = vpop.eup %4135 }
 0x664   : > { %v1225_v42 = vmul.f32 %v4136_v16, %v4902_v41 }
 0x666   : > { %v1240_v44 = vpack.c.bf16 %v1225_v42, %v1224_v40 }
 0x668   : > { %3743 = vmatpush3.bf16.xpose.msra.mxu0 %v1240_v44 }
 0x669   : > { %3979 = vmatprep.subr.msk.bf16.mxu0 %vm655_vm1, %v1632_v7 }
 0x66f   : > { %3745 = vmatmul.mubr.bf16.vlgmr.msra.gmra.mxu0 %v955_v45 }
 0x670   : > { %3787 = vmatpush3.bf16.msra.mxu0 %v1675_v50 }
 0x671   : > { %3804 = vmatprep.subr.bf16.mxu0 %v5936_v10 }
 0x681   : > { %v1642_v14 = vpop.trf.xlu1 }
 0x682   : > { %3788 = vmatprep.mubr.msk.bf16.mxu0 %vm630_vm2, %v1642_v14 }
 0x685   : > { %v1643_v51 = vpop.trf.xlu1 }
 0x686   : > { %3789 = vmatmul.mubr.msk.bf16.vlgmr.msra.gmra.mxu0 %vm630_vm2, %v1643_v51 }
 0x689   : > { %v1644_v41 = vpop.trf.xlu1 }
 0x68a   : > { %3792 = vmatprep.mubr.msk.bf16.mxu0 %vm630_vm2, %v1644_v41 }
 0x68d   : > { %v1645_v46 = vpop.trf.xlu1 }
 0x68e   : > { %3793 = vmatmul.mubr.msk.bf16.gmra.mxu0 %vm630_vm2, %v1645_v46 }
 0x691   : > { %v1303_v35 = vpop.trf.xlu0  ;;  %v1646_v0 = vpop.trf.xlu1 }
 0x692   : > { %3750 = vmatprep.mubr.msk.bf16.mxu1 %vm630_vm2, %v1303_v35  ;;  %3796 = vmatprep.mubr.msk.bf16.mxu0 %vm630_vm2, %v1646_v0 }
 0x695   : > { %v1304_v21 = vpop.trf.xlu0  ;;  %v1647_v13 = vpop.trf.xlu1 }
 0x696   : > { %3751 = vmatmul.mubr.msk.bf16.vlgmr.msra.gmra.mxu1 %vm630_vm2, %v1304_v21  ;;  %3797 = vmatmul.mubr.msk.bf16.gmra.mxu0 %vm630_vm2, %v1647_v13 }
 0x699   : > { %v1305_v4 = vpop.trf.xlu0  ;;  %v1648_v38 = vpop.trf.xlu1 }
 0x69a   : > { %3754 = vmatprep.mubr.msk.bf16.mxu1 %vm630_vm2, %v1305_v4  ;;  %3800 = vmatprep.mubr.msk.bf16.mxu0 %vm630_vm2, %v1648_v38 }
 0x69d   : > { %v1306_v18 = vpop.trf.xlu0  ;;  %v1649_v11 = vpop.trf.xlu1 }
 0x69e   : > { %3755 = vmatmul.mubr.msk.bf16.gmra.mxu1 %vm630_vm2, %v1306_v18  ;;  %3801 = vmatmul.mubr.msk.bf16.gmra.mxu0 %vm630_vm2, %v1649_v11 }
 0x69f   : > { %3820 = vmatprep.mubr.msk.bf16.mxu0 %vm4538_vm3, %v5936_v10 }
 0x6a1   : > { %v1307_v52 = vpop.trf.xlu0 }
 0x6a2   : > { %3758 = vmatprep.mubr.msk.bf16.mxu1 %vm630_vm2, %v1307_v52 }
 0x6a5   : > { %v1308_v61 = vpop.trf.xlu0 }
 0x6a6   : > { %3759 = vmatmul.mubr.msk.bf16.gmra.mxu1 %vm630_vm2, %v1308_v61 }
 0x6a9   : > { %v1309_v62 = vpop.trf.xlu0 }
 0x6aa   : > { %3762 = vmatprep.mubr.msk.bf16.mxu1 %vm630_vm2, %v1309_v62 }
 0x6ad   : > { %v1310_v37 = vpop.trf.xlu0 }
 0x6ae   : > { %3763 = vmatmul.mubr.msk.bf16.gmra.mxu1 %vm630_vm2, %v1310_v37 }
 0x6af   : > { %3782 = vmatprep.mubr.msk.bf16.mxu1 %vm4538_vm3, %v5936_v10 }
 0x72f   : > { %v1282_v5 = vpop.f32.mrf.mxu0 }
 0x730   : > { %v1288_v63 = vmul.f32 %v1282_v5, %v4811_v53 }
 0x731   : > { %v3746_v57 = vpop.f32.mrf.mxu0 }
 0x732   : > { %v1289_v2 = vadd.f32 %v4521_v54, %v1288_v63 }
 0x733   : > { %v1285_v3 = vpop.f32.mrf.mxu0 }
 0x734   : > { %1290 = vst [vmem:[%s4819_s7 + $0x8] sm:$0xff] %v1289_v2 }
 0x735   : > { %v3747_v59 = vpop.f32.mrf.mxu0 }
 0x746   : > { %v5002_v15 = vpop.f32.mrf.mxu0 }
 0x748   : > { %v5008_v58 = vpop.f32.mrf.mxu0 }
 0x74a   : > { %v5014_v49 = vpop.f32.mrf.mxu0 }
 0x74c   : > { %v5020_v16 = vpop.f32.mrf.mxu0 }
 0x74e   : > { %v5024_v42 = vpop.f32.mrf.mxu0 }
 0x750   : > { %v5026_v7 = vpop.f32.mrf.mxu0 }
 0x752   : > { %v5028_v9 = vpop.f32.mrf.mxu0 }
 0x754   : > { %v5031_v45 = vpop.f32.mrf.mxu0 }
 0x756   : > { %v4992_v24 = vpop.f32.mrf.mxu1  ;;  %v5035_v50 = vpop.f32.mrf.mxu0 }
 0x758   : > { %v4994_v6 = vpop.f32.mrf.mxu1  ;;  %v5039_v14 = vpop.f32.mrf.mxu0 }
 0x75a   : > { %v4996_v1 = vpop.f32.mrf.mxu1  ;;  %v5043_v51 = vpop.f32.mrf.mxu0 }
 0x75c   : > { %v4998_v55 = vpop.f32.mrf.mxu1  ;;  %v5046_v41 = vpop.f32.mrf.mxu0 }
 0x75e   : > { %v5000_v34 = vpop.f32.mrf.mxu1  ;;  %v5050_v46 = vpop.f32.mrf.mxu0 }
 0x760   : > { %v5004_v56 = vpop.f32.mrf.mxu1  ;;  %v5054_v35 = vpop.f32.mrf.mxu0 }
 0x762   : > { %v5006_v33 = vpop.f32.mrf.mxu1  ;;  %v5058_v0 = vpop.f32.mrf.mxu0 }
 0x764   : > { %v5010_v8 = vpop.f32.mrf.mxu1  ;;  %v5064_v21 = vpop.f32.mrf.mxu0 }
 0x766   : > { %v5012_v17 = vpop.f32.mrf.mxu1 }
 0x768   : > { %v5016_v20 = vpop.f32.mrf.mxu1 }
 0x76a   : > { %v5018_v12 = vpop.f32.mrf.mxu1 }
 0x76c   : > { %v5022_v28 = vpop.f32.mrf.mxu1 }
 0x76e   : > { %v3764_v40 = vpop.f32.mrf.mxu1 }
 0x76f   : > { %1463 = vmax.xlane.f32.xlu0 %v3764_v40 }
 0x770   : > { %v1420_v43 = vpop.f32.mrf.mxu1 }
 0x772   : > { %v3765_v44 = vpop.f32.mrf.mxu1 }
 0x773   : > { %1465 = vmax.xlane.f32.xlu1 %v3765_v44 }
 0x774   : > { %v1423_v25 = vpop.f32.mrf.mxu1 }
 0x775   : > { %1461 = vmax.xlane.f32.xlu0 %v1423_v25 }
 0x777   : > { %1459 = vmax.xlane.f32.xlu1 %v1420_v43 }
 0x779   : > { %1457 = vmax.xlane.f32.xlu0 %v5018_v12 }
 0x77b   : > { %1455 = vmax.xlane.f32.xlu1 %v5012_v17 }
 0x77d   : > { %1453 = vmax.xlane.f32.xlu0 %v5022_v28 }
 0x77f   : > { %1451 = vmax.xlane.f32.xlu1 %v5016_v20 }
 0x781   : > { %1449 = vmax.xlane.f32.xlu0 %v5006_v33 }
 0x783   : > { %1447 = vmax.xlane.f32.xlu1 %v5000_v34 }
 0x785   : > { %1788 = vmax.xlane.f32.xlu0 %v5028_v9 }
 0x787   : > { %1443 = vmax.xlane.f32.xlu1 %v5004_v56 }
 0x789   : > { %1796 = vmax.xlane.f32.xlu0 %v5043_v51 }
 0x78b   : > { %1786 = vmax.xlane.f32.xlu1 %v5024_v42 }
 0x78d   : > { %1792 = vmax.xlane.f32.xlu0 %v5046_v41 }
 0x78f   : > { %1794 = vmax.xlane.f32.xlu1 %v5035_v50 }
 0x791   : > { %1802 = vmax.xlane.f32.xlu0 %v5050_v46 }
 0x793   : > { %1790 = vmax.xlane.f32.xlu1 %v5039_v14 }
 0x795   : > { %1804 = vmax.xlane.f32.xlu0 %v5058_v0 }
 0x797   : > { %1798 = vmax.xlane.f32.xlu1 %v5054_v35 }
 0x799   : > { %1445 = vmax.xlane.f32.xlu0 %v5010_v8 }
 0x79b   : > { %1782 = vmax.xlane.f32.xlu1 %v5026_v7 }
 0x79d   : > { %1800 = vmax.xlane.f32.xlu0 %v5064_v21 }
 0x79f   : > { %1439 = vmax.xlane.f32.xlu1 %v4992_v24 }
 0x7a1   : > { %1784 = vmax.xlane.f32.xlu0 %v5031_v45 }
 0x7a3   : > { %1778 = vmax.xlane.f32.xlu1 %v5002_v15 }
 0x7a5   : > { %1441 = vmax.xlane.f32.xlu0 %v4996_v1 }
 0x7a7   : > { %1435 = vmax.xlane.f32.xlu1 %v4994_v6 }
 0x7a9   : > { %1780 = vmax.xlane.f32.xlu0 %v5014_v49 }
 0x7ab   : > { %1774 = vmax.xlane.f32.xlu1 %v5008_v58 }
 0x7ad   : > { %1437 = vmax.xlane.f32.xlu0 %v4998_v55 }
 0x7b1   : > { %1776 = vmax.xlane.f32.xlu0 %v5020_v16 }
 0x7f8   : > { %v1464_v13 = vpop.xlane.xlu0 %1463 }
 0x7f9   : > { %v1481_v4 = vsub.f32 %v3764_v40, %v1464_v13 }
 0x7fb   : > { %v1511_v38 = vmul.f32 1.442695, %v1481_v4 }
 0x7fc   : > { %v1466_v18 = vpop.xlane.xlu1 %1465 }
 0x7fd   : > { %4137 = vpow2.f32 %v1511_v38  ;;  %v1482_v11 = vsub.f32 %v3765_v44, %v1466_v18 }
 0x7fe   : > { %v1462_v52 = vpop.xlane.xlu0 %1461 }
 0x7ff   : > { %v1513_v61 = vmul.f32 1.442695, %v1482_v11  ;;  %v1480_v62 = vsub.f32 %v1423_v25, %v1462_v52 }
 0x800   : > { %v1460_v37 = vpop.xlane.xlu1 %1459 }
 0x801   : > { %4139 = vpow2.f32 %v1513_v61  ;;  %v1509_v5 = vmul.f32 1.442695, %v1480_v62  ;;  %v1479_v63 = vsub.f32 %v1420_v43, %v1460_v37 }
 0x802   : > { %v1458_v57 = vpop.xlane.xlu0 %1457 }
 0x803   : > { %v1507_v54 = vmul.f32 1.442695, %v1479_v63  ;;  %v1478_v2 = vsub.f32 %v5018_v12, %v1458_v57  ;;  %4141 = vpow2.f32 %v1509_v5 }
 0x804   : > { %v1456_v3 = vpop.xlane.xlu1 %1455 }
 0x805   : > { %4143 = vpow2.f32 %v1507_v54  ;;  %v1505_v59 = vmul.f32 1.442695, %v1478_v2  ;;  %v1477_v40 = vsub.f32 %v5012_v17, %v1456_v3 }
 0x806   : > { %v1454_v13 = vpop.xlane.xlu0 %1453 }
 0x807   : > { %v1503_v4 = vmul.f32 1.442695, %v1477_v40  ;;  %v1476_v44 = vsub.f32 %v5022_v28, %v1454_v13  ;;  %4145 = vpow2.f32 %v1505_v59 }
 0x808   : > { %v1452_v25 = vpop.xlane.xlu1 %1451 }
 0x809   : > { %4147 = vpow2.f32 %v1503_v4  ;;  %v1501_v38 = vmul.f32 1.442695, %v1476_v44  ;;  %v1475_v43 = vsub.f32 %v5016_v20, %v1452_v25 }
 0x80a   : > { %v5080_v18 = vpop.eup %4137  ;;  %v1450_v11 = vpop.xlane.xlu0 %1449 }
 0x80b   : > { %v1499_v12 = vmul.f32 1.442695, %v1475_v43  ;;  %v1474_v52 = vsub.f32 %v5006_v33, %v1450_v11  ;;  %1543 = vadd.xlane.f32.xlu1 %v5080_v18  ;;  %4149 = vpow2.f32 %v1501_v38 }
 0x80c   : > { %v1448_v17 = vpop.xlane.xlu1 %1447 }
 0x80d   : > { %4151 = vpow2.f32 %v1499_v12  ;;  %v1497_v61 = vmul.f32 1.442695, %v1474_v52  ;;  %v1473_v28 = vsub.f32 %v5000_v34, %v1448_v17 }
 0x80e   : > { %v5085_v62 = vpop.eup %4139  ;;  %v5087_v37 = vpop.xlane.xlu0 %1788 }
 0x80f   : > { %v1495_v5 = vmul.f32 1.442695, %v1473_v28  ;;  %1545 = vadd.xlane.f32.xlu0 %v5085_v62  ;;  %4153 = vpow2.f32 %v1497_v61 }
 0x810   : > { %v1444_v20 = vpop.xlane.xlu1 %1443  ;;  %v5090_v63 = vpop.eup %4141 }
 0x811   : > { %4155 = vpow2.f32 %v1495_v5  ;;  %v1471_v33 = vsub.f32 %v5004_v56, %v1444_v20 }
 0x812   : > { %v5093_v57 = vpop.eup %4143  ;;  %v5095_v54 = vpop.xlane.xlu0 %1796 }
 0x813   : > { %v1491_v2 = vmul.f32 1.442695, %v1471_v33  ;;  %1539 = vadd.xlane.f32.xlu1 %v5093_v57  ;;  %1541 = vadd.xlane.f32.xlu0 %v5090_v63 }
 0x814   : > { %v1787_v34 = vpop.xlane.xlu1 %1786  ;;  %v5099_v3 = vpop.eup %4145 }
 0x815   : > { %4157 = vpow2.f32 %v1491_v2  ;;  %v1812_v60 = vsub.f32 %v5024_v42, %v1787_v34 }
 0x816   : > { %v5101_v59 = vpop.eup %4147  ;;  %v5103_v40 = vpop.xlane.xlu0 %1792 }
 0x817   : > { %1535 = vadd.xlane.f32.xlu1 %v5101_v59  ;;  %1537 = vadd.xlane.f32.xlu0 %v5099_v3  ;;  %v1834_v19 = vmul.f32 1.442695, %v1812_v60 }
 0x818   : > { %v1795_v56 = vpop.xlane.xlu1 %1794  ;;  %v5107_v13 = vpop.eup %4149 }
 0x81a   : > { %v5109_v4 = vpop.eup %4151  ;;  %v5111_v44 = vpop.xlane.xlu0 %1802 }
 0x81b   : > { %1531 = vadd.xlane.f32.xlu1 %v5109_v4  ;;  %1533 = vadd.xlane.f32.xlu0 %v5107_v13 }
 0x81c   : > { %v1791_v25 = vpop.xlane.xlu1 %1790  ;;  %v5115_v38 = vpop.eup %4153 }
 0x81e   : > { %v5117_v43 = vpop.eup %4155  ;;  %v5119_v11 = vpop.xlane.xlu0 %1804 }
 0x81f   : > { %1527 = vadd.xlane.f32.xlu1 %v5117_v43  ;;  %1529 = vadd.xlane.f32.xlu0 %v5115_v38  ;;  %v1821_v34 = vsub.f32 %v5058_v0, %v5119_v11 }
 0x820   : > { %v5123_v12 = vpop.xlane.xlu1 %1798 }
 0x822   : > { %v5125_v52 = vpop.eup %4157  ;;  %v1446_v17 = vpop.xlane.xlu0 %1445 }
 0x823   : > { %v1472_v61 = vsub.f32 %v5010_v8, %v1446_v17  ;;  %1523 = vadd.xlane.f32.xlu1 %v5125_v52 }
 0x824   : > { %v1783_v28 = vpop.xlane.xlu1 %1782 }
 0x825   : > { %v1493_v5 = vmul.f32 1.442695, %v1472_v61  ;;  %v1810_v61 = vsub.f32 %v5026_v7, %v1783_v28 }
 0x826   : > { %v5129_v20 = vpop.xlane.xlu0 %1800 }
 0x827   : > { %4159 = vpow2.f32 %v1493_v5 }
 0x828   : > { %v1440_v33 = vpop.xlane.xlu1 %1439 }
 0x829   : > { %v1469_v2 = vsub.f32 %v4992_v24, %v1440_v33  ;;  %v1813_v24 = vsub.f32 %v5028_v9, %v5087_v37  ;;  %v1818_v37 = vsub.f32 %v5054_v35, %v5123_v12  ;;  %v1852_v35 = vmul.f32 1.442695, %v1821_v34 }
 0x82a   : > { %v1785_v10 = vpop.xlane.xlu0 %1784 }
 0x82b   : > { %v1487_v27 = vmul.f32 1.442695, %v1469_v2  ;;  %v1811_v60 = vsub.f32 %v5031_v45, %v1785_v10 }
 0x82c   : > { %v1779_v48 = vpop.xlane.xlu1 %1778 }
 0x82d   : > { %4161 = vpow2.f32 %v1487_v27  ;;  %v1808_v47 = vsub.f32 %v5002_v15, %v1779_v48  ;;  %v1816_v48 = vsub.f32 %v5035_v50, %v1795_v56  ;;  %v1814_v15 = vsub.f32 %v5039_v14, %v1791_v25 }
 0x82e   : > { %v1442_v26 = vpop.xlane.xlu0 %1441  ;;  %v1815_v50 = vsub.f32 %v5046_v41, %v5103_v40  ;;  %v1846_v40 = vmul.f32 1.442695, %v1818_v37 }
 0x82f   : > { %v1826_v8 = vmul.f32 1.442695, %v1808_v47  ;;  %v1470_v17 = vsub.f32 %v4996_v1, %v1442_v26  ;;  %v1830_v47 = vmul.f32 1.442695, %v1810_v61  ;;  %v1836_v26 = vmul.f32 1.442695, %v1813_v24 }
 0x830   : > { %v1842_v1 = vmul.f32 1.442695, %v1816_v48  ;;  %v1838_v9 = vmul.f32 1.442695, %v1814_v15  ;;  %v244_v24 = vld [vmem:[%s5933_s2 + $0x28] sm:$0xff] }
 0x831   : > { %4163 = vpow2.f32 %v1826_v8  ;;  %v1489_v5 = vmul.f32 1.442695, %v1470_v17 }
 0x832   : > { %v1781_v31 = vpop.xlane.xlu0 %1780 }
 0x833   : > { %4165 = vpow2.f32 %v1489_v5  ;;  %v1809_v33 = vsub.f32 %v5014_v49, %v1781_v31  ;;  %v1817_v31 = vsub.f32 %v5043_v51, %v5095_v54  ;;  %v1820_v49 = vsub.f32 %v5050_v46, %v5111_v44  ;;  %v243_v5 = vld [vmem:[%s5933_s2 + $0x20] sm:$0xff] }
 0x834   : > { %v5139_v42 = vpop.eup %4159  ;;  %4167 = vpow2.f32 %v1834_v19  ;;  %v1832_v19 = vmul.f32 1.442695, %v1811_v60  ;;  %v1840_v54 = vmul.f32 1.442695, %v1815_v50  ;;  %v1819_v44 = vsub.f32 %v5064_v21, %v5129_v20 }
 0x835   : > { %v1828_v27 = vmul.f32 1.442695, %v1809_v33  ;;  %1525 = vadd.xlane.f32.xlu0 %v5139_v42  ;;  %v1844_v45 = vmul.f32 1.442695, %v1817_v31  ;;  %v1850_v51 = vmul.f32 1.442695, %v1820_v49  ;;  %v1436_v33 = vpop.xlane.xlu1 %1435 }
 0x836   : > { %v1848_v11 = vmul.f32 1.442695, %v1819_v44  ;;  %v1467_v48 = vsub.f32 %v4994_v6, %v1436_v33 }
 0x837   : > { %4169 = vpow2.f32 %v1828_v27  ;;  %v1438_v27 = vpop.xlane.xlu0 %1437 }
 0x838   : > { %4171 = vpow2.f32 %v1830_v47 }
 0x839   : > { %4173 = vpow2.f32 %v1836_v26  ;;  %v1775_v47 = vpop.xlane.xlu1 %1774  ;;  %v1483_v26 = vmul.f32 1.442695, %v1467_v48 }
 0x83a   : > { %v5145_v7 = vpop.eup %4161  ;;  %4175 = vpow2.f32 %v1842_v1  ;;  %v1806_v60 = vsub.f32 %v5008_v58, %v1775_v47  ;;  %v1468_v1 = vsub.f32 %v4998_v55, %v1438_v27  ;;  %v258_v27 = vld [vmem:[%s5933_s2 + $0x98] sm:$0xff] }
 0x83b   : > { %1519 = vadd.xlane.f32.xlu1 %v5145_v7  ;;  %4177 = vpow2.f32 %v1832_v19  ;;  %v1777_v15 = vpop.xlane.xlu0 %1776 }
 0x83c   : > { %4179 = vpow2.f32 %v1838_v9  ;;  %v1822_v31 = vmul.f32 1.442695, %v1806_v60  ;;  %v1485_v19 = vmul.f32 1.442695, %v1468_v1  ;;  %v1807_v49 = vsub.f32 %v5020_v16, %v1777_v15 }
 0x83d   : > { %4181 = vpow2.f32 %v1844_v45  ;;  %v5945_v15 = vmov 0.0  }
 0x83e   : > { %v5152_v10 = vpop.eup %4163  ;;  %4183 = vpow2.f32 %v1850_v51  ;;  %v1824_v9 = vmul.f32 1.442695, %v1807_v49 }
 0x83f   : > { %1858 = vadd.xlane.f32.xlu1 %v5152_v10  ;;  %4185 = vpow2.f32 %v1840_v54  ;;  %v257_v54 = vld [vmem:[%s5933_s2 + $0x90] sm:$0xff] }
 0x840   : > { %v5157_v14 = vpop.eup %4165  ;;  %4187 = vpow2.f32 %v1846_v40 }
 0x841   : > { %1521 = vadd.xlane.f32.xlu0 %v5157_v14  ;;  %v5162_v46 = vpop.eup %4167  ;;  %4189 = vpow2.f32 %v1852_v35  ;;  %v251_v35 = vld [vmem:[%s5933_s2 + $0x60] sm:$0xff] }
 0x842   : > { %4191 = vpow2.f32 %v1848_v11 }
 0x843   : > { %1866 = vadd.xlane.f32.xlu1 %v5162_v46  ;;  %4193 = vpow2.f32 %v1483_v26 }
 0x844   : > { %v5167_v41 = vpop.eup %4169  ;;  %4195 = vpow2.f32 %v1822_v31 }
 0x845   : > { %1860 = vadd.xlane.f32.xlu0 %v5167_v41  ;;  %v5170_v56 = vpop.eup %4171  ;;  %4197 = vpow2.f32 %v1485_v19 }
 0x846   : > { %v5175_v25 = vpop.eup %4173  ;;  %4199 = vpow2.f32 %v1824_v9 }
 0x847   : > { %1862 = vadd.xlane.f32.xlu1 %v5170_v56  ;;  %v5178_v0 = vpop.eup %4175 }
 0x848   : > { %v5181_v12 = vpop.eup %4177 }
 0x849   : > { %1868 = vadd.xlane.f32.xlu0 %v5175_v25  ;;  %v5184_v28 = vpop.eup %4179 }
 0x84a   : > { %v5187_v21 = vpop.eup %4181 }
 0x84b   : > { %1874 = vadd.xlane.f32.xlu1 %v5178_v0  ;;  %v5190_v20 = vpop.eup %4183 }
 0x84c   : > { %v5193_v2 = vpop.eup %4185 }
 0x84d   : > { %1864 = vadd.xlane.f32.xlu0 %v5181_v12  ;;  %v5196_v8 = vpop.eup %4187 }
 0x84e   : > { %v5199_v17 = vpop.eup %4189 }
 0x84f   : > { %1870 = vadd.xlane.f32.xlu1 %v5184_v28  ;;  %v5202_v61 = vpop.eup %4191 }
 0x850   : > { %v5215_v45 = vpop.eup %4193 }
 0x851   : > { %1876 = vadd.xlane.f32.xlu0 %v5187_v21  ;;  %v5218_v6 = vpop.eup %4195 }
 0x852   : > { %v5221_v58 = vpop.eup %4197 }
 0x853   : > { %1882 = vadd.xlane.f32.xlu1 %v5190_v20  ;;  %v5224_v50 = vpop.eup %4199 }
 0x855   : > { %1872 = vadd.xlane.f32.xlu0 %v5193_v2 }
 0x857   : > { %1878 = vadd.xlane.f32.xlu1 %v5196_v8 }
 0x859   : > { %1884 = vadd.xlane.f32.xlu0 %v5199_v17 }
 0x85d   : > { %1880 = vadd.xlane.f32.xlu0 %v5202_v61 }
 0x868   : > { %285 = vperm.xlu1 %3996, %v243_v5   ;;  %v252_v5 = vld [vmem:[%s5933_s2 + $0x68] sm:$0xff] }
 0x873   : > { %290 = vperm.xlu0 %3995, %v244_v24  }
 0x88c   : > { %1515 = vadd.xlane.f32.xlu1 %v5215_v45 }
 0x890   : > { %1854 = vadd.xlane.f32.xlu1 %v5218_v6 }
 0x892   : > { %1517 = vadd.xlane.f32.xlu0 %v5221_v58 }
 0x894   : > { %v1544_v55 = vpop.xlane.xlu1 %1543 }
 0x895   : > { %4201 = vrcp.f32 %v1544_v55 }
 0x896   : > { %1856 = vadd.xlane.f32.xlu0 %v5224_v50 }
 0x898   : > { %v1546_v16 = vpop.xlane.xlu0 %1545 }
 0x899   : > { %4203 = vrcp.f32 %v1546_v16 }
 0x89c   : > { %v1540_v51 = vpop.xlane.xlu1 %1539  ;;  %v1542_v37 = vpop.xlane.xlu0 %1541 }
 0x89d   : > { %4205 = vrcp.f32 %v1540_v51 }
 0x89e   : > { %4207 = vrcp.f32 %v1542_v37 }
 0x8a0   : > { %v1536_v34 = vpop.xlane.xlu1 %1535  ;;  %v1538_v40 = vpop.xlane.xlu0 %1537 }
 0x8a1   : > { %355 = vperm.xlu1 %3996, %v257_v54   ;;  %4209 = vrcp.f32 %v1536_v34 }
 0x8a2   : > { %v4202_v44 = vpop.eup %4201  ;;  %4211 = vrcp.f32 %v1538_v40 }
 0x8a3   : > { %v1577_v24 = vmul.f32 %v4202_v44, %v5080_v18 }
 0x8a4   : > { %v1532_v48 = vpop.xlane.xlu1 %1531  ;;  %v1534_v60 = vpop.xlane.xlu0 %1533 }
 0x8a5   : > { %325 = vperm.xlu1 %3996, %v251_v35   ;;  %4213 = vrcp.f32 %v1532_v48 }
 0x8a6   : > { %v4204_v11 = vpop.eup %4203  ;;  %4215 = vrcp.f32 %v1534_v60 }
 0x8a7   : > { %v1578_v33 = vmul.f32 %v4204_v11, %v5085_v62 }
 0x8a8   : > { %v1528_v19 = vpop.xlane.xlu1 %1527  ;;  %v1530_v55 = vpop.xlane.xlu0 %1529 }
 0x8a9   : > { %330 = vperm.xlu1 %3996, %v252_v5   ;;  %v1586_v47 = vpack.c.bf16 %v1578_v33, %v1577_v24  ;;  %4217 = vrcp.f32 %v1528_v19 }
 0x8aa   : > { %v4206_v26 = vpop.eup %4205  ;;  %4219 = vrcp.f32 %v1530_v55 }
 0x8ab   : > { %v4208_v1 = vpop.eup %4207  ;;  %3767 = vmatpush3.bf16.xpose.msra.mxu1 %v1586_v47  ;;  %v1575_v18 = vmul.f32 %v4206_v26, %v5093_v57 }
 0x8ac   : > { %360 = vperm.xlu0 %3995, %v258_v27   ;;  %3768 = vmatprep.subr.bf16.mxu1 %v5945_v15  ;;  %v1576_v62 = vmul.f32 %v4208_v1, %v5090_v63  ;;  %v1524_v57 = vpop.xlane.xlu1 %1523 }
 0x8ad   : > { %4221 = vrcp.f32 %v1524_v57 }
 0x8ae   : > { %v4210_v31 = vpop.eup %4209  ;;  %v1585_v49 = vpack.c.bf16 %v1576_v62, %v1575_v18 }
 0x8af   : > { %v4212_v9 = vpop.eup %4211  ;;  %v1573_v16 = vmul.f32 %v4210_v31, %v5101_v59 }
 0x8b0   : > { %v1574_v51 = vmul.f32 %v4212_v9, %v5099_v3 }
 0x8b2   : > { %v4214_v37 = vpop.eup %4213  ;;  %v1584_v54 = vpack.c.bf16 %v1574_v51, %v1573_v16 }
 0x8b3   : > { %3769 = vmatpush3.bf16.xpose.msra.mxu1 %v1585_v49  ;;  %v4216_v34 = vpop.eup %4215  ;;  %v1571_v63 = vmul.f32 %v4214_v37, %v5109_v4 }
 0x8b4   : > { %3770 = vmatprep.subr.bf16.mxu1 %v5945_v15  ;;  %v1572_v40 = vmul.f32 %v4216_v34, %v5107_v13 }
 0x8b6   : > { %v4218_v44 = vpop.eup %4217  ;;  %v1583_v11 = vpack.c.bf16 %v1572_v40, %v1571_v63 }
 0x8b7   : > { %v4220_v5 = vpop.eup %4219  ;;  %v1569_v3 = vmul.f32 %v4218_v44, %v5117_v43 }
 0x8b8   : > { %v1570_v24 = vmul.f32 %v4220_v5, %v5115_v38 }
 0x8ba   : > { %v1582_v4 = vpack.c.bf16 %v1570_v24, %v1569_v3  ;;  %v4222_v13 = vpop.eup %4221 }
 0x8bb   : > { %3771 = vmatpush3.bf16.xpose.msra.mxu1 %v1584_v54  ;;  %v1567_v43 = vmul.f32 %v4222_v13, %v5125_v52 }
 0x8bc   : > { %3772 = vmatprep.subr.bf16.mxu1 %v5945_v15 }
 0x8be   : > { %v1526_v35 = vpop.xlane.xlu0 %1525 }
 0x8bf   : > { %4223 = vrcp.f32 %v1526_v35 }
 0x8c3   : > { %3773 = vmatpush3.bf16.xpose.msra.mxu1 %v1583_v11 }
 0x8c4   : > { %v1520_v59 = vpop.xlane.xlu1 %1519  ;;  %3774 = vmatprep.subr.bf16.mxu1 %v5945_v15 }
 0x8c5   : > { %4225 = vrcp.f32 %v1520_v59 }
 0x8c8   : > { %v5253_v33 = vpop.xlane.xlu1 %1858 }
 0x8ca   : > { %v1522_v48 = vpop.xlane.xlu0 %1521 }
 0x8cb   : > { %4227 = vrcp.f32 %v1522_v48  ;;  %3775 = vmatpush3.bf16.xpose.msra.mxu1 %v1582_v4 }
 0x8cc   : > { %v4224_v47 = vpop.eup %4223  ;;  %v1867_v27 = vpop.xlane.xlu1 %1866  ;;  %3776 = vmatprep.subr.bf16.mxu1 %v5945_v15 }
 0x8cd   : > { %v1568_v26 = vmul.f32 %v4224_v47, %v5139_v42 }
 0x8ce   : > { %v5257_v60 = vpop.xlane.xlu0 %1860 }
 0x8cf   : > { %v1581_v38 = vpack.c.bf16 %v1568_v26, %v1567_v43 }
 0x8d0   : > { %v5260_v1 = vpop.xlane.xlu1 %1862 }
 0x8d2   : > { %v1869_v18 = vpop.xlane.xlu0 %1868  ;;  %v4226_v31 = vpop.eup %4225 }
 0x8d3   : > { %3777 = vmatpush3.bf16.xpose.msra.mxu1 %v1581_v38  ;;  %v1565_v55 = vmul.f32 %v4226_v31, %v5145_v7 }
 0x8d4   : > { %v1875_v62 = vpop.xlane.xlu1 %1874  ;;  %3778 = vmatprep.subr.bf16.mxu1 %v5945_v15 }
 0x8d6   : > { %v1865_v19 = vpop.xlane.xlu0 %1864 }
 0x8d8   : > { %v4228_v49 = vpop.eup %4227  ;;  %v1871_v9 = vpop.xlane.xlu1 %1870 }
 0x8d9   : > { %v1566_v42 = vmul.f32 %v4228_v49, %v5157_v14 }
 0x8da   : > { %v1877_v16 = vpop.xlane.xlu0 %1876 }
 0x8db   : > { %v1580_v51 = vpack.c.bf16 %v1566_v42, %v1565_v55 }
 0x8dc   : > { %v1883_v37 = vpop.xlane.xlu1 %1882 }
 0x8dd   : > { %3779 = vmatpush3.bf16.xpose.msra.mxu1 %v1580_v51  ;;  %4229 = vrcp.f32 %v1883_v37 }
 0x8de   : > { %v1873_v52 = vpop.xlane.xlu0 %1872  ;;  %3780 = vmatprep.subr.bf16.mxu1 %v5945_v15 }
 0x8e0   : > { %v1879_v54 = vpop.xlane.xlu1 %1878 }
 0x8e2   : > { %v1885_v34 = vpop.xlane.xlu0 %1884 }
 0x8e3   : > { %4231 = vrcp.f32 %v1885_v34 }
 0x8e4   : > { %v286_v57 = vpop.permute.xlu1 %285 }
 0x8e5   : > { %v531_v63 = vadd.f32 %v4634_v30, %v286_v57 }
 0x8e6   : > { %v1881_v40 = vpop.xlane.xlu0 %1880 }
 0x8e7   : > { %v1969_v35 = vmul.f32 0.35355338, %v531_v63  ;;  %4233 = vrcp.f32 %v1881_v40 }
 0x8e8   : > { %4235 = vrcp.f32 %v1879_v54 }
 0x8e9   : > { %v1970_v7 = vpack.c.bf16 %v1969_v35, %v1969_v35  ;;  %4237 = vrcp.f32 %v1877_v16 }
 0x8ea   : > { %v4230_v14 = vpop.eup %4229  ;;  %4239 = vrcp.f32 %v1875_v62 }
 0x8eb   : > { %1973 = vxpose.xlu0.c.b16.start.end [1/1] (short) %v1970_v7, 128  ;;  %v1916_v3 = vmul.f32 %v4230_v14, %v5190_v20  ;;  %4241 = vrcp.f32 %v1873_v52 }
 0x8ec   : > { %4243 = vrcp.f32 %v1871_v9 }
 0x8ed   : > { %4245 = vrcp.f32 %v1869_v18 }
 0x8ee   : > { %v291_v44 = vpop.permute.xlu0 %290  ;;  %4247 = vrcp.f32 %v1867_v27 }
 0x8ef   : > { %v534_v11 = vadd.f32 %v4638_v32, %v291_v44  ;;  %4249 = vrcp.f32 %v1865_v19 }
 0x8f0   : > { %v4232_v5 = vpop.eup %4231  ;;  %4251 = vrcp.f32 %v5260_v1 }
 0x8f1   : > { %v2308_v59 = vmul.f32 0.35355338, %v534_v11  ;;  %v1917_v24 = vmul.f32 %v4232_v5, %v5199_v17  ;;  %4253 = vrcp.f32 %v5257_v60 }
 0x8f2   : > { %4255 = vrcp.f32 %v5253_v33 }
 0x8f3   : > { %v2309_v4 = vpack.c.bf16 %v2308_v59, %v2308_v59  ;;  %v1925_v30 = vpack.c.bf16 %v1917_v24, %v1916_v3 }
 0x8f4   : > { %v4234_v48 = vpop.eup %4233 }
 0x8f5   : > { %3805 = vmatpush3.bf16.xpose.msra.mxu0 %v1925_v30  ;;  %2312 = vxpose.xlu1.c.b16.start.end [1/1] (short) %v2309_v4, 128  ;;  %v4236_v13 = vpop.eup %4235  ;;  %v1915_v47 = vmul.f32 %v4234_v48, %v5202_v61 }
 0x8f6   : > { %3806 = vmatprep.subr.bf16.mxu0 %v5945_v15  ;;  %v1914_v32 = vmul.f32 %v4236_v13, %v5196_v8  ;;  %v4238_v43 = vpop.eup %4237 }
 0x8f7   : > { %v4240_v20 = vpop.eup %4239  ;;  %v1913_v17 = vmul.f32 %v4238_v43, %v5187_v21 }
 0x8f8   : > { %v1924_v26 = vpack.c.bf16 %v1915_v47, %v1914_v32  ;;  %v1912_v38 = vmul.f32 %v4240_v20, %v5178_v0  ;;  %v4242_v31 = vpop.eup %4241 }
 0x8f9   : > { %v4244_v49 = vpop.eup %4243  ;;  %v1911_v8 = vmul.f32 %v4242_v31, %v5193_v2 }
 0x8fa   : > { %v1923_v62 = vpack.c.bf16 %v1913_v17, %v1912_v38  ;;  %v1910_v61 = vmul.f32 %v4244_v49, %v5184_v28  ;;  %v4246_v18 = vpop.eup %4245 }
 0x8fb   : > { %v4248_v21 = vpop.eup %4247  ;;  %v1909_v0 = vmul.f32 %v4246_v18, %v5175_v25 }
 0x8fc   : > { %v1922_v9 = vpack.c.bf16 %v1911_v8, %v1910_v61  ;;  %v1908_v27 = vmul.f32 %v4248_v21, %v5162_v46  ;;  %v4250_v2 = vpop.eup %4249  ;;  %v4522_v21 = vld [vmem:[%s4587_s24 + $0x10] sm:$0xff] }
 0x8fd   : > { %3807 = vmatpush3.bf16.xpose.msra.mxu0 %v1924_v26  ;;  %v4252_v1 = vpop.eup %4251  ;;  %v1907_v28 = vmul.f32 %v4250_v2, %v5181_v12 }
 0x8fe   : > { %3808 = vmatprep.subr.bf16.mxu0 %v5945_v15  ;;  %v1921_v19 = vpack.c.bf16 %v1909_v0, %v1908_v27  ;;  %v1906_v16 = vmul.f32 %v4252_v1, %v5170_v56  ;;  %v4254_v25 = vpop.eup %4253 }
 0x8ff   : > { %v4256_v33 = vpop.eup %4255  ;;  %v1905_v52 = vmul.f32 %v4254_v25, %v5167_v41 }
 0x900   : > { %v1920_v51 = vpack.c.bf16 %v1907_v28, %v1906_v16  ;;  %v1904_v12 = vmul.f32 %v4256_v33, %v5152_v10  ;;  %v4523_v28 = vld [vmem:[%s4587_s24 + $0x18] sm:$0xff] }
 0x902   : > { %v1919_v54 = vpack.c.bf16 %v1905_v52, %v1904_v12 }
 0x905   : > { %3809 = vmatpush3.bf16.xpose.msra.mxu0 %v1923_v62 }
 0x906   : > { %3810 = vmatprep.subr.bf16.mxu0 %v5945_v15 }
 0x90d   : > { %3811 = vmatpush3.bf16.xpose.msra.mxu0 %v1922_v9 }
 0x90e   : > { %3812 = vmatprep.subr.bf16.mxu0 %v5945_v15 }
 0x915   : > { %v1516_v55 = vpop.xlane.xlu1 %1515  ;;  %3813 = vmatpush3.bf16.xpose.msra.mxu0 %v1921_v19 }
 0x916   : > { %3814 = vmatprep.subr.bf16.mxu0 %v5945_v15  ;;  %4257 = vrcp.f32 %v1516_v55 }
 0x919   : > { %v1855_v42 = vpop.xlane.xlu1 %1854 }
 0x91b   : > { %v1518_v60 = vpop.xlane.xlu0 %1517 }
 0x91c   : > { %4259 = vrcp.f32 %v1518_v60 }
 0x91d   : > { %3815 = vmatpush3.bf16.xpose.msra.mxu0 %v1920_v51  ;;  %4261 = vrcp.f32 %v1855_v42  ;;  %v356_v46 = vpop.permute.xlu1 %355 }
 0x91e   : > { %3816 = vmatprep.subr.bf16.mxu0 %v5945_v15  ;;  %v587_v3 = vadd.f32 %v4797_v39, %v356_v46 }
 0x91f   : > { %v1857_v37 = vpop.xlane.xlu0 %1856 }
 0x920   : > { %4263 = vrcp.f32 %v1857_v37 }
 0x921   : > { %v326_v34 = vpop.permute.xlu1 %325 }
 0x922   : > { %v563_v63 = vadd.f32 %v4787_v22, %v326_v34 }
 0x923   : > { %v4258_v56 = vpop.eup %4257 }
 0x924   : > { %v1563_v35 = vmul.f32 %v4258_v56, %v5215_v45  ;;  %v1971_v11 = vpack.c.bf16 %v563_v63, %v563_v63 }
 0x925   : > { %3817 = vmatpush3.bf16.xpose.msra.mxu0 %v1919_v54  ;;  %v331_v40 = vpop.permute.xlu1 %330 }
 0x926   : > { %3818 = vmatprep.subr.bf16.mxu0 %v5945_v15  ;;  %v566_v10 = vadd.f32 %v4794_v36, %v331_v40  ;;  %v2014_v36 = vsel %vm655_vm1, %v1971_v11, 0 }
 0x927   : > { %v361_v22 = vpop.permute.xlu0 %360 }
 0x928   : > { %v2310_v45 = vpack.c.bf16 %v566_v10, %v566_v10  ;;  %v590_v4 = vadd.f32 %v4954_v23, %v361_v22 }
 0x929   : > { %v4260_v57 = vpop.eup %4259 }
 0x92a   : > { %v1564_v7 = vmul.f32 %v4260_v57, %v5221_v58  ;;  %v4262_v14 = vpop.eup %4261  ;;  %v1294_v58 = vpack.c.bf16 %v587_v3, %v587_v3  ;;  %v2353_v39 = vsel %vm655_vm1, %v2310_v45, 0 }
 0x92b   : > { %v1902_v5 = vmul.f32 %v4262_v14, %v5218_v6  ;;  %v1633_v6 = vpack.c.bf16 %v590_v4, %v590_v4 }
 0x92c   : > { %v1579_v44 = vpack.c.bf16 %v1564_v7, %v1563_v35 }
 0x92d   : > { %v4264_v41 = vpop.eup %4263 }
 0x92e   : > { %3781 = vmatpush3.bf16.xpose.msra.mxu1 %v1579_v44  ;;  %v1903_v59 = vmul.f32 %v4264_v41, %v5224_v50 }
 0x92f   : > { %3980 = vmatprep.subr.msk.bf16.mxu1 %vm655_vm1, %v1971_v11 }
 0x930   : > { %v1918_v24 = vpack.c.bf16 %v1903_v59, %v1902_v5 }
 0x932   : > { %3819 = vmatpush3.bf16.xpose.msra.mxu0 %v1918_v24 }
 0x933   : > { %3981 = vmatprep.subr.msk.bf16.mxu0 %vm655_vm1, %v2310_v45 }
 0x935   : > { %3783 = vmatmul.mubr.bf16.vlgmr.msra.gmra.mxu1 %v1294_v58 }
 0x936   : > { %3825 = vmatpush3.bf16.msra.mxu1 %v2014_v36 }
 0x937   : > { %3842 = vmatprep.subr.bf16.mxu1 %v5945_v15 }
 0x939   : > { %3821 = vmatmul.mubr.bf16.vlgmr.msra.gmra.mxu0 %v1633_v6 }
 0x93a   : > { %3863 = vmatpush3.bf16.msra.mxu0 %v2353_v39 }
 0x93b   : > { %3880 = vmatprep.subr.bf16.mxu0 %v5945_v15 }
 0x94d   : > { %v1981_v50 = vpop.trf.xlu0 }
 0x94e   : > { %3826 = vmatprep.mubr.msk.bf16.mxu1 %vm630_vm2, %v1981_v50 }
 0x951   : > { %v1982_v30 = vpop.trf.xlu0 }
 0x952   : > { %3827 = vmatmul.mubr.msk.bf16.vlgmr.msra.gmra.mxu1 %vm630_vm2, %v1982_v30 }
 0x955   : > { %v1983_v23 = vpop.trf.xlu0 }
 0x956   : > { %3830 = vmatprep.mubr.msk.bf16.mxu1 %vm630_vm2, %v1983_v23 }
 0x957   : > { %v2320_v48 = vpop.trf.xlu1 }
 0x958   : > { %3864 = vmatprep.mubr.msk.bf16.mxu0 %vm630_vm2, %v2320_v48 }
 0x959   : > { %v1984_v13 = vpop.trf.xlu0 }
 0x95a   : > { %3831 = vmatmul.mubr.msk.bf16.gmra.mxu1 %vm630_vm2, %v1984_v13 }
 0x95b   : > { %v2321_v47 = vpop.trf.xlu1 }
 0x95c   : > { %3865 = vmatmul.mubr.msk.bf16.vlgmr.msra.gmra.mxu0 %vm630_vm2, %v2321_v47 }
 0x95d   : > { %v1985_v32 = vpop.trf.xlu0 }
 0x95e   : > { %3834 = vmatprep.mubr.msk.bf16.mxu1 %vm630_vm2, %v1985_v32 }
 0x95f   : > { %v2322_v26 = vpop.trf.xlu1 }
 0x960   : > { %3868 = vmatprep.mubr.msk.bf16.mxu0 %vm630_vm2, %v2322_v26 }
 0x961   : > { %v1986_v43 = vpop.trf.xlu0 }
 0x962   : > { %3835 = vmatmul.mubr.msk.bf16.gmra.mxu1 %vm630_vm2, %v1986_v43 }
 0x963   : > { %v2323_v20 = vpop.trf.xlu1 }
 0x964   : > { %3869 = vmatmul.mubr.msk.bf16.gmra.mxu0 %vm630_vm2, %v2323_v20 }
 0x965   : > { %v1987_v17 = vpop.trf.xlu0 }
 0x966   : > { %3838 = vmatprep.mubr.msk.bf16.mxu1 %vm630_vm2, %v1987_v17 }
 0x967   : > { %v2324_v38 = vpop.trf.xlu1 }
 0x968   : > { %3872 = vmatprep.mubr.msk.bf16.mxu0 %vm630_vm2, %v2324_v38 }
 0x969   : > { %v1988_v62 = vpop.trf.xlu0 }
 0x96a   : > { %3839 = vmatmul.mubr.msk.bf16.gmra.mxu1 %vm630_vm2, %v1988_v62 }
 0x96b   : > { %v2325_v31 = vpop.trf.xlu1  ;;  %3858 = vmatprep.mubr.msk.bf16.mxu1 %vm4538_vm3, %v5945_v15 }
 0x96c   : > { %3873 = vmatmul.mubr.msk.bf16.gmra.mxu0 %vm630_vm2, %v2325_v31 }
 0x96f   : > { %v2326_v49 = vpop.trf.xlu1 }
 0x970   : > { %3876 = vmatprep.mubr.msk.bf16.mxu0 %vm630_vm2, %v2326_v49 }
 0x973   : > { %v2327_v8 = vpop.trf.xlu1 }
 0x974   : > { %3877 = vmatmul.mubr.msk.bf16.gmra.mxu0 %vm630_vm2, %v2327_v8 }
 0x975   : > { %3896 = vmatprep.mubr.msk.bf16.mxu0 %vm4538_vm3, %v5945_v15 }
 0x9f5   : > { %v1621_v61 = vpop.f32.mrf.mxu1 }
 0x9f6   : > { %v1627_v9 = vmul.f32 %v1621_v61, %v4811_v53 }
 0x9f7   : > { %v3784_v18 = vpop.f32.mrf.mxu1 }
 0x9f8   : > { %v1628_v0 = vadd.f32 %v4522_v21, %v1627_v9 }
 0x9f9   : > { %v1624_v27 = vpop.f32.mrf.mxu1  ;;  %v1960_v19 = vpop.f32.mrf.mxu0 }
 0x9fa   : > { %1629 = vst [vmem:[%s4819_s7 + $0x10] sm:$0xff] %v1628_v0  ;;  %v1966_v2 = vmul.f32 %v1960_v19, %v4811_v53 }
 0x9fb   : > { %v3785_v55 = vpop.f32.mrf.mxu1  ;;  %v3822_v1 = vpop.f32.mrf.mxu0 }
 0x9fc   : > { %v1967_v42 = vadd.f32 %v4523_v28, %v1966_v2 }
 0x9fd   : > { %v1963_v16 = vpop.f32.mrf.mxu0 }
 0x9fe   : > { %1968 = vst [vmem:[%s4819_s7 + $0x18] sm:$0xff] %v1967_v42 }
 0x9ff   : > { %v3823_v60 = vpop.f32.mrf.mxu0 }
 0xa12   : > { %v5332_v51 = vpop.f32.mrf.mxu1 }
 0xa14   : > { %v5334_v25 = vpop.f32.mrf.mxu1 }
 0xa16   : > { %v5336_v33 = vpop.f32.mrf.mxu1 }
 0xa18   : > { %v5338_v46 = vpop.f32.mrf.mxu1 }
 0xa1a   : > { %v5340_v37 = vpop.f32.mrf.mxu1 }
 0xa1c   : > { %v5342_v52 = vpop.f32.mrf.mxu1  ;;  %v5344_v12 = vpop.f32.mrf.mxu0 }
 0xa1e   : > { %v5346_v54 = vpop.f32.mrf.mxu1  ;;  %v5348_v34 = vpop.f32.mrf.mxu0 }
 0xa20   : > { %v5350_v56 = vpop.f32.mrf.mxu1  ;;  %v5354_v63 = vpop.f32.mrf.mxu0 }
 0xa22   : > { %v5352_v57 = vpop.f32.mrf.mxu1  ;;  %v5360_v7 = vpop.f32.mrf.mxu0 }
 0xa24   : > { %v5356_v40 = vpop.f32.mrf.mxu1  ;;  %v5364_v41 = vpop.f32.mrf.mxu0 }
 0xa26   : > { %v5358_v35 = vpop.f32.mrf.mxu1  ;;  %v5366_v5 = vpop.f32.mrf.mxu0 }
 0xa28   : > { %v5362_v14 = vpop.f32.mrf.mxu1  ;;  %v5368_v3 = vpop.f32.mrf.mxu0 }
 0xa2a   : > { %v3840_v44 = vpop.f32.mrf.mxu1  ;;  %v5371_v22 = vpop.f32.mrf.mxu0 }
 0xa2b   : > { %2141 = vmax.xlane.f32.xlu0 %v3840_v44 }
 0xa2c   : > { %v2098_v11 = vpop.f32.mrf.mxu1  ;;  %v5375_v24 = vpop.f32.mrf.mxu0 }
 0xa2e   : > { %v3841_v10 = vpop.f32.mrf.mxu1  ;;  %v5379_v45 = vpop.f32.mrf.mxu0 }
 0xa2f   : > { %2143 = vmax.xlane.f32.xlu1 %v3841_v10 }
 0xa30   : > { %v2101_v59 = vpop.f32.mrf.mxu1  ;;  %v5383_v58 = vpop.f32.mrf.mxu0 }
 0xa31   : > { %2139 = vmax.xlane.f32.xlu0 %v2101_v59 }
 0xa32   : > { %v5387_v4 = vpop.f32.mrf.mxu0 }
 0xa33   : > { %2137 = vmax.xlane.f32.xlu1 %v2098_v11 }
 0xa34   : > { %v5390_v36 = vpop.f32.mrf.mxu0 }
 0xa35   : > { %2135 = vmax.xlane.f32.xlu0 %v5358_v35 }
 0xa36   : > { %v5394_v6 = vpop.f32.mrf.mxu0 }
 0xa37   : > { %2133 = vmax.xlane.f32.xlu1 %v5352_v57 }
 0xa38   : > { %v5398_v39 = vpop.f32.mrf.mxu0 }
 0xa39   : > { %2131 = vmax.xlane.f32.xlu0 %v5362_v14 }
 0xa3a   : > { %v5404_v50 = vpop.f32.mrf.mxu0 }
 0xa3b   : > { %2129 = vmax.xlane.f32.xlu1 %v5356_v40 }
 0xa3d   : > { %2127 = vmax.xlane.f32.xlu0 %v5346_v54 }
 0xa3f   : > { %2125 = vmax.xlane.f32.xlu1 %v5340_v37 }
 0xa41   : > { %2466 = vmax.xlane.f32.xlu0 %v5368_v3 }
 0xa43   : > { %2121 = vmax.xlane.f32.xlu1 %v5342_v52 }
 0xa45   : > { %2474 = vmax.xlane.f32.xlu0 %v5383_v58 }
 0xa47   : > { %2464 = vmax.xlane.f32.xlu1 %v5364_v41 }
 0xa49   : > { %2470 = vmax.xlane.f32.xlu0 %v5387_v4 }
 0xa4b   : > { %2472 = vmax.xlane.f32.xlu1 %v5375_v24 }
 0xa4d   : > { %2480 = vmax.xlane.f32.xlu0 %v5390_v36 }
 0xa4f   : > { %2468 = vmax.xlane.f32.xlu1 %v5379_v45 }
 0xa51   : > { %2482 = vmax.xlane.f32.xlu0 %v5398_v39 }
 0xa53   : > { %2476 = vmax.xlane.f32.xlu1 %v5394_v6 }
 0xa55   : > { %2123 = vmax.xlane.f32.xlu0 %v5350_v56 }
 0xa57   : > { %2460 = vmax.xlane.f32.xlu1 %v5366_v5 }
 0xa59   : > { %2478 = vmax.xlane.f32.xlu0 %v5404_v50 }
 0xa5b   : > { %2117 = vmax.xlane.f32.xlu1 %v5332_v51 }
 0xa5d   : > { %2462 = vmax.xlane.f32.xlu0 %v5371_v22 }
 0xa5f   : > { %2456 = vmax.xlane.f32.xlu1 %v5344_v12 }
 0xa61   : > { %2119 = vmax.xlane.f32.xlu0 %v5336_v33 }
 0xa63   : > { %2113 = vmax.xlane.f32.xlu1 %v5334_v25 }
 0xa65   : > { %2458 = vmax.xlane.f32.xlu0 %v5354_v63 }
 0xa67   : > { %2452 = vmax.xlane.f32.xlu1 %v5348_v34 }
 0xa69   : > { %2115 = vmax.xlane.f32.xlu0 %v5338_v46 }
 0xa6d   : > { %2454 = vmax.xlane.f32.xlu0 %v5360_v7 }
 0xab4   : > { %v2142_v30 = vpop.xlane.xlu0 %2141 }
 0xab5   : > { %v2159_v23 = vsub.f32 %v3840_v44, %v2142_v30 }
 0xab7   : > { %v2189_v48 = vmul.f32 1.442695, %v2159_v23 }
 0xab8   : > { %v2144_v13 = vpop.xlane.xlu1 %2143 }
 0xab9   : > { %4265 = vpow2.f32 %v2189_v48  ;;  %v2160_v47 = vsub.f32 %v3841_v10, %v2144_v13 }
 0xaba   : > { %v2140_v32 = vpop.xlane.xlu0 %2139 }
 0xabb   : > { %v2191_v26 = vmul.f32 1.442695, %v2160_v47  ;;  %v2158_v43 = vsub.f32 %v2101_v59, %v2140_v32 }
 0xabc   : > { %v2138_v20 = vpop.xlane.xlu1 %2137 }
 0xabd   : > { %4267 = vpow2.f32 %v2191_v26  ;;  %v2187_v17 = vmul.f32 1.442695, %v2158_v43  ;;  %v2157_v38 = vsub.f32 %v2098_v11, %v2138_v20 }
 0xabe   : > { %v2136_v62 = vpop.xlane.xlu0 %2135 }
 0xabf   : > { %v2185_v31 = vmul.f32 1.442695, %v2157_v38  ;;  %v2156_v49 = vsub.f32 %v5358_v35, %v2136_v62  ;;  %4269 = vpow2.f32 %v2187_v17 }
 0xac0   : > { %v2134_v8 = vpop.xlane.xlu1 %2133 }
 0xac1   : > { %4271 = vpow2.f32 %v2185_v31  ;;  %v2183_v61 = vmul.f32 1.442695, %v2156_v49  ;;  %v2155_v9 = vsub.f32 %v5352_v57, %v2134_v8 }
 0xac2   : > { %v2132_v18 = vpop.xlane.xlu0 %2131 }
 0xac3   : > { %v2181_v21 = vmul.f32 1.442695, %v2155_v9  ;;  %v2154_v0 = vsub.f32 %v5362_v14, %v2132_v18  ;;  %4273 = vpow2.f32 %v2183_v61 }
 0xac4   : > { %v2130_v27 = vpop.xlane.xlu1 %2129 }
 0xac5   : > { %4275 = vpow2.f32 %v2181_v21  ;;  %v2179_v19 = vmul.f32 1.442695, %v2154_v0  ;;  %v2153_v2 = vsub.f32 %v5356_v40, %v2130_v27 }
 0xac6   : > { %v5420_v55 = vpop.eup %4265  ;;  %v2128_v1 = vpop.xlane.xlu0 %2127 }
 0xac7   : > { %v2177_v28 = vmul.f32 1.442695, %v2153_v2  ;;  %v2152_v42 = vsub.f32 %v5346_v54, %v2128_v1  ;;  %2221 = vadd.xlane.f32.xlu1 %v5420_v55  ;;  %4277 = vpow2.f32 %v2179_v19 }
 0xac8   : > { %v2126_v16 = vpop.xlane.xlu1 %2125 }
 0xac9   : > { %4279 = vpow2.f32 %v2177_v28  ;;  %v2175_v60 = vmul.f32 1.442695, %v2152_v42  ;;  %v2151_v57 = vsub.f32 %v5340_v37, %v2126_v16 }
 0xaca   : > { %v5425_v35 = vpop.eup %4267  ;;  %v5427_v14 = vpop.xlane.xlu0 %2466 }
 0xacb   : > { %v2173_v44 = vmul.f32 1.442695, %v2151_v57  ;;  %2223 = vadd.xlane.f32.xlu0 %v5425_v35  ;;  %4281 = vpow2.f32 %v2175_v60 }
 0xacc   : > { %v2122_v40 = vpop.xlane.xlu1 %2121  ;;  %v5430_v11 = vpop.eup %4269 }
 0xacd   : > { %4283 = vpow2.f32 %v2173_v44  ;;  %v2149_v54 = vsub.f32 %v5342_v52, %v2122_v40 }
 0xace   : > { %v5433_v10 = vpop.eup %4271  ;;  %v5435_v59 = vpop.xlane.xlu0 %2474 }
 0xacf   : > { %v2169_v30 = vmul.f32 1.442695, %v2149_v54  ;;  %2217 = vadd.xlane.f32.xlu1 %v5433_v10  ;;  %2219 = vadd.xlane.f32.xlu0 %v5430_v11 }
 0xad0   : > { %v2465_v37 = vpop.xlane.xlu1 %2464  ;;  %v5439_v23 = vpop.eup %4273 }
 0xad1   : > { %4285 = vpow2.f32 %v2169_v30  ;;  %v2490_v1 = vsub.f32 %v5364_v41, %v2465_v37 }
 0xad2   : > { %v5441_v48 = vpop.eup %4275  ;;  %v5443_v13 = vpop.xlane.xlu0 %2470 }
 0xad3   : > { %2213 = vadd.xlane.f32.xlu1 %v5441_v48  ;;  %2215 = vadd.xlane.f32.xlu0 %v5439_v23  ;;  %v2512_v60 = vmul.f32 1.442695, %v2490_v1 }
 0xad4   : > { %v2473_v52 = vpop.xlane.xlu1 %2472  ;;  %v5447_v47 = vpop.eup %4277 }
 0xad6   : > { %v5449_v32 = vpop.eup %4279  ;;  %v5451_v26 = vpop.xlane.xlu0 %2480 }
 0xad7   : > { %2209 = vadd.xlane.f32.xlu1 %v5449_v32  ;;  %2211 = vadd.xlane.f32.xlu0 %v5447_v47 }
 0xad8   : > { %v2469_v43 = vpop.xlane.xlu1 %2468  ;;  %v5455_v20 = vpop.eup %4281 }
 0xada   : > { %v5457_v17 = vpop.eup %4283  ;;  %v5459_v38 = vpop.xlane.xlu0 %2482 }
 0xadb   : > { %2205 = vadd.xlane.f32.xlu1 %v5457_v17  ;;  %2207 = vadd.xlane.f32.xlu0 %v5455_v20 }
 0xadc   : > { %v5463_v62 = vpop.xlane.xlu1 %2476 }
 0xade   : > { %v5465_v31 = vpop.eup %4285  ;;  %v2124_v49 = vpop.xlane.xlu0 %2123 }
 0xadf   : > { %v2150_v8 = vsub.f32 %v5350_v56, %v2124_v49  ;;  %2201 = vadd.xlane.f32.xlu1 %v5465_v31 }
 0xae0   : > { %v2461_v61 = vpop.xlane.xlu1 %2460 }
 0xae1   : > { %v2171_v9 = vmul.f32 1.442695, %v2150_v8  ;;  %v2488_v57 = vsub.f32 %v5366_v5, %v2461_v61  ;;  %v2492_v8 = vsub.f32 %v5379_v45, %v2469_v43  ;;  %v2493_v45 = vsub.f32 %v5387_v4, %v5443_v13 }
 0xae2   : > { %v5469_v18 = vpop.xlane.xlu0 %2478 }
 0xae3   : > { %4287 = vpow2.f32 %v2171_v9  ;;  %v2508_v30 = vmul.f32 1.442695, %v2488_v57  ;;  %v2499_v9 = vsub.f32 %v5398_v39, %v5459_v38 }
 0xae4   : > { %v2118_v21 = vpop.xlane.xlu1 %2117 }
 0xae5   : > { %v2147_v0 = vsub.f32 %v5332_v51, %v2118_v21  ;;  %v2491_v51 = vsub.f32 %v5368_v3, %v5427_v14 }
 0xae6   : > { %v2463_v27 = vpop.xlane.xlu0 %2462 }
 0xae7   : > { %v2165_v19 = vmul.f32 1.442695, %v2147_v0  ;;  %v2489_v5 = vsub.f32 %v5371_v22, %v2463_v27 }
 0xae8   : > { %v2457_v2 = vpop.xlane.xlu1 %2456 }
 0xae9   : > { %4289 = vpow2.f32 %v2165_v19  ;;  %v2486_v28 = vsub.f32 %v5344_v12, %v2457_v2  ;;  %v2494_v12 = vsub.f32 %v5375_v24, %v2473_v52  ;;  %v2510_v14 = vmul.f32 1.442695, %v2489_v5 }
 0xaea   : > { %v2120_v42 = vpop.xlane.xlu0 %2119  ;;  %v2498_v24 = vsub.f32 %v5390_v36, %v5451_v26  ;;  %v2516_v52 = vmul.f32 1.442695, %v2492_v8  ;;  %v2518_v26 = vmul.f32 1.442695, %v2493_v45 }
 0xaeb   : > { %v2504_v56 = vmul.f32 1.442695, %v2486_v28  ;;  %v2148_v16 = vsub.f32 %v5336_v33, %v2120_v42  ;;  %v2514_v33 = vmul.f32 1.442695, %v2491_v51  ;;  %v2520_v49 = vmul.f32 1.442695, %v2494_v12 }
 0xaed   : > { %4291 = vpow2.f32 %v2504_v56  ;;  %v2167_v44 = vmul.f32 1.442695, %v2148_v16  ;;  %v245_v56 = vld [vmem:[%s5933_s2 + $0x30] sm:$0xff]  ;;  %v246_v16 = vld [vmem:[%s5933_s2 + $0x38] sm:$0xff] }
 0xaee   : > { %v2459_v40 = vpop.xlane.xlu0 %2458 }
 0xaef   : > { %4293 = vpow2.f32 %v2167_v44  ;;  %v2487_v54 = vsub.f32 %v5354_v63, %v2459_v40  ;;  %v2495_v63 = vsub.f32 %v5383_v58, %v5435_v59  ;;  %v2528_v58 = vmul.f32 1.442695, %v2498_v24 }
 0xaf0   : > { %v5479_v41 = vpop.eup %4287  ;;  %4295 = vpow2.f32 %v2512_v60  ;;  %v2496_v59 = vsub.f32 %v5394_v6, %v5463_v62  ;;  %v2530_v6 = vmul.f32 1.442695, %v2499_v9  ;;  %v2497_v62 = vsub.f32 %v5404_v50, %v5469_v18  ;;  %v2114_v60 = vpop.xlane.xlu1 %2113  ;;  %v254_v9 = vld [vmem:[%s5933_s2 + $0x78] sm:$0xff] }
 0xaf1   : > { %v2506_v37 = vmul.f32 1.442695, %v2487_v54  ;;  %2203 = vadd.xlane.f32.xlu0 %v5479_v41  ;;  %v2522_v61 = vmul.f32 1.442695, %v2495_v63  ;;  %v2145_v57 = vsub.f32 %v5334_v25, %v2114_v60 }
 0xaf2   : > { %v2524_v13 = vmul.f32 1.442695, %v2496_v59  ;;  %v2526_v38 = vmul.f32 1.442695, %v2497_v62  ;;  %v2116_v40 = vpop.xlane.xlu0 %2115 }
 0xaf3   : > { %4297 = vpow2.f32 %v2506_v37  ;;  %v2161_v51 = vmul.f32 1.442695, %v2145_v57  ;;  %v2146_v12 = vsub.f32 %v5338_v46, %v2116_v40 }
 0xaf4   : > { %4299 = vpow2.f32 %v2508_v30  ;;  %v2453_v44 = vpop.xlane.xlu1 %2452 }
 0xaf5   : > { %4301 = vpow2.f32 %v2514_v33  ;;  %v2484_v54 = vsub.f32 %v5348_v34, %v2453_v44  ;;  %v2163_v33 = vmul.f32 1.442695, %v2146_v12 }
 0xaf6   : > { %v5485_v3 = vpop.eup %4289  ;;  %4303 = vpow2.f32 %v2520_v49  ;;  %v2455_v30 = vpop.xlane.xlu0 %2454 }
 0xaf7   : > { %2197 = vadd.xlane.f32.xlu1 %v5485_v3  ;;  %4305 = vpow2.f32 %v2510_v14  ;;  %v2500_v37 = vmul.f32 1.442695, %v2484_v54  ;;  %v2485_v5 = vsub.f32 %v5360_v7, %v2455_v30 }
 0xaf8   : > { %4307 = vpow2.f32 %v2516_v52  ;;  %v259_v52 = vld [vmem:[%s5933_s2 + $0xa0] sm:$0xff] }
 0xaf9   : > { %4309 = vpow2.f32 %v2522_v61  ;;  %v2502_v49 = vmul.f32 1.442695, %v2485_v5 }
 0xafa   : > { %v5492_v22 = vpop.eup %4291  ;;  %4311 = vpow2.f32 %v2528_v58  ;;  %v253_v58 = vld [vmem:[%s5933_s2 + $0x70] sm:$0xff] }
 0xafb   : > { %2536 = vadd.xlane.f32.xlu1 %v5492_v22  ;;  %4313 = vpow2.f32 %v2518_v26 }
 0xafc   : > { %v5497_v43 = vpop.eup %4293  ;;  %4315 = vpow2.f32 %v2524_v13 }
 0xafd   : > { %2199 = vadd.xlane.f32.xlu0 %v5497_v43  ;;  %v5502_v36 = vpop.eup %4295  ;;  %4317 = vpow2.f32 %v2530_v6 }
 0xafe   : > { %4319 = vpow2.f32 %v2526_v38 }
 0xaff   : > { %2544 = vadd.xlane.f32.xlu1 %v5502_v36  ;;  %4321 = vpow2.f32 %v2161_v51 }
 0xb00   : > { %v5507_v4 = vpop.eup %4297  ;;  %4323 = vpow2.f32 %v2500_v37 }
 0xb01   : > { %2538 = vadd.xlane.f32.xlu0 %v5507_v4  ;;  %v5510_v21 = vpop.eup %4299  ;;  %4325 = vpow2.f32 %v2163_v33 }
 0xb02   : > { %v5515_v0 = vpop.eup %4301  ;;  %4327 = vpow2.f32 %v2502_v49 }
 0xb03   : > { %2540 = vadd.xlane.f32.xlu1 %v5510_v21  ;;  %v5518_v39 = vpop.eup %4303 }
 0xb04   : > { %v5521_v27 = vpop.eup %4305 }
 0xb05   : > { %2546 = vadd.xlane.f32.xlu0 %v5515_v0  ;;  %v5524_v19 = vpop.eup %4307 }
 0xb06   : > { %v5527_v50 = vpop.eup %4309 }
 0xb07   : > { %2552 = vadd.xlane.f32.xlu1 %v5518_v39  ;;  %v5530_v18 = vpop.eup %4311 }
 0xb08   : > { %v5533_v2 = vpop.eup %4313 }
 0xb09   : > { %2542 = vadd.xlane.f32.xlu0 %v5521_v27  ;;  %v5536_v1 = vpop.eup %4315 }
 0xb0a   : > { %v5539_v28 = vpop.eup %4317 }
 0xb0b   : > { %2548 = vadd.xlane.f32.xlu1 %v5524_v19  ;;  %v5542_v42 = vpop.eup %4319 }
 0xb0c   : > { %v5555_v8 = vpop.eup %4321 }
 0xb0d   : > { %2554 = vadd.xlane.f32.xlu0 %v5527_v50  ;;  %v5558_v25 = vpop.eup %4323 }
 0xb0e   : > { %v5561_v34 = vpop.eup %4325 }
 0xb0f   : > { %2560 = vadd.xlane.f32.xlu1 %v5530_v18  ;;  %v5564_v63 = vpop.eup %4327 }
 0xb11   : > { %2550 = vadd.xlane.f32.xlu0 %v5533_v2 }
 0xb13   : > { %2556 = vadd.xlane.f32.xlu1 %v5536_v1 }
 0xb15   : > { %2562 = vadd.xlane.f32.xlu0 %v5539_v28 }
 0xb19   : > { %2558 = vadd.xlane.f32.xlu0 %v5542_v42 }
 0xb24   : > { %295 = vperm.xlu1 %3996, %v245_v56   ;;  %v260_v56 = vld [vmem:[%s5933_s2 + $0xa8] sm:$0xff] }
 0xb2f   : > { %300 = vperm.xlu0 %3995, %v246_v16  }
 0xb48   : > { %2193 = vadd.xlane.f32.xlu1 %v5555_v8 }
 0xb4c   : > { %2532 = vadd.xlane.f32.xlu1 %v5558_v25 }
 0xb4e   : > { %2195 = vadd.xlane.f32.xlu0 %v5561_v34 }
 0xb50   : > { %v2222_v46 = vpop.xlane.xlu1 %2221 }
 0xb51   : > { %4329 = vrcp.f32 %v2222_v46 }
 0xb52   : > { %2534 = vadd.xlane.f32.xlu0 %v5564_v63 }
 0xb54   : > { %v2224_v7 = vpop.xlane.xlu0 %2223 }
 0xb55   : > { %4331 = vrcp.f32 %v2224_v7 }
 0xb58   : > { %v2218_v14 = vpop.xlane.xlu1 %2217  ;;  %v2220_v24 = vpop.xlane.xlu0 %2219 }
 0xb59   : > { %4333 = vrcp.f32 %v2218_v14 }
 0xb5a   : > { %4335 = vrcp.f32 %v2220_v24 }
 0xb5c   : > { %v2214_v61 = vpop.xlane.xlu1 %2213  ;;  %v2216_v45 = vpop.xlane.xlu0 %2215 }
 0xb5d   : > { %365 = vperm.xlu1 %3996, %v259_v52   ;;  %4337 = vrcp.f32 %v2214_v61 }
 0xb5e   : > { %v4330_v59 = vpop.eup %4329  ;;  %4339 = vrcp.f32 %v2216_v45 }
 0xb5f   : > { %v2255_v13 = vmul.f32 %v4330_v59, %v5420_v55 }
 0xb60   : > { %v2210_v62 = vpop.xlane.xlu1 %2209  ;;  %v2212_v60 = vpop.xlane.xlu0 %2211 }
 0xb61   : > { %335 = vperm.xlu1 %3996, %v253_v58   ;;  %4341 = vrcp.f32 %v2210_v62 }
 0xb62   : > { %v4332_v26 = vpop.eup %4331  ;;  %4343 = vrcp.f32 %v2212_v60 }
 0xb63   : > { %v2256_v6 = vmul.f32 %v4332_v26, %v5425_v35 }
 0xb64   : > { %v2206_v40 = vpop.xlane.xlu1 %2205  ;;  %v2208_v12 = vpop.xlane.xlu0 %2207 }
 0xb65   : > { %340 = vperm.xlu1 %3996, %v254_v9   ;;  %v2264_v38 = vpack.c.bf16 %v2256_v6, %v2255_v13  ;;  %4345 = vrcp.f32 %v2206_v40 }
 0xb66   : > { %v4334_v16 = vpop.eup %4333  ;;  %4347 = vrcp.f32 %v2208_v12 }
 0xb67   : > { %v4336_v57 = vpop.eup %4335  ;;  %3843 = vmatpush3.bf16.xpose.msra.mxu1 %v2264_v38  ;;  %v2253_v55 = vmul.f32 %v4334_v16, %v5433_v10 }
 0xb68   : > { %370 = vperm.xlu0 %3995, %v260_v56   ;;  %3844 = vmatprep.subr.bf16.mxu1 %v5945_v15  ;;  %v2254_v35 = vmul.f32 %v4336_v57, %v5430_v11  ;;  %v2202_v10 = vpop.xlane.xlu1 %2201 }
 0xb69   : > { %4349 = vrcp.f32 %v2202_v10 }
 0xb6a   : > { %v4338_v44 = vpop.eup %4337  ;;  %v2263_v51 = vpack.c.bf16 %v2254_v35, %v2253_v55 }
 0xb6b   : > { %v4340_v54 = vpop.eup %4339  ;;  %v2251_v30 = vmul.f32 %v4338_v44, %v5441_v48 }
 0xb6c   : > { %v2252_v37 = vmul.f32 %v4340_v54, %v5439_v23 }
 0xb6e   : > { %v4342_v33 = vpop.eup %4341  ;;  %v2262_v5 = vpack.c.bf16 %v2252_v37, %v2251_v30 }
 0xb6f   : > { %3845 = vmatpush3.bf16.xpose.msra.mxu1 %v2263_v51  ;;  %v4344_v49 = vpop.eup %4343  ;;  %v2249_v11 = vmul.f32 %v4342_v33, %v5449_v32 }
 0xb70   : > { %3846 = vmatprep.subr.bf16.mxu1 %v5945_v15  ;;  %v2250_v46 = vmul.f32 %v4344_v49, %v5447_v47  ;;  %v5946_v49 = vld [vmem:[#allocation3_spill] sm:$0xff] }
 0xb72   : > { %v4346_v14 = vpop.eup %4345  ;;  %v2261_v24 = vpack.c.bf16 %v2250_v46, %v2249_v11 }
 0xb73   : > { %v4348_v52 = vpop.eup %4347  ;;  %v2247_v23 = vmul.f32 %v4346_v14, %v5457_v17 }
 0xb74   : > { %v2248_v61 = vmul.f32 %v4348_v52, %v5455_v20 }
 0xb76   : > { %v2260_v32 = vpack.c.bf16 %v2248_v61, %v2247_v23  ;;  %v4350_v47 = vpop.eup %4349 }
 0xb77   : > { %3847 = vmatpush3.bf16.xpose.msra.mxu1 %v2262_v5  ;;  %v2245_v17 = vmul.f32 %v4350_v47, %v5465_v31 }
 0xb78   : > { %3848 = vmatprep.subr.bf16.mxu1 %v5945_v15 }
 0xb7a   : > { %v2204_v7 = vpop.xlane.xlu0 %2203 }
 0xb7b   : > { %4351 = vrcp.f32 %v2204_v7 }
 0xb7f   : > { %3849 = vmatpush3.bf16.xpose.msra.mxu1 %v2261_v24 }
 0xb80   : > { %v2198_v48 = vpop.xlane.xlu1 %2197  ;;  %3850 = vmatprep.subr.bf16.mxu1 %v5945_v15 }
 0xb81   : > { %4353 = vrcp.f32 %v2198_v48 }
 0xb84   : > { %v5593_v45 = vpop.xlane.xlu1 %2536 }
 0xb86   : > { %v2200_v58 = vpop.xlane.xlu0 %2199 }
 0xb87   : > { %4355 = vrcp.f32 %v2200_v58  ;;  %3851 = vmatpush3.bf16.xpose.msra.mxu1 %v2260_v32 }
 0xb88   : > { %v4352_v59 = vpop.eup %4351  ;;  %v2545_v26 = vpop.xlane.xlu1 %2544  ;;  %3852 = vmatprep.subr.bf16.mxu1 %v5945_v15 }
 0xb89   : > { %v2246_v9 = vmul.f32 %v4352_v59, %v5479_v41 }
 0xb8a   : > { %v5597_v13 = vpop.xlane.xlu0 %2538 }
 0xb8b   : > { %v2259_v20 = vpack.c.bf16 %v2246_v9, %v2245_v17 }
 0xb8c   : > { %v5600_v6 = vpop.xlane.xlu1 %2540 }
 0xb8e   : > { %v2547_v62 = vpop.xlane.xlu0 %2546  ;;  %v4354_v56 = vpop.eup %4353 }
 0xb8f   : > { %3853 = vmatpush3.bf16.xpose.msra.mxu1 %v2259_v20  ;;  %v2243_v55 = vmul.f32 %v4354_v56, %v5485_v3 }
 0xb90   : > { %v2553_v38 = vpop.xlane.xlu1 %2552  ;;  %3854 = vmatprep.subr.bf16.mxu1 %v5945_v15 }
 0xb92   : > { %v2543_v16 = vpop.xlane.xlu0 %2542 }
 0xb94   : > { %v4356_v60 = vpop.eup %4355  ;;  %v2549_v57 = vpop.xlane.xlu1 %2548 }
 0xb95   : > { %v2244_v41 = vmul.f32 %v4356_v60, %v5497_v43 }
 0xb96   : > { %v2555_v35 = vpop.xlane.xlu0 %2554 }
 0xb97   : > { %v2258_v44 = vpack.c.bf16 %v2244_v41, %v2243_v55 }
 0xb98   : > { %v2561_v40 = vpop.xlane.xlu1 %2560 }
 0xb99   : > { %3855 = vmatpush3.bf16.xpose.msra.mxu1 %v2258_v44  ;;  %4357 = vrcp.f32 %v2561_v40 }
 0xb9a   : > { %v2551_v31 = vpop.xlane.xlu0 %2550  ;;  %3856 = vmatprep.subr.bf16.mxu1 %v5945_v15 }
 0xb9c   : > { %v2557_v51 = vpop.xlane.xlu1 %2556 }
 0xb9e   : > { %v2563_v54 = vpop.xlane.xlu0 %2562 }
 0xb9f   : > { %4359 = vrcp.f32 %v2563_v54 }
 0xba0   : > { %v296_v12 = vpop.permute.xlu1 %295 }
 0xba1   : > { %v539_v30 = vadd.f32 %v4632_v29, %v296_v12 }
 0xba2   : > { %v2559_v37 = vpop.xlane.xlu0 %2558 }
 0xba3   : > { %v2647_v33 = vmul.f32 0.35355338, %v539_v30  ;;  %4361 = vrcp.f32 %v2559_v37 }
 0xba4   : > { %4363 = vrcp.f32 %v2557_v51 }
 0xba5   : > { %v2648_v3 = vpack.c.bf16 %v2647_v33, %v2647_v33  ;;  %4365 = vrcp.f32 %v2555_v35 }
 0xba6   : > { %v4358_v43 = vpop.eup %4357  ;;  %4367 = vrcp.f32 %v2553_v38 }
 0xba7   : > { %2651 = vxpose.xlu0.c.b16.start.end [1/1] (short) %v2648_v3, 128  ;;  %v2594_v7 = vmul.f32 %v4358_v43, %v5530_v18  ;;  %4369 = vrcp.f32 %v2551_v31  ;;  %v5947_v31 = vld [vmem:[#allocation4_spill] sm:$0xff]  ;;  %v5948_v43 = vld [vmem:[#allocation5_spill] sm:$0xff] }
 0xba8   : > { %4371 = vrcp.f32 %v2549_v57 }
 0xba9   : > { %4373 = vrcp.f32 %v2547_v62 }
 0xbaa   : > { %v301_v5 = vpop.permute.xlu0 %300  ;;  %4375 = vrcp.f32 %v2545_v26 }
 0xbab   : > { %v542_v10 = vadd.f32 %v5946_v49, %v301_v5  ;;  %4377 = vrcp.f32 %v2543_v16 }
 0xbac   : > { %v4360_v11 = vpop.eup %4359  ;;  %4379 = vrcp.f32 %v5600_v6 }
 0xbad   : > { %v2986_v46 = vmul.f32 0.35355338, %v542_v10  ;;  %v2595_v14 = vmul.f32 %v4360_v11, %v5539_v28  ;;  %4381 = vrcp.f32 %v5597_v13  ;;  %v5949_v10 = vld [vmem:[#allocation7_spill] sm:$0xff] }
 0xbae   : > { %4383 = vrcp.f32 %v5593_v45 }
 0xbaf   : > { %v2987_v24 = vpack.c.bf16 %v2986_v46, %v2986_v46  ;;  %v2603_v29 = vpack.c.bf16 %v2595_v14, %v2594_v7  ;;  %v5950_v14 = vld [vmem:[#allocation9_spill] sm:$0xff] }
 0xbb0   : > { %v4362_v52 = vpop.eup %4361 }
 0xbb1   : > { %3881 = vmatpush3.bf16.xpose.msra.mxu0 %v2603_v29  ;;  %2990 = vxpose.xlu1.c.b16.start.end [1/1] (short) %v2987_v24, 128  ;;  %v4364_v48 = vpop.eup %4363  ;;  %v2593_v23 = vmul.f32 %v4362_v52, %v5542_v42 }
 0xbb2   : > { %3882 = vmatprep.subr.bf16.mxu0 %v5945_v15  ;;  %v2592_v61 = vmul.f32 %v4364_v48, %v5536_v1  ;;  %v4366_v58 = vpop.eup %4365 }
 0xbb3   : > { %v4368_v18 = vpop.eup %4367  ;;  %v2591_v28 = vmul.f32 %v4366_v58, %v5527_v50 }
 0xbb4   : > { %v2602_v32 = vpack.c.bf16 %v2593_v23, %v2592_v61  ;;  %v2590_v47 = vmul.f32 %v4368_v18, %v5518_v39  ;;  %v4370_v9 = vpop.eup %4369 }
 0xbb5   : > { %v4372_v17 = vpop.eup %4371  ;;  %v2589_v1 = vmul.f32 %v4370_v9, %v5533_v2 }
 0xbb6   : > { %v2601_v59 = vpack.c.bf16 %v2591_v28, %v2590_v47  ;;  %v2588_v42 = vmul.f32 %v4372_v17, %v5524_v19  ;;  %v4374_v62 = vpop.eup %4373 }
 0xbb7   : > { %v4376_v50 = vpop.eup %4375  ;;  %v2587_v39 = vmul.f32 %v4374_v62, %v5515_v0 }
 0xbb8   : > { %v2600_v20 = vpack.c.bf16 %v2589_v1, %v2588_v42  ;;  %v2586_v26 = vmul.f32 %v4376_v50, %v5502_v36  ;;  %v4378_v2 = vpop.eup %4377 }
 0xbb9   : > { %3883 = vmatpush3.bf16.xpose.msra.mxu0 %v2602_v32  ;;  %v4380_v6 = vpop.eup %4379  ;;  %v2585_v19 = vmul.f32 %v4378_v2, %v5521_v27 }
 0xbba   : > { %3884 = vmatprep.subr.bf16.mxu0 %v5945_v15  ;;  %v2599_v38 = vpack.c.bf16 %v2587_v39, %v2586_v26  ;;  %v2584_v60 = vmul.f32 %v4380_v6, %v5510_v21  ;;  %v4382_v0 = vpop.eup %4381 }
 0xbbb   : > { %v4384_v45 = vpop.eup %4383  ;;  %v2583_v41 = vmul.f32 %v4382_v0, %v5507_v4 }
 0xbbc   : > { %v2598_v57 = vpack.c.bf16 %v2585_v19, %v2584_v60  ;;  %v2582_v27 = vmul.f32 %v4384_v45, %v5492_v22 }
 0xbbe   : > { %v2597_v35 = vpack.c.bf16 %v2583_v41, %v2582_v27 }
 0xbc1   : > { %3885 = vmatpush3.bf16.xpose.msra.mxu0 %v2601_v59 }
 0xbc2   : > { %3886 = vmatprep.subr.bf16.mxu0 %v5945_v15 }
 0xbc9   : > { %3887 = vmatpush3.bf16.xpose.msra.mxu0 %v2600_v20 }
 0xbca   : > { %3888 = vmatprep.subr.bf16.mxu0 %v5945_v15 }
 0xbd1   : > { %v2194_v56 = vpop.xlane.xlu1 %2193  ;;  %3889 = vmatpush3.bf16.xpose.msra.mxu0 %v2599_v38  ;;  %v4524_v38 = vld [vmem:[%s4587_s24 + $0x20] sm:$0xff] }
 0xbd2   : > { %3890 = vmatprep.subr.bf16.mxu0 %v5945_v15  ;;  %4385 = vrcp.f32 %v2194_v56 }
 0xbd5   : > { %v2533_v16 = vpop.xlane.xlu1 %2532 }
 0xbd7   : > { %v2196_v13 = vpop.xlane.xlu0 %2195 }
 0xbd8   : > { %4387 = vrcp.f32 %v2196_v13  ;;  %v4525_v13 = vld [vmem:[%s4587_s24 + $0x28] sm:$0xff] }
 0xbd9   : > { %3891 = vmatpush3.bf16.xpose.msra.mxu0 %v2598_v57  ;;  %4389 = vrcp.f32 %v2533_v16  ;;  %v366_v36 = vpop.permute.xlu1 %365 }
 0xbda   : > { %3892 = vmatprep.subr.bf16.mxu0 %v5945_v15  ;;  %v595_v11 = vadd.f32 %v5949_v10, %v366_v36 }
 0xbdb   : > { %v2535_v55 = vpop.xlane.xlu0 %2534 }
 0xbdc   : > { %4391 = vrcp.f32 %v2535_v55 }
 0xbdd   : > { %v336_v44 = vpop.permute.xlu1 %335 }
 0xbde   : > { %v571_v51 = vadd.f32 %v5947_v31, %v336_v44 }
 0xbdf   : > { %v4386_v21 = vpop.eup %4385 }
 0xbe0   : > { %v2241_v12 = vmul.f32 %v4386_v21, %v5555_v8  ;;  %v2649_v3 = vpack.c.bf16 %v571_v51, %v571_v51 }
 0xbe1   : > { %3893 = vmatpush3.bf16.xpose.msra.mxu0 %v2597_v35  ;;  %v341_v54 = vpop.permute.xlu1 %340 }
 0xbe2   : > { %3894 = vmatprep.subr.bf16.mxu0 %v5945_v15  ;;  %v574_v22 = vadd.f32 %v5948_v43, %v341_v54  ;;  %v2692_v29 = vsel %vm655_vm1, %v2649_v3, 0 }
 0xbe3   : > { %v371_v46 = vpop.permute.xlu0 %370 }
 0xbe4   : > { %v2988_v8 = vpack.c.bf16 %v574_v22, %v574_v22  ;;  %v598_v24 = vadd.f32 %v5950_v14, %v371_v46 }
 0xbe5   : > { %v4388_v40 = vpop.eup %4387 }
 0xbe6   : > { %v2242_v30 = vmul.f32 %v4388_v40, %v5561_v34  ;;  %v4390_v37 = vpop.eup %4389  ;;  %v1972_v34 = vpack.c.bf16 %v595_v11, %v595_v11 }
 0xbe7   : > { %v2580_v5 = vmul.f32 %v4390_v37, %v5558_v25  ;;  %v2311_v25 = vpack.c.bf16 %v598_v24, %v598_v24 }
 0xbe8   : > { %v2257_v33 = vpack.c.bf16 %v2242_v30, %v2241_v12 }
 0xbe9   : > { %v4392_v4 = vpop.eup %4391 }
 0xbea   : > { %3857 = vmatpush3.bf16.xpose.msra.mxu1 %v2257_v33  ;;  %v2581_v49 = vmul.f32 %v4392_v4, %v5564_v63  ;;  %v3031_v63 = vsel %vm655_vm1, %v2988_v8, 0 }
 0xbeb   : > { %3982 = vmatprep.subr.msk.bf16.mxu1 %vm655_vm1, %v2649_v3 }
 0xbec   : > { %v2596_v7 = vpack.c.bf16 %v2581_v49, %v2580_v5 }
 0xbee   : > { %3895 = vmatpush3.bf16.xpose.msra.mxu0 %v2596_v7 }
 0xbef   : > { %3983 = vmatprep.subr.msk.bf16.mxu0 %vm655_vm1, %v2988_v8 }
 0xbf1   : > { %3859 = vmatmul.mubr.bf16.vlgmr.msra.gmra.mxu1 %v1972_v34 }
 0xbf2   : > { %3901 = vmatpush3.bf16.msra.mxu1 %v2692_v29 }
 0xbf3   : > { %3918 = vmatprep.subr.bf16.mxu1 %v5945_v15 }
 0xbf5   : > { %3897 = vmatmul.mubr.bf16.vlgmr.msra.gmra.mxu0 %v2311_v25 }
 0xbf6   : > { %3939 = vmatpush3.bf16.msra.mxu0 %v3031_v63 }
 0xbf7   : > { %3956 = vmatprep.subr.bf16.mxu0 %v5945_v15 }
 0xc09   : > { %v2659_v52 = vpop.trf.xlu0 }
 0xc0a   : > { %3902 = vmatprep.mubr.msk.bf16.mxu1 %vm630_vm2, %v2659_v52 }
 0xc0d   : > { %v2660_v48 = vpop.trf.xlu0 }
 0xc0e   : > { %3903 = vmatmul.mubr.msk.bf16.vlgmr.msra.gmra.mxu1 %vm630_vm2, %v2660_v48 }
 0xc11   : > { %v2661_v23 = vpop.trf.xlu0 }
 0xc12   : > { %3906 = vmatprep.mubr.msk.bf16.mxu1 %vm630_vm2, %v2661_v23 }
 0xc13   : > { %v2998_v61 = vpop.trf.xlu1 }
 0xc14   : > { %3940 = vmatprep.mubr.msk.bf16.mxu0 %vm630_vm2, %v2998_v61 }
 0xc15   : > { %v2662_v32 = vpop.trf.xlu0 }
 0xc16   : > { %3907 = vmatmul.mubr.msk.bf16.gmra.mxu1 %vm630_vm2, %v2662_v32 }
 0xc17   : > { %v2999_v58 = vpop.trf.xlu1 }
 0xc18   : > { %3941 = vmatmul.mubr.msk.bf16.vlgmr.msra.gmra.mxu0 %vm630_vm2, %v2999_v58 }
 0xc19   : > { %v2663_v18 = vpop.trf.xlu0 }
 0xc1a   : > { %3910 = vmatprep.mubr.msk.bf16.mxu1 %vm630_vm2, %v2663_v18 }
 0xc1b   : > { %v3000_v28 = vpop.trf.xlu1 }
 0xc1c   : > { %3944 = vmatprep.mubr.msk.bf16.mxu0 %vm630_vm2, %v3000_v28 }
 0xc1d   : > { %v2664_v47 = vpop.trf.xlu0 }
 0xc1e   : > { %3911 = vmatmul.mubr.msk.bf16.gmra.mxu1 %vm630_vm2, %v2664_v47 }
 0xc1f   : > { %v3001_v59 = vpop.trf.xlu1 }
 0xc20   : > { %3945 = vmatmul.mubr.msk.bf16.gmra.mxu0 %vm630_vm2, %v3001_v59 }
 0xc21   : > { %v2665_v9 = vpop.trf.xlu0 }
 0xc22   : > { %3914 = vmatprep.mubr.msk.bf16.mxu1 %vm630_vm2, %v2665_v9 }
 0xc23   : > { %v3002_v17 = vpop.trf.xlu1 }
 0xc24   : > { %3948 = vmatprep.mubr.msk.bf16.mxu0 %vm630_vm2, %v3002_v17 }
 0xc25   : > { %v2666_v1 = vpop.trf.xlu0 }
 0xc26   : > { %3915 = vmatmul.mubr.msk.bf16.gmra.mxu1 %vm630_vm2, %v2666_v1 }
 0xc27   : > { %v3003_v42 = vpop.trf.xlu1  ;;  %3934 = vmatprep.mubr.msk.bf16.mxu1 %vm4538_vm3, %v5945_v15 }
 0xc28   : > { %3949 = vmatmul.mubr.msk.bf16.gmra.mxu0 %vm630_vm2, %v3003_v42 }
 0xc2b   : > { %v3004_v20 = vpop.trf.xlu1 }
 0xc2c   : > { %3952 = vmatprep.mubr.msk.bf16.mxu0 %vm630_vm2, %v3004_v20 }
 0xc2f   : > { %v3005_v62 = vpop.trf.xlu1 }
 0xc30   : > { %3953 = vmatmul.mubr.msk.bf16.gmra.mxu0 %vm630_vm2, %v3005_v62 }
 0xc31   : > { %3972 = vmatprep.mubr.msk.bf16.mxu0 %vm4538_vm3, %v5945_v15 }
 0xcb1   : > { %v2299_v50 = vpop.f32.mrf.mxu1 }
 0xcb2   : > { %v2305_v39 = vmul.f32 %v2299_v50, %v4811_v53 }
 0xcb3   : > { %v3860_v26 = vpop.f32.mrf.mxu1 }
 0xcb4   : > { %v2306_v2 = vadd.f32 %v4524_v38, %v2305_v39 }
 0xcb5   : > { %v2302_v56 = vpop.f32.mrf.mxu1  ;;  %v2638_v6 = vpop.f32.mrf.mxu0 }
 0xcb6   : > { %2307 = vst [vmem:[%s4819_s7 + $0x20] sm:$0xff] %v2306_v2  ;;  %v2644_v19 = vmul.f32 %v2638_v6, %v4811_v53 }
 0xcb7   : > { %v3861_v16 = vpop.f32.mrf.mxu1  ;;  %v3898_v60 = vpop.f32.mrf.mxu0 }
 0xcb8   : > { %v2645_v57 = vadd.f32 %v4525_v13, %v2644_v19 }
 0xcb9   : > { %v2641_v0 = vpop.f32.mrf.mxu0 }
 0xcba   : > { %2646 = vst [vmem:[%s4819_s7 + $0x28] sm:$0xff] %v2645_v57 }
 0xcbb   : > { %v3899_v45 = vpop.f32.mrf.mxu0 }
 0xcce   : > { %v5672_v36 = vpop.f32.mrf.mxu1 }
 0xcd0   : > { %v5674_v55 = vpop.f32.mrf.mxu1 }
 0xcd2   : > { %v5676_v41 = vpop.f32.mrf.mxu1 }
 0xcd4   : > { %v5678_v27 = vpop.f32.mrf.mxu1 }
 0xcd6   : > { %v5680_v35 = vpop.f32.mrf.mxu1 }
 0xcd8   : > { %v5682_v44 = vpop.f32.mrf.mxu1  ;;  %v5684_v21 = vpop.f32.mrf.mxu0 }
 0xcda   : > { %v5686_v40 = vpop.f32.mrf.mxu1  ;;  %v5688_v31 = vpop.f32.mrf.mxu0 }
 0xcdc   : > { %v5690_v51 = vpop.f32.mrf.mxu1  ;;  %v5692_v54 = vpop.f32.mrf.mxu0 }
 0xcde   : > { %v5694_v12 = vpop.f32.mrf.mxu1  ;;  %v5696_v30 = vpop.f32.mrf.mxu0 }
 0xce0   : > { %v5698_v37 = vpop.f32.mrf.mxu1  ;;  %v5700_v33 = vpop.f32.mrf.mxu0 }
 0xce2   : > { %v5702_v4 = vpop.f32.mrf.mxu1  ;;  %v5704_v3 = vpop.f32.mrf.mxu0 }
 0xce4   : > { %v5706_v43 = vpop.f32.mrf.mxu1  ;;  %v5708_v22 = vpop.f32.mrf.mxu0 }
 0xce6   : > { %v3916_v5 = vpop.f32.mrf.mxu1  ;;  %v5710_v49 = vpop.f32.mrf.mxu0 }
 0xce7   : > { %2819 = vmax.xlane.f32.xlu0 %v3916_v5 }
 0xce8   : > { %v2776_v10 = vpop.f32.mrf.mxu1  ;;  %v5712_v11 = vpop.f32.mrf.mxu0 }
 0xcea   : > { %v3917_v46 = vpop.f32.mrf.mxu1  ;;  %v5714_v7 = vpop.f32.mrf.mxu0 }
 0xceb   : > { %2821 = vmax.xlane.f32.xlu1 %v3917_v46 }
 0xcec   : > { %v5716_v8 = vpop.f32.mrf.mxu0  ;;  %v2779_v25 = vpop.f32.mrf.mxu1 }
 0xcee   : > { %v5718_v34 = vpop.f32.mrf.mxu0 }
 0xcef   : > { %2815 = vmax.xlane.f32.xlu1 %v2776_v10 }
 0xcf0   : > { %v3954_v14 = vpop.f32.mrf.mxu0 }
 0xcf1   : > { %3158 = vmax.xlane.f32.xlu0 %v3954_v14 }
 0xcf2   : > { %v3115_v24 = vpop.f32.mrf.mxu0 }
 0xcf3   : > { %3154 = vmax.xlane.f32.xlu1 %v3115_v24 }
 0xcf4   : > { %v3955_v29 = vpop.f32.mrf.mxu0 }
 0xcf5   : > { %3160 = vmax.xlane.f32.xlu0 %v3955_v29 }
 0xcf6   : > { %v5722_v63 = vpop.f32.mrf.mxu0 }
 0xcf7   : > { %2811 = vmax.xlane.f32.xlu1 %v5694_v12 }
 0xcf9   : > { %2817 = vmax.xlane.f32.xlu0 %v2779_v25 }
 0xcfb   : > { %3150 = vmax.xlane.f32.xlu1 %v5712_v11 }
 0xcfd   : > { %3156 = vmax.xlane.f32.xlu0 %v5722_v63 }
 0xcff   : > { %2807 = vmax.xlane.f32.xlu1 %v5698_v37 }
 0xd01   : > { %2813 = vmax.xlane.f32.xlu0 %v5702_v4 }
 0xd03   : > { %3146 = vmax.xlane.f32.xlu1 %v5714_v7 }
 0xd05   : > { %3152 = vmax.xlane.f32.xlu0 %v5716_v8 }
 0xd07   : > { %2803 = vmax.xlane.f32.xlu1 %v5680_v35 }
 0xd09   : > { %2809 = vmax.xlane.f32.xlu0 %v5706_v43 }
 0xd0b   : > { %3142 = vmax.xlane.f32.xlu1 %v5700_v33 }
 0xd0d   : > { %3148 = vmax.xlane.f32.xlu0 %v5718_v34 }
 0xd0f   : > { %2799 = vmax.xlane.f32.xlu1 %v5682_v44 }
 0xd11   : > { %2805 = vmax.xlane.f32.xlu0 %v5686_v40 }
 0xd13   : > { %3138 = vmax.xlane.f32.xlu1 %v5704_v3 }
 0xd15   : > { %3144 = vmax.xlane.f32.xlu0 %v5708_v22 }
 0xd17   : > { %2795 = vmax.xlane.f32.xlu1 %v5672_v36 }
 0xd19   : > { %2801 = vmax.xlane.f32.xlu0 %v5690_v51 }
 0xd1b   : > { %3134 = vmax.xlane.f32.xlu1 %v5684_v21 }
 0xd1d   : > { %3140 = vmax.xlane.f32.xlu0 %v5710_v49 }
 0xd1f   : > { %2791 = vmax.xlane.f32.xlu1 %v5674_v55 }
 0xd21   : > { %2797 = vmax.xlane.f32.xlu0 %v5676_v41 }
 0xd23   : > { %3130 = vmax.xlane.f32.xlu1 %v5688_v31 }
 0xd25   : > { %3136 = vmax.xlane.f32.xlu0 %v5692_v54 }
 0xd29   : > { %2793 = vmax.xlane.f32.xlu0 %v5678_v27 }
 0xd2d   : > { %3132 = vmax.xlane.f32.xlu0 %v5696_v30 }
 0xd70   : > { %v2820_v52 = vpop.xlane.xlu0 %2819 }
 0xd71   : > { %v2837_v48 = vsub.f32 %v3916_v5, %v2820_v52 }
 0xd73   : > { %v2867_v23 = vmul.f32 1.442695, %v2837_v48 }
 0xd74   : > { %v2822_v61 = vpop.xlane.xlu1 %2821 }
 0xd75   : > { %4393 = vpow2.f32 %v2867_v23  ;;  %v2838_v32 = vsub.f32 %v3917_v46, %v2822_v61 }
 0xd77   : > { %v2869_v58 = vmul.f32 1.442695, %v2838_v32 }
 0xd78   : > { %v2816_v18 = vpop.xlane.xlu1 %2815 }
 0xd79   : > { %4395 = vpow2.f32 %v2869_v58  ;;  %v2835_v28 = vsub.f32 %v2776_v10, %v2816_v18 }
 0xd7a   : > { %v3159_v47 = vpop.xlane.xlu0 %3158 }
 0xd7b   : > { %v2863_v59 = vmul.f32 1.442695, %v2835_v28  ;;  %v3176_v9 = vsub.f32 %v3954_v14, %v3159_v47 }
 0xd7c   : > { %v3155_v17 = vpop.xlane.xlu1 %3154 }
 0xd7d   : > { %4397 = vpow2.f32 %v2863_v59  ;;  %v3206_v1 = vmul.f32 1.442695, %v3176_v9  ;;  %v3174_v42 = vsub.f32 %v3115_v24, %v3155_v17 }
 0xd7e   : > { %v3161_v20 = vpop.xlane.xlu0 %3160 }
 0xd7f   : > { %v3177_v62 = vsub.f32 %v3955_v29, %v3161_v20  ;;  %4399 = vpow2.f32 %v3206_v1  ;;  %v3202_v39 = vmul.f32 1.442695, %v3174_v42 }
 0xd80   : > { %v2812_v50 = vpop.xlane.xlu1 %2811 }
 0xd81   : > { %v3208_v26 = vmul.f32 1.442695, %v3177_v62  ;;  %v2833_v38 = vsub.f32 %v5694_v12, %v2812_v50 }
 0xd82   : > { %v5748_v2 = vpop.eup %4393  ;;  %v2818_v56 = vpop.xlane.xlu0 %2817 }
 0xd83   : > { %4401 = vpow2.f32 %v3208_v26  ;;  %v2836_v6 = vsub.f32 %v2779_v25, %v2818_v56  ;;  %2899 = vadd.xlane.f32.xlu1 %v5748_v2  ;;  %v2859_v16 = vmul.f32 1.442695, %v2833_v38 }
 0xd84   : > { %v3151_v19 = vpop.xlane.xlu1 %3150  ;;  %4403 = vpow2.f32 %v3202_v39 }
 0xd85   : > { %v2865_v60 = vmul.f32 1.442695, %v2836_v6  ;;  %v3172_v13 = vsub.f32 %v5712_v11, %v3151_v19 }
 0xd86   : > { %v5752_v57 = vpop.eup %4395  ;;  %v3157_v0 = vpop.xlane.xlu0 %3156 }
 0xd87   : > { %4405 = vpow2.f32 %v2865_v60  ;;  %v3175_v45 = vsub.f32 %v5722_v63, %v3157_v0  ;;  %2901 = vadd.xlane.f32.xlu0 %v5752_v57  ;;  %v3198_v5 = vmul.f32 1.442695, %v3172_v13 }
 0xd88   : > { %v2808_v12 = vpop.xlane.xlu1 %2807  ;;  %4407 = vpow2.f32 %v2859_v16 }
 0xd89   : > { %v3204_v10 = vmul.f32 1.442695, %v3175_v45  ;;  %v2831_v46 = vsub.f32 %v5698_v37, %v2808_v12 }
 0xd8a   : > { %v5757_v14 = vpop.eup %4397  ;;  %v2814_v24 = vpop.xlane.xlu0 %2813 }
 0xd8b   : > { %4409 = vpow2.f32 %v3204_v10  ;;  %v2834_v11 = vsub.f32 %v5702_v4, %v2814_v24  ;;  %2895 = vadd.xlane.f32.xlu1 %v5757_v14  ;;  %v2855_v25 = vmul.f32 1.442695, %v2831_v46 }
 0xd8c   : > { %v3147_v29 = vpop.xlane.xlu1 %3146  ;;  %4411 = vpow2.f32 %v3198_v5  ;;  %v5762_v48 = vpop.eup %4399 }
 0xd8d   : > { %v2861_v63 = vmul.f32 1.442695, %v2834_v11  ;;  %v3170_v52 = vsub.f32 %v5714_v7, %v3147_v29 }
 0xd8e   : > { %v3153_v23 = vpop.xlane.xlu0 %3152 }
 0xd8f   : > { %4413 = vpow2.f32 %v2861_v63  ;;  %v3173_v37 = vsub.f32 %v5716_v8, %v3153_v23  ;;  %3238 = vadd.xlane.f32.xlu1 %v5762_v48  ;;  %v3194_v4 = vmul.f32 1.442695, %v3170_v52 }
 0xd90   : > { %v5766_v61 = vpop.eup %4401  ;;  %v2804_v32 = vpop.xlane.xlu1 %2803  ;;  %4415 = vpow2.f32 %v2855_v25 }
 0xd91   : > { %v3200_v58 = vmul.f32 1.442695, %v3173_v37  ;;  %v2829_v18 = vsub.f32 %v5680_v35, %v2804_v32  ;;  %3240 = vadd.xlane.f32.xlu0 %v5766_v61  ;;  %v5770_v28 = vpop.eup %4403 }
 0xd92   : > { %v2810_v7 = vpop.xlane.xlu0 %2809 }
 0xd93   : > { %4417 = vpow2.f32 %v3200_v58  ;;  %v2832_v47 = vsub.f32 %v5706_v43, %v2810_v7  ;;  %3234 = vadd.xlane.f32.xlu1 %v5770_v28  ;;  %v2851_v9 = vmul.f32 1.442695, %v2829_v18 }
 0xd94   : > { %v5774_v8 = vpop.eup %4405  ;;  %v3143_v59 = vpop.xlane.xlu1 %3142  ;;  %4419 = vpow2.f32 %v3194_v4 }
 0xd95   : > { %v2857_v17 = vmul.f32 1.442695, %v2832_v47  ;;  %v3168_v1 = vsub.f32 %v5700_v33, %v3143_v59  ;;  %2897 = vadd.xlane.f32.xlu0 %v5774_v8  ;;  %v5778_v35 = vpop.eup %4407 }
 0xd96   : > { %v3149_v42 = vpop.xlane.xlu0 %3148 }
 0xd97   : > { %4421 = vpow2.f32 %v2857_v17  ;;  %v3171_v20 = vsub.f32 %v5718_v34, %v3149_v42  ;;  %2891 = vadd.xlane.f32.xlu1 %v5778_v35  ;;  %v3190_v50 = vmul.f32 1.442695, %v3168_v1 }
 0xd98   : > { %v5782_v43 = vpop.eup %4409  ;;  %v2800_v62 = vpop.xlane.xlu1 %2799  ;;  %4423 = vpow2.f32 %v2851_v9 }
 0xd99   : > { %v3196_v39 = vmul.f32 1.442695, %v3171_v20  ;;  %v2827_v26 = vsub.f32 %v5682_v44, %v2800_v62  ;;  %3236 = vadd.xlane.f32.xlu0 %v5782_v43  ;;  %v5786_v33 = vpop.eup %4411 }
 0xd9a   : > { %v2806_v38 = vpop.xlane.xlu0 %2805 }
 0xd9b   : > { %4425 = vpow2.f32 %v3196_v39  ;;  %v2830_v56 = vsub.f32 %v5686_v40, %v2806_v38  ;;  %3230 = vadd.xlane.f32.xlu1 %v5786_v33  ;;  %v2847_v19 = vmul.f32 1.442695, %v2827_v26 }
 0xd9c   : > { %v5790_v34 = vpop.eup %4413  ;;  %v3139_v6 = vpop.xlane.xlu1 %3138  ;;  %4427 = vpow2.f32 %v3190_v50 }
 0xd9d   : > { %v2853_v16 = vmul.f32 1.442695, %v2830_v56  ;;  %v3166_v60 = vsub.f32 %v5704_v3, %v3139_v6  ;;  %2893 = vadd.xlane.f32.xlu0 %v5790_v34  ;;  %v5794_v44 = vpop.eup %4415 }
 0xd9e   : > { %v3145_v13 = vpop.xlane.xlu0 %3144 }
 0xd9f   : > { %4429 = vpow2.f32 %v2853_v16  ;;  %v3169_v0 = vsub.f32 %v5708_v22, %v3145_v13  ;;  %2887 = vadd.xlane.f32.xlu1 %v5794_v44  ;;  %v3186_v12 = vmul.f32 1.442695, %v3166_v60 }
 0xda0   : > { %v5798_v40 = vpop.eup %4417  ;;  %v2796_v45 = vpop.xlane.xlu1 %2795  ;;  %4431 = vpow2.f32 %v2847_v19 }
 0xda1   : > { %v3192_v5 = vmul.f32 1.442695, %v3169_v0  ;;  %v2825_v10 = vsub.f32 %v5672_v36, %v2796_v45  ;;  %3232 = vadd.xlane.f32.xlu0 %v5798_v40  ;;  %v5802_v3 = vpop.eup %4419 }
 0xda2   : > { %v2802_v46 = vpop.xlane.xlu0 %2801 }
 0xda3   : > { %4433 = vpow2.f32 %v3192_v5  ;;  %v2828_v24 = vsub.f32 %v5690_v51, %v2802_v46  ;;  %3226 = vadd.xlane.f32.xlu1 %v5802_v3  ;;  %v2843_v29 = vmul.f32 1.442695, %v2825_v10  ;;  %v261_v5 = vld [vmem:[%s5933_s2 + $0xb0] sm:$0xff]  ;;  %v262_v10 = vld [vmem:[%s5933_s2 + $0xb8] sm:$0xff] }
 0xda4   : > { %v5806_v22 = vpop.eup %4421  ;;  %v3135_v11 = vpop.xlane.xlu1 %3134  ;;  %4435 = vpow2.f32 %v3186_v12 }
 0xda5   : > { %v2849_v25 = vmul.f32 1.442695, %v2828_v24  ;;  %v3164_v63 = vsub.f32 %v5684_v21, %v3135_v11  ;;  %2889 = vadd.xlane.f32.xlu0 %v5806_v22  ;;  %v5810_v36 = vpop.eup %4423 }
 0xda6   : > { %v3141_v52 = vpop.xlane.xlu0 %3140 }
 0xda7   : > { %4437 = vpow2.f32 %v2849_v25  ;;  %v3167_v23 = vsub.f32 %v5710_v49, %v3141_v52  ;;  %2883 = vadd.xlane.f32.xlu1 %v5810_v36  ;;  %v3182_v32 = vmul.f32 1.442695, %v3164_v63 }
 0xda8   : > { %v5814_v51 = vpop.eup %4425  ;;  %v2792_v37 = vpop.xlane.xlu1 %2791  ;;  %4439 = vpow2.f32 %v2843_v29 }
 0xda9   : > { %v3188_v4 = vmul.f32 1.442695, %v3167_v23  ;;  %v2823_v58 = vsub.f32 %v5674_v55, %v2792_v37  ;;  %3228 = vadd.xlane.f32.xlu0 %v5814_v51  ;;  %v5818_v21 = vpop.eup %4427 }
 0xdaa   : > { %v2798_v18 = vpop.xlane.xlu0 %2797 }
 0xdab   : > { %4441 = vpow2.f32 %v3188_v4  ;;  %v2826_v7 = vsub.f32 %v5676_v41, %v2798_v18  ;;  %3222 = vadd.xlane.f32.xlu1 %v5818_v21  ;;  %v2839_v59 = vmul.f32 1.442695, %v2823_v58 }
 0xdac   : > { %v5822_v49 = vpop.eup %4429  ;;  %v3131_v47 = vpop.xlane.xlu1 %3130  ;;  %4443 = vpow2.f32 %v3182_v32 }
 0xdad   : > { %v2845_v9 = vmul.f32 1.442695, %v2826_v7  ;;  %v3162_v17 = vsub.f32 %v5688_v31, %v3131_v47  ;;  %2885 = vadd.xlane.f32.xlu0 %v5822_v49  ;;  %v5826_v55 = vpop.eup %4431 }
 0xdae   : > { %v3137_v1 = vpop.xlane.xlu0 %3136 }
 0xdaf   : > { %4445 = vpow2.f32 %v2845_v9  ;;  %v3165_v42 = vsub.f32 %v5692_v54, %v3137_v1  ;;  %2879 = vadd.xlane.f32.xlu1 %v5826_v55  ;;  %v3178_v20 = vmul.f32 1.442695, %v3162_v17 }
 0xdb0   : > { %v5830_v41 = vpop.eup %4433  ;;  %4447 = vpow2.f32 %v2839_v59 }
 0xdb1   : > { %v3184_v62 = vmul.f32 1.442695, %v3165_v42  ;;  %3224 = vadd.xlane.f32.xlu0 %v5830_v41  ;;  %v5833_v50 = vpop.eup %4435 }
 0xdb2   : > { %v2794_v31 = vpop.xlane.xlu0 %2793 }
 0xdb3   : > { %4449 = vpow2.f32 %v3184_v62  ;;  %v2824_v39 = vsub.f32 %v5678_v27, %v2794_v31  ;;  %3218 = vadd.xlane.f32.xlu1 %v5833_v50 }
 0xdb4   : > { %v5837_v26 = vpop.eup %4437  ;;  %4451 = vpow2.f32 %v3178_v20 }
 0xdb5   : > { %v2841_v54 = vmul.f32 1.442695, %v2824_v39  ;;  %2881 = vadd.xlane.f32.xlu0 %v5837_v26  ;;  %v5840_v38 = vpop.eup %4439 }
 0xdb6   : > { %v3133_v56 = vpop.xlane.xlu0 %3132 }
 0xdb7   : > { %4453 = vpow2.f32 %v2841_v54  ;;  %v3163_v6 = vsub.f32 %v5696_v30, %v3133_v56  ;;  %2875 = vadd.xlane.f32.xlu1 %v5840_v38 }
 0xdb8   : > { %v5844_v19 = vpop.eup %4441 }
 0xdb9   : > { %v3180_v16 = vmul.f32 1.442695, %v3163_v6  ;;  %3220 = vadd.xlane.f32.xlu0 %v5844_v19  ;;  %v5847_v27 = vpop.eup %4443 }
 0xdbb   : > { %4455 = vpow2.f32 %v3180_v16  ;;  %3214 = vadd.xlane.f32.xlu1 %v5847_v27 }
 0xdbc   : > { %v5850_v60 = vpop.eup %4445 }
 0xdbd   : > { %2877 = vadd.xlane.f32.xlu0 %v5850_v60  ;;  %v5853_v13 = vpop.eup %4447 }
 0xdbf   : > { %2871 = vadd.xlane.f32.xlu1 %v5853_v13 }
 0xdc0   : > { %v5856_v30 = vpop.eup %4449 }
 0xdc1   : > { %3216 = vadd.xlane.f32.xlu0 %v5856_v30  ;;  %v5859_v0 = vpop.eup %4451 }
 0xdc3   : > { %3210 = vadd.xlane.f32.xlu1 %v5859_v0 }
 0xdc4   : > { %v5862_v45 = vpop.eup %4453 }
 0xdc5   : > { %2873 = vadd.xlane.f32.xlu0 %v5862_v45 }
 0xdc8   : > { %v5865_v12 = vpop.eup %4455 }
 0xdc9   : > { %3212 = vadd.xlane.f32.xlu0 %v5865_v12 }
 0xdd4   : > { %375 = vperm.xlu1 %3996, %v261_v5  }
 0xddf   : > { %380 = vperm.xlu0 %3995, %v262_v10  }
 0xe0c   : > { %v2900_v46 = vpop.xlane.xlu1 %2899 }
 0xe0d   : > { %4457 = vrcp.f32 %v2900_v46 }
 0xe10   : > { %v2902_v24 = vpop.xlane.xlu0 %2901 }
 0xe11   : > { %4459 = vrcp.f32 %v2902_v24 }
 0xe14   : > { %v2896_v11 = vpop.xlane.xlu1 %2895 }
 0xe18   : > { %v3239_v29 = vpop.xlane.xlu1 %3238 }
 0xe19   : > { %4461 = vrcp.f32 %v3239_v29 }
 0xe1a   : > { %v3241_v25 = vpop.xlane.xlu0 %3240  ;;  %v4458_v63 = vpop.eup %4457 }
 0xe1b   : > { %4463 = vrcp.f32 %v3241_v25  ;;  %v2933_v32 = vmul.f32 %v4458_v63, %v5748_v2 }
 0xe1c   : > { %v3235_v52 = vpop.xlane.xlu1 %3234  ;;  %4465 = vrcp.f32 %v2896_v11 }
 0xe1e   : > { %v4460_v23 = vpop.eup %4459  ;;  %v2898_v37 = vpop.xlane.xlu0 %2897 }
 0xe1f   : > { %4467 = vrcp.f32 %v2898_v37  ;;  %v2934_v4 = vmul.f32 %v4460_v23, %v5752_v57 }
 0xe20   : > { %v2892_v58 = vpop.xlane.xlu1 %2891  ;;  %4469 = vrcp.f32 %v3235_v52 }
 0xe21   : > { %v2942_v18 = vpack.c.bf16 %v2934_v4, %v2933_v32 }
 0xe22   : > { %v3237_v7 = vpop.xlane.xlu0 %3236 }
 0xe23   : > { %4471 = vrcp.f32 %v3237_v7  ;;  %3919 = vmatpush3.bf16.xpose.msra.mxu1 %v2942_v18 }
 0xe24   : > { %v3231_v47 = vpop.xlane.xlu1 %3230  ;;  %3920 = vmatprep.subr.bf16.mxu1 %v5945_v15  ;;  %4473 = vrcp.f32 %v2892_v58 }
 0xe26   : > { %v4462_v59 = vpop.eup %4461  ;;  %v2894_v9 = vpop.xlane.xlu0 %2893 }
 0xe27   : > { %4475 = vrcp.f32 %v2894_v9  ;;  %v3272_v2 = vmul.f32 %v4462_v59, %v5762_v48 }
 0xe28   : > { %v4464_v17 = vpop.eup %4463  ;;  %v2888_v1 = vpop.xlane.xlu1 %2887  ;;  %4477 = vrcp.f32 %v3231_v47 }
 0xe29   : > { %v3273_v57 = vmul.f32 %v4464_v17, %v5766_v61  ;;  %v4466_v42 = vpop.eup %4465 }
 0xe2a   : > { %v3233_v20 = vpop.xlane.xlu0 %3232  ;;  %v2931_v54 = vmul.f32 %v4466_v42, %v5757_v14 }
 0xe2b   : > { %4479 = vrcp.f32 %v3233_v20  ;;  %v3281_v62 = vpack.c.bf16 %v3273_v57, %v3272_v2 }
 0xe2c   : > { %v4468_v31 = vpop.eup %4467  ;;  %v3227_v39 = vpop.xlane.xlu1 %3226  ;;  %4481 = vrcp.f32 %v2888_v1 }
 0xe2d   : > { %3957 = vmatpush3.bf16.xpose.msra.mxu0 %v3281_v62  ;;  %v2932_v56 = vmul.f32 %v4468_v31, %v5774_v8  ;;  %v4470_v6 = vpop.eup %4469 }
 0xe2e   : > { %v2890_v16 = vpop.xlane.xlu0 %2889  ;;  %3958 = vmatprep.subr.bf16.mxu0 %v5945_v15  ;;  %v3270_v10 = vmul.f32 %v4470_v6, %v5770_v28 }
 0xe2f   : > { %4483 = vrcp.f32 %v2890_v16  ;;  %v2941_v48 = vpack.c.bf16 %v2932_v56, %v2931_v54 }
 0xe30   : > { %v4472_v5 = vpop.eup %4471  ;;  %v2884_v61 = vpop.xlane.xlu1 %2883  ;;  %4485 = vrcp.f32 %v3227_v39 }
 0xe31   : > { %3921 = vmatpush3.bf16.xpose.msra.mxu1 %v2941_v48  ;;  %v3271_v46 = vmul.f32 %v4472_v5, %v5782_v43  ;;  %v4474_v24 = vpop.eup %4473 }
 0xe32   : > { %v3229_v11 = vpop.xlane.xlu0 %3228  ;;  %3922 = vmatprep.subr.bf16.mxu1 %v5945_v15  ;;  %v2929_v25 = vmul.f32 %v4474_v24, %v5778_v35 }
 0xe33   : > { %4487 = vrcp.f32 %v3229_v11  ;;  %v3280_v14 = vpack.c.bf16 %v3271_v46, %v3270_v10 }
 0xe34   : > { %v4476_v8 = vpop.eup %4475  ;;  %v3223_v29 = vpop.xlane.xlu1 %3222  ;;  %4489 = vrcp.f32 %v2884_v61 }
 0xe35   : > { %3959 = vmatpush3.bf16.xpose.msra.mxu0 %v3280_v14  ;;  %v2930_v63 = vmul.f32 %v4476_v8, %v5790_v34  ;;  %v4478_v52 = vpop.eup %4477 }
 0xe36   : > { %v2886_v23 = vpop.xlane.xlu0 %2885  ;;  %3960 = vmatprep.subr.bf16.mxu0 %v5945_v15  ;;  %v3268_v32 = vmul.f32 %v4478_v52, %v5786_v33 }
 0xe37   : > { %4491 = vrcp.f32 %v2886_v23  ;;  %v2940_v28 = vpack.c.bf16 %v2930_v63, %v2929_v25 }
 0xe38   : > { %v4480_v43 = vpop.eup %4479  ;;  %v2880_v37 = vpop.xlane.xlu1 %2879  ;;  %4493 = vrcp.f32 %v3223_v29 }
 0xe39   : > { %3923 = vmatpush3.bf16.xpose.msra.mxu1 %v2940_v28  ;;  %v3269_v4 = vmul.f32 %v4480_v43, %v5798_v40  ;;  %v4482_v58 = vpop.eup %4481 }
 0xe3a   : > { %v3225_v18 = vpop.xlane.xlu0 %3224  ;;  %3924 = vmatprep.subr.bf16.mxu1 %v5945_v15  ;;  %v2927_v47 = vmul.f32 %v4482_v58, %v5794_v44 }
 0xe3b   : > { %4495 = vrcp.f32 %v3225_v18  ;;  %v3279_v35 = vpack.c.bf16 %v3269_v4, %v3268_v32 }
 0xe3c   : > { %v4484_v34 = vpop.eup %4483  ;;  %v3219_v7 = vpop.xlane.xlu1 %3218  ;;  %4497 = vrcp.f32 %v2880_v37 }
 0xe3d   : > { %3961 = vmatpush3.bf16.xpose.msra.mxu0 %v3279_v35  ;;  %v2928_v59 = vmul.f32 %v4484_v34, %v5806_v22  ;;  %v4486_v9 = vpop.eup %4485 }
 0xe3e   : > { %v2882_v17 = vpop.xlane.xlu0 %2881  ;;  %3962 = vmatprep.subr.bf16.mxu0 %v5945_v15  ;;  %v3266_v2 = vmul.f32 %v4486_v9, %v5802_v3 }
 0xe3f   : > { %4499 = vrcp.f32 %v2882_v17  ;;  %v2939_v33 = vpack.c.bf16 %v2928_v59, %v2927_v47  ;;  %v5951_v47 = vld [vmem:[#allocation6_spill] sm:$0xff] }
 0xe40   : > { %v4488_v40 = vpop.eup %4487  ;;  %v2876_v1 = vpop.xlane.xlu1 %2875  ;;  %4501 = vrcp.f32 %v3219_v7 }
 0xe41   : > { %3925 = vmatpush3.bf16.xpose.msra.mxu1 %v2939_v33  ;;  %v3267_v57 = vmul.f32 %v4488_v40, %v5814_v51  ;;  %v4490_v42 = vpop.eup %4489 }
 0xe42   : > { %v3221_v20 = vpop.xlane.xlu0 %3220  ;;  %3926 = vmatprep.subr.bf16.mxu1 %v5945_v15  ;;  %v2925_v31 = vmul.f32 %v4490_v42, %v5810_v36 }
 0xe43   : > { %4503 = vrcp.f32 %v3221_v20  ;;  %v3278_v44 = vpack.c.bf16 %v3267_v57, %v3266_v2  ;;  %v4526_v2 = vld [vmem:[%s4587_s24 + $0x30] sm:$0xff] }
 0xe44   : > { %v4492_v22 = vpop.eup %4491  ;;  %v3215_v62 = vpop.xlane.xlu1 %3214  ;;  %4505 = vrcp.f32 %v2876_v1 }
 0xe45   : > { %3963 = vmatpush3.bf16.xpose.msra.mxu0 %v3278_v44  ;;  %v2926_v39 = vmul.f32 %v4492_v22, %v5822_v49  ;;  %v4494_v54 = vpop.eup %4493 }
 0xe46   : > { %v2878_v56 = vpop.xlane.xlu0 %2877  ;;  %3964 = vmatprep.subr.bf16.mxu0 %v5945_v15  ;;  %v3264_v16 = vmul.f32 %v4494_v54, %v5818_v21 }
 0xe47   : > { %4507 = vrcp.f32 %v2878_v56  ;;  %v2938_v3 = vpack.c.bf16 %v2926_v39, %v2925_v31 }
 0xe48   : > { %v4496_v51 = vpop.eup %4495  ;;  %v2872_v6 = vpop.xlane.xlu1 %2871  ;;  %4509 = vrcp.f32 %v3215_v62  ;;  %v4527_v62 = vld [vmem:[%s4587_s24 + $0x38] sm:$0xff] }
 0xe49   : > { %3927 = vmatpush3.bf16.xpose.msra.mxu1 %v2938_v3  ;;  %v3265_v48 = vmul.f32 %v4496_v51, %v5830_v41  ;;  %v4498_v5 = vpop.eup %4497 }
 0xe4a   : > { %v3217_v61 = vpop.xlane.xlu0 %3216  ;;  %3928 = vmatprep.subr.bf16.mxu1 %v5945_v15  ;;  %v2923_v10 = vmul.f32 %v4498_v5, %v5826_v55 }
 0xe4b   : > { %4511 = vrcp.f32 %v3217_v61  ;;  %v3277_v36 = vpack.c.bf16 %v3265_v48, %v3264_v16 }
 0xe4c   : > { %v4500_v49 = vpop.eup %4499  ;;  %4513 = vrcp.f32 %v2872_v6  ;;  %v3211_v11 = vpop.xlane.xlu1 %3210 }
 0xe4d   : > { %3965 = vmatpush3.bf16.xpose.msra.mxu0 %v3277_v36  ;;  %v2924_v46 = vmul.f32 %v4500_v49, %v5837_v26  ;;  %v4502_v24 = vpop.eup %4501 }
 0xe4e   : > { %v2874_v14 = vpop.xlane.xlu0 %2873  ;;  %3966 = vmatprep.subr.bf16.mxu0 %v5945_v15  ;;  %v3262_v8 = vmul.f32 %v4502_v24, %v5833_v50 }
 0xe4f   : > { %4515 = vrcp.f32 %v2874_v14  ;;  %v2937_v21 = vpack.c.bf16 %v2924_v46, %v2923_v10 }
 0xe50   : > { %v4504_v41 = vpop.eup %4503  ;;  %4517 = vrcp.f32 %v3211_v11  ;;  %v376_v35 = vpop.permute.xlu1 %375 }
 0xe51   : > { %3929 = vmatpush3.bf16.xpose.msra.mxu1 %v2937_v21  ;;  %v3263_v29 = vmul.f32 %v4504_v41, %v5844_v19  ;;  %v4506_v25 = vpop.eup %4505  ;;  %v603_v59 = vadd.f32 %v5951_v47, %v376_v35 }
 0xe52   : > { %v3213_v63 = vpop.xlane.xlu0 %3212  ;;  %3930 = vmatprep.subr.bf16.mxu1 %v5945_v15  ;;  %v2921_v52 = vmul.f32 %v4506_v25, %v5840_v38 }
 0xe53   : > { %4519 = vrcp.f32 %v3213_v63  ;;  %v3276_v55 = vpack.c.bf16 %v3263_v29, %v3262_v8 }
 0xe54   : > { %v4508_v26 = vpop.eup %4507 }
 0xe55   : > { %3967 = vmatpush3.bf16.xpose.msra.mxu0 %v3276_v55  ;;  %v2922_v23 = vmul.f32 %v4508_v26, %v5850_v60  ;;  %v4510_v28 = vpop.eup %4509 }
 0xe56   : > { %3968 = vmatprep.subr.bf16.mxu0 %v5945_v15  ;;  %v3260_v50 = vmul.f32 %v4510_v28, %v5847_v27 }
 0xe57   : > { %v2936_v43 = vpack.c.bf16 %v2922_v23, %v2921_v52 }
 0xe58   : > { %v4512_v37 = vpop.eup %4511 }
 0xe59   : > { %3931 = vmatpush3.bf16.xpose.msra.mxu1 %v2936_v43  ;;  %v3261_v19 = vmul.f32 %v4512_v37, %v5856_v30  ;;  %v4514_v32 = vpop.eup %4513 }
 0xe5a   : > { %3932 = vmatprep.subr.bf16.mxu1 %v5945_v15  ;;  %v2919_v38 = vmul.f32 %v4514_v32, %v5853_v13  ;;  %v381_v9 = vpop.permute.xlu0 %380  ;;  %v2650_v13 = vpack.c.bf16 %v603_v59, %v603_v59 }
 0xe5b   : > { %v3275_v4 = vpack.c.bf16 %v3261_v19, %v3260_v50 }
 0xe5c   : > { %v4516_v58 = vpop.eup %4515 }
 0xe5d   : > { %3969 = vmatpush3.bf16.xpose.msra.mxu0 %v3275_v4  ;;  %v2920_v60 = vmul.f32 %v4516_v58, %v5862_v45  ;;  %v4518_v18 = vpop.eup %4517  ;;  %v5952_v45 = vld [vmem:[#allocation8_spill] sm:$0xff] }
 0xe5e   : > { %3970 = vmatprep.subr.bf16.mxu0 %v5945_v15  ;;  %v3258_v27 = vmul.f32 %v4518_v18, %v5859_v0  ;;  %v606_v33 = vadd.f32 %v5952_v45, %v381_v9 }
 0xe5f   : > { %v2935_v34 = vpack.c.bf16 %v2920_v60, %v2919_v38 }
 0xe60   : > { %v4520_v7 = vpop.eup %4519  ;;  %v2989_v15 = vpack.c.bf16 %v606_v33, %v606_v33 }
 0xe61   : > { %3933 = vmatpush3.bf16.xpose.msra.mxu1 %v2935_v34  ;;  %v3259_v30 = vmul.f32 %v4520_v7, %v5865_v12 }
 0xe63   : > { %v3274_v17 = vpack.c.bf16 %v3259_v30, %v3258_v27 }
 0xe65   : > { %3971 = vmatpush3.bf16.xpose.msra.mxu0 %v3274_v17 }
 0xe68   : > { %3935 = vmatmul.mubr.bf16.vlgmr.msra.gmra.mxu1 %v2650_v13 }
 0xe6c   : > { %3973 = vmatmul.mubr.bf16.vlgmr.msra.gmra.mxu0 %v2989_v15 }
 0xf28   : > { %v2977_v40 = vpop.f32.mrf.mxu1 }
 0xf29   : > { %v2983_v1 = vmul.f32 %v2977_v40, %v4811_v53 }
 0xf2a   : > { %v3936_v0 = vpop.f32.mrf.mxu1 }
 0xf2b   : > { %v2984_v12 = vadd.f32 %v4526_v2, %v2983_v1 }
 0xf2c   : > { %v2980_v57 = vpop.f32.mrf.mxu1  ;;  %v3316_v42 = vpop.f32.mrf.mxu0 }
 0xf2d   : > { %2985 = vst [vmem:[%s4819_s7 + $0x30] sm:$0xff] %v2984_v12  ;;  %v3322_v20 = vmul.f32 %v3316_v42, %v4811_v53 }
 0xf2e   : > { %v3937_v44 = vpop.f32.mrf.mxu1  ;;  %v3974_v22 = vpop.f32.mrf.mxu0 }
 0xf2f   : > { %v3323_v31 = vadd.f32 %v4527_v62, %v3322_v20 }
 0xf30   : > { %v3319_v39 = vpop.f32.mrf.mxu0 }
 0xf31   : > { %3324 = vst [vmem:[%s4819_s7 + $0x38] sm:$0xff] %v3323_v31 }
 0xf32   : > { %v3975_v54 = vpop.f32.mrf.mxu0 }
 0xf33 PF: > { %s15_s17 = sadd.s32 1, %s4534_s17  }
 0xf34   : > { %p12_p4 = scmp.ge.s32.totalorder %s15_s17, 4  }
 0xf36   :  { %14 = sbr.rel (!%p12_p4) target bundleno = 2 (0x2), region = 66 }

</bundles_post_ra>
